<compile_context>
chip_gen: v6e
topology: v6e:2x2x1
jax: 0.10.0
libtpu: 0.0.40
codegen_flags: <defaults>
</compile_context>

<pallas_src>
import functools
import math

import jax
import jax.numpy as jnp
from jax.experimental import pallas as pl
from jax.experimental.pallas import tpu as pltpu


# ----------------------------------------------------------------------------
# Phase decomposition of (2x nearest upsample  ∘  3x3 conv, pad=1)
#
# Output pixel (2a+pi, 2b+pj) reads source pixels (a+ra, b+rb) with the
# offsets / contributing original 3x3 taps below (per parity):
#   parity 0: offset -1 <- tap 0 ;  offset 0 <- taps {1,2}
#   parity 1: offset  0 <- taps {0,1} ;  offset 1 <- tap 2
# ----------------------------------------------------------------------------
_PARITY_TAPS = (
    ((-1, (0,)), (0, (1, 2))),   # parity 0
    ((0, (0, 1)), (1, (2,))),    # parity 1
)


def _round_up(x, m):
    return (x + m - 1) // m * m


# ----------------------------------------------------------------------------
# Pallas kernel: fused upsample + 3x3 conv + folded BN + ReLU
#   x_ref : (1, H+2, W+2, Cin)  bf16   (spatially zero-padded source image)
#   w_ref : (4, 4*Cin, Coutp)   bf16   (per-phase pre-summed, scale-folded W)
#   b_ref : (1, Coutp)          f32    (folded BN/bias shift)
#   o_ref : (4, H*W, Coutp)     f32    (phase-major, spatially-flat output)
# ----------------------------------------------------------------------------
def _up_conv_kernel(x_ref, w_ref, b_ref, o_ref, *, H, W, Cin):
    shift = b_ref[...]                                       # (1, Coutp) f32

    # The 9 shifted windows of the padded tile, computed once and shared by
    # every parity phase (each is used by up to 4 phases).  Slicing the H axis
    # is free (above the (8,128) tiling); the W-axis offset slice and the
    # (H, W, Cin) -> (H*W, Cin) collapse are cheap in-VMEM relayouts.
    win = {}
    for ra in (-1, 0, 1):
        for rb in (-1, 0, 1):
            win[(ra, rb)] = x_ref[0, pl.ds(1 + ra, H), pl.ds(1 + rb, W), :] \
                .reshape(H * W, Cin)

    for p in range(4):                                       # unrolled at trace
        pi, pj = divmod(p, 2)
        taps = [win[(ra, rb)]
                for (ra, _) in _PARITY_TAPS[pi]
                for (rb, _) in _PARITY_TAPS[pj]]
        # In-VMEM "im2col": (H*W, 4*Cin) bf16 patch (lane-aligned concat).
        patch = jnp.concatenate(taps, axis=-1)
        # MXU: bf16 x bf16 -> f32 accumulate, whole K in one pass.
        y = jnp.dot(patch, w_ref[p], preferred_element_type=jnp.float32)
        # Folded BN shift + ReLU; full-tile aligned store (H*W x Coutp).
        o_ref[p] = jnp.maximum(y + shift, 0.0).astype(o_ref.dtype)


@functools.partial(jax.jit, static_argnames=("cout",))
def up_conv_apply(w, shift, x_nchw, *, cout):
    """Forward of up_conv.  x_nchw: (N, Cin, H, W) f32 -> (N, cout, 2H, 2W) f32."""
    N, Cin, H, W = x_nchw.shape
    Coutp = w.shape[-1]

    # NCHW -> NHWC, zero-pad spatially by 1 (tiny, one pass), cast bf16 for MXU.
    x = jnp.transpose(x_nchw, (0, 2, 3, 1))
    xp = jnp.pad(x, ((0, 0), (1, 1), (1, 1), (0, 0))).astype(jnp.bfloat16)

    out = pl.pallas_call(
        functools.partial(_up_conv_kernel, H=H, W=W, Cin=Cin),
        out_shape=jax.ShapeDtypeStruct((N * 4, H * W, Coutp), jnp.float32),
        grid_spec=pltpu.PrefetchScalarGridSpec(
            num_scalar_prefetch=0,
            grid=(N,),
            in_specs=[
                pl.BlockSpec((1, H + 2, W + 2, Cin), lambda b: (b, 0, 0, 0)),
                # Weights / shift: constant block index -> DMA'd once, reused.
                pl.BlockSpec((4, 4 * Cin, Coutp), lambda b: (0, 0, 0)),
                pl.BlockSpec((1, Coutp), lambda b: (0, 0)),
            ],
            out_specs=pl.BlockSpec((4, H * W, Coutp), lambda b: (b, 0, 0)),
        ),
        compiler_params=pltpu.CompilerParams(
            dimension_semantics=("parallel",)),
    )(xp, w, shift)

    # Layout plumbing on the (small) final output: interleave the 4 parity
    # phases into the (2H, 2W) grid and drop the Cout lane padding.
    out = out.reshape(N, 2, 2, H, W, Coutp)          # (n, pi, pj, a, b, c)
    out = out.transpose(0, 3, 1, 4, 2, 5).reshape(N, 2 * H, 2 * W, Coutp)
    out = out[..., :cout]
    return jnp.transpose(out, (0, 3, 1, 2))          # back to NCHW


# ----------------------------------------------------------------------------
# Parameter folding (done ONCE): BN scale into W, phase-summed taps, pad, bf16.
# ----------------------------------------------------------------------------
def fold_up_conv_params(w4, bias, gamma, beta, mean, var, eps=1e-5):
    """w4: (3, 3, cin, cout) HWIO conv weight; returns Pallas-ready params."""
    cin, cout = w4.shape[2], w4.shape[3]
    scale = gamma * jax.lax.rsqrt(var + eps)
    shift = (bias - mean) * scale + beta
    wf = w4 * scale[None, None, None, :]                       # fold BN scale

    coutp = _round_up(cout, 128)                               # lane-dense output
    phases = []
    for pi in (0, 1):
        for pj in (0, 1):
            taps = []
            for (_, dys) in _PARITY_TAPS[pi]:
                for (_, dxs) in _PARITY_TAPS[pj]:
                    wsum = sum(wf[dy, dx] for dy in dys for dx in dxs)  # (cin,cout)
                    taps.append(wsum)
            phases.append(jnp.concatenate(taps, axis=0))        # (4*cin, cout)
    wp = jnp.stack(phases, axis=0)                              # (4, 4*cin, cout)
    wp = jnp.pad(wp, ((0, 0), (0, 0), (0, coutp - cout))).astype(jnp.bfloat16)
    shift_p = jnp.pad(shift, (0, coutp - cout)).reshape(1, coutp).astype(jnp.float32)
    return {"w": wp, "shift": shift_p, "cin": cin, "cout": cout}


def init_up_conv(key, ch_in, ch_out):
    """Deterministic synthetic parameters (Conv bias=True, fresh eval-mode BN)."""
    k = jax.random.split(key, 4)
    w4 = jax.random.normal(k[0], (3, 3, ch_in, ch_out), jnp.float32) / math.sqrt(9 * ch_in)
    bias = 0.01 * jax.random.normal(k[1], (ch_out,), jnp.float32)
    gamma = 1.0 + 0.1 * jax.random.normal(k[2], (ch_out,), jnp.float32)
    beta = 0.05 * jax.random.normal(k[3], (ch_out,), jnp.float32)
    mean = jnp.zeros((ch_out,), jnp.float32)
    var = jnp.ones((ch_out,), jnp.float32)
    raw = dict(w=w4, bias=bias, gamma=gamma, beta=beta, mean=mean, var=var)
    return raw, fold_up_conv_params(w4, bias, gamma, beta, mean, var)


# ----------------------------------------------------------------------------
# Pure-JAX reference (mirrors the PyTorch module exactly, f32 throughout)
# ----------------------------------------------------------------------------
def up_conv_reference(raw, x_nchw, eps=1e-5):
    x = jnp.transpose(x_nchw, (0, 2, 3, 1))
    up = jnp.repeat(jnp.repeat(x, 2, axis=1), 2, axis=2)        # nearest x2
    y = jax.lax.conv_general_dilated(
        up, raw["w"], window_strides=(1, 1), padding=((1, 1), (1, 1)),
        dimension_numbers=("NHWC", "HWIO", "NHWC"))
    y = y + raw["bias"]
    scale = raw["gamma"] * jax.lax.rsqrt(raw["var"] + eps)
    y = (y - raw["mean"]) * scale + raw["beta"]
    y = jnp.maximum(y, 0.0)
    return jnp.transpose(y, (0, 3, 1, 2))


# ----------------------------------------------------------------------------
# Main
# ----------------------------------------------------------------------------
if __name__ == "__main__":
    # Small shapes consistent with up_conv(128, 64) at a 16x16 feature map.
    N, CIN, COUT, H, W = 2, 128, 64, 16, 16

    key = jax.random.PRNGKey(0)
    kx, kp = jax.random.split(key)
    x = jax.random.normal(kx, (N, CIN, H, W), jnp.float32)

    raw, params = init_up_conv(kp, CIN, COUT)

    y = up_conv_apply(params["w"], params["shift"], x, cout=params["cout"])
    y = jax.block_until_ready(y)

    assert y.shape == (N, COUT, 2 * H, 2 * W), y.shape
    assert bool(jnp.all(jnp.isfinite(y)))

    y_ref = jax.block_until_ready(up_conv_reference(raw, x))
    max_err = float(jnp.max(jnp.abs(y - y_ref)))
    assert max_err < 1e-1, f"max_err={max_err}"   # bf16-input tolerance

    print("KERNEL_OK")
</pallas_src>

<mosaic_0001>
module attributes {stable_mosaic.version = 11 : i64} {
  func.func @_up_conv_kernel(%arg0: i32, %arg1: memref<1x18x18x128xbf16, #tpu.memory_space<vmem>>, %arg2: memref<4x512x128xbf16, #tpu.memory_space<vmem>>, %arg3: memref<1x128xf32, #tpu.memory_space<vmem>>, %arg4: memref<4x256x128xf32, #tpu.memory_space<vmem>>) attributes {dimension_semantics = [#tpu.dimension_semantics<parallel>], iteration_bounds = array<i64: 2>, scalar_prefetch = 0 : i64, scratch_operands = 0 : i64, tpu.core_type = #tpu.core_type<tc>, window_params = [{transform_indices = @transform_0, window_bounds = array<i64: 1, 18, 18, 128>}, {pipeline_mode = #tpu.pipeline_mode<synchronous>, transform_indices = @transform_1, window_bounds = array<i64: 4, 512, 128>}, {pipeline_mode = #tpu.pipeline_mode<synchronous>, transform_indices = @transform_2, window_bounds = array<i64: 1, 128>}, {transform_indices = @transform_3, window_bounds = array<i64: 4, 256, 128>}]} {
    %c0 = arith.constant 0 : index
    %c0_0 = arith.constant 0 : index
    %0 = vector.load %arg3[%c0, %c0_0] : memref<1x128xf32, #tpu.memory_space<vmem>>, vector<1x128xf32>
    %c0_1 = arith.constant 0 : index
    %c0_2 = arith.constant 0 : index
    %c0_3 = arith.constant 0 : index
    %c0_4 = arith.constant 0 : index
    %1 = vector.load %arg1[%c0_1, %c0_2, %c0_3, %c0_4] : memref<1x18x18x128xbf16, #tpu.memory_space<vmem>>, vector<1x16x16x128xbf16>
    %2 = vector.shape_cast %1 : vector<1x16x16x128xbf16> to vector<16x16x128xbf16>
    %3 = vector.shape_cast %2 : vector<16x16x128xbf16> to vector<256x128xbf16>
    %c0_5 = arith.constant 0 : index
    %c0_6 = arith.constant 0 : index
    %c1 = arith.constant 1 : index
    %c0_7 = arith.constant 0 : index
    %4 = vector.load %arg1[%c0_5, %c0_6, %c1, %c0_7] : memref<1x18x18x128xbf16, #tpu.memory_space<vmem>>, vector<1x16x16x128xbf16>
    %5 = vector.shape_cast %4 : vector<1x16x16x128xbf16> to vector<16x16x128xbf16>
    %6 = vector.shape_cast %5 : vector<16x16x128xbf16> to vector<256x128xbf16>
    %c0_8 = arith.constant 0 : index
    %c0_9 = arith.constant 0 : index
    %c2 = arith.constant 2 : index
    %c0_10 = arith.constant 0 : index
    %7 = vector.load %arg1[%c0_8, %c0_9, %c2, %c0_10] : memref<1x18x18x128xbf16, #tpu.memory_space<vmem>>, vector<1x16x16x128xbf16>
    %8 = vector.shape_cast %7 : vector<1x16x16x128xbf16> to vector<16x16x128xbf16>
    %9 = vector.shape_cast %8 : vector<16x16x128xbf16> to vector<256x128xbf16>
    %c0_11 = arith.constant 0 : index
    %c1_12 = arith.constant 1 : index
    %c0_13 = arith.constant 0 : index
    %c0_14 = arith.constant 0 : index
    %10 = vector.load %arg1[%c0_11, %c1_12, %c0_13, %c0_14] : memref<1x18x18x128xbf16, #tpu.memory_space<vmem>>, vector<1x16x16x128xbf16>
    %11 = vector.shape_cast %10 : vector<1x16x16x128xbf16> to vector<16x16x128xbf16>
    %12 = vector.shape_cast %11 : vector<16x16x128xbf16> to vector<256x128xbf16>
    %c0_15 = arith.constant 0 : index
    %c1_16 = arith.constant 1 : index
    %c1_17 = arith.constant 1 : index
    %c0_18 = arith.constant 0 : index
    %13 = vector.load %arg1[%c0_15, %c1_16, %c1_17, %c0_18] : memref<1x18x18x128xbf16, #tpu.memory_space<vmem>>, vector<1x16x16x128xbf16>
    %14 = vector.shape_cast %13 : vector<1x16x16x128xbf16> to vector<16x16x128xbf16>
    %15 = vector.shape_cast %14 : vector<16x16x128xbf16> to vector<256x128xbf16>
    %c0_19 = arith.constant 0 : index
    %c1_20 = arith.constant 1 : index
    %c2_21 = arith.constant 2 : index
    %c0_22 = arith.constant 0 : index
    %16 = vector.load %arg1[%c0_19, %c1_20, %c2_21, %c0_22] : memref<1x18x18x128xbf16, #tpu.memory_space<vmem>>, vector<1x16x16x128xbf16>
    %17 = vector.shape_cast %16 : vector<1x16x16x128xbf16> to vector<16x16x128xbf16>
    %18 = vector.shape_cast %17 : vector<16x16x128xbf16> to vector<256x128xbf16>
    %c0_23 = arith.constant 0 : index
    %c2_24 = arith.constant 2 : index
    %c0_25 = arith.constant 0 : index
    %c0_26 = arith.constant 0 : index
    %19 = vector.load %arg1[%c0_23, %c2_24, %c0_25, %c0_26] : memref<1x18x18x128xbf16, #tpu.memory_space<vmem>>, vector<1x16x16x128xbf16>
    %20 = vector.shape_cast %19 : vector<1x16x16x128xbf16> to vector<16x16x128xbf16>
    %21 = vector.shape_cast %20 : vector<16x16x128xbf16> to vector<256x128xbf16>
    %c0_27 = arith.constant 0 : index
    %c2_28 = arith.constant 2 : index
    %c1_29 = arith.constant 1 : index
    %c0_30 = arith.constant 0 : index
    %22 = vector.load %arg1[%c0_27, %c2_28, %c1_29, %c0_30] : memref<1x18x18x128xbf16, #tpu.memory_space<vmem>>, vector<1x16x16x128xbf16>
    %23 = vector.shape_cast %22 : vector<1x16x16x128xbf16> to vector<16x16x128xbf16>
    %24 = vector.shape_cast %23 : vector<16x16x128xbf16> to vector<256x128xbf16>
    %c0_31 = arith.constant 0 : index
    %c2_32 = arith.constant 2 : index
    %c2_33 = arith.constant 2 : index
    %c0_34 = arith.constant 0 : index
    %25 = vector.load %arg1[%c0_31, %c2_32, %c2_33, %c0_34] : memref<1x18x18x128xbf16, #tpu.memory_space<vmem>>, vector<1x16x16x128xbf16>
    %26 = vector.shape_cast %25 : vector<1x16x16x128xbf16> to vector<16x16x128xbf16>
    %27 = vector.shape_cast %26 : vector<16x16x128xbf16> to vector<256x128xbf16>
    %28 = tpu.concatenate %3, %6, %12, %15 in 1 : vector<256x128xbf16>, vector<256x128xbf16>, vector<256x128xbf16>, vector<256x128xbf16> -> vector<256x512xbf16>
    %c0_35 = arith.constant 0 : index
    %c0_36 = arith.constant 0 : index
    %c0_37 = arith.constant 0 : index
    %29 = vector.load %arg2[%c0_35, %c0_36, %c0_37] : memref<4x512x128xbf16, #tpu.memory_space<vmem>>, vector<1x512x128xbf16>
    %30 = vector.shape_cast %29 : vector<1x512x128xbf16> to vector<512x128xbf16>
    %cst = arith.constant dense<0.000000e+00> : vector<256x128xf32>
    %31 = tpu.matmul %28, %30, %cst {dimension_numbers = #tpu.dot_dimension_numbers<[1], [0], [0], [1], [0, 0, 1, 1], [], []>} : vector<256x512xbf16>, vector<512x128xbf16>, vector<256x128xf32> -> vector<256x128xf32>
    %32 = vector.broadcast %0 : vector<1x128xf32> to vector<256x128xf32>
    %33 = arith.addf %31, %32 : vector<256x128xf32>
    %cst_38 = arith.constant 0.000000e+00 : f32
    %34 = vector.broadcast %cst_38 : f32 to vector<256x128xf32>
    %35 = arith.maximumf %33, %34 : vector<256x128xf32>
    %c0_39 = arith.constant 0 : index
    %c0_40 = arith.constant 0 : index
    %c0_41 = arith.constant 0 : index
    %36 = vector.load %arg4[%c0_39, %c0_40, %c0_41] : memref<4x256x128xf32, #tpu.memory_space<vmem>>, vector<1x256x128xf32>
    %37 = vector.shape_cast %36 : vector<1x256x128xf32> to vector<256x128xf32>
    %38 = vector.shape_cast %35 : vector<256x128xf32> to vector<1x256x128xf32>
    tpu.vector_store %arg4[%c0_39, %c0_40, %c0_41], %38 {strides = array<i32>} : memref<4x256x128xf32, #tpu.memory_space<vmem>>, vector<1x256x128xf32>,
    %39 = tpu.concatenate %6, %9, %15, %18 in 1 : vector<256x128xbf16>, vector<256x128xbf16>, vector<256x128xbf16>, vector<256x128xbf16> -> vector<256x512xbf16>
    %c1_42 = arith.constant 1 : index
    %c0_43 = arith.constant 0 : index
    %c0_44 = arith.constant 0 : index
    %40 = vector.load %arg2[%c1_42, %c0_43, %c0_44] : memref<4x512x128xbf16, #tpu.memory_space<vmem>>, vector<1x512x128xbf16>
    %41 = vector.shape_cast %40 : vector<1x512x128xbf16> to vector<512x128xbf16>
    %cst_45 = arith.constant dense<0.000000e+00> : vector<256x128xf32>
    %42 = tpu.matmul %39, %41, %cst_45 {dimension_numbers = #tpu.dot_dimension_numbers<[1], [0], [0], [1], [0, 0, 1, 1], [], []>} : vector<256x512xbf16>, vector<512x128xbf16>, vector<256x128xf32> -> vector<256x128xf32>
    %43 = vector.broadcast %0 : vector<1x128xf32> to vector<256x128xf32>
    %44 = arith.addf %42, %43 : vector<256x128xf32>
    %cst_46 = arith.constant 0.000000e+00 : f32
    %45 = vector.broadcast %cst_46 : f32 to vector<256x128xf32>
    %46 = arith.maximumf %44, %45 : vector<256x128xf32>
    %c1_47 = arith.constant 1 : index
    %c0_48 = arith.constant 0 : index
    %c0_49 = arith.constant 0 : index
    %47 = vector.load %arg4[%c1_47, %c0_48, %c0_49] : memref<4x256x128xf32, #tpu.memory_space<vmem>>, vector<1x256x128xf32>
    %48 = vector.shape_cast %47 : vector<1x256x128xf32> to vector<256x128xf32>
    %49 = vector.shape_cast %46 : vector<256x128xf32> to vector<1x256x128xf32>
    tpu.vector_store %arg4[%c1_47, %c0_48, %c0_49], %49 {strides = array<i32>} : memref<4x256x128xf32, #tpu.memory_space<vmem>>, vector<1x256x128xf32>,
    %50 = tpu.concatenate %12, %15, %21, %24 in 1 : vector<256x128xbf16>, vector<256x128xbf16>, vector<256x128xbf16>, vector<256x128xbf16> -> vector<256x512xbf16>
    %c2_50 = arith.constant 2 : index
    %c0_51 = arith.constant 0 : index
    %c0_52 = arith.constant 0 : index
    %51 = vector.load %arg2[%c2_50, %c0_51, %c0_52] : memref<4x512x128xbf16, #tpu.memory_space<vmem>>, vector<1x512x128xbf16>
    %52 = vector.shape_cast %51 : vector<1x512x128xbf16> to vector<512x128xbf16>
    %cst_53 = arith.constant dense<0.000000e+00> : vector<256x128xf32>
    %53 = tpu.matmul %50, %52, %cst_53 {dimension_numbers = #tpu.dot_dimension_numbers<[1], [0], [0], [1], [0, 0, 1, 1], [], []>} : vector<256x512xbf16>, vector<512x128xbf16>, vector<256x128xf32> -> vector<256x128xf32>
    %54 = vector.broadcast %0 : vector<1x128xf32> to vector<256x128xf32>
    %55 = arith.addf %53, %54 : vector<256x128xf32>
    %cst_54 = arith.constant 0.000000e+00 : f32
    %56 = vector.broadcast %cst_54 : f32 to vector<256x128xf32>
    %57 = arith.maximumf %55, %56 : vector<256x128xf32>
    %c2_55 = arith.constant 2 : index
    %c0_56 = arith.constant 0 : index
    %c0_57 = arith.constant 0 : index
    %58 = vector.load %arg4[%c2_55, %c0_56, %c0_57] : memref<4x256x128xf32, #tpu.memory_space<vmem>>, vector<1x256x128xf32>
    %59 = vector.shape_cast %58 : vector<1x256x128xf32> to vector<256x128xf32>
    %60 = vector.shape_cast %57 : vector<256x128xf32> to vector<1x256x128xf32>
    tpu.vector_store %arg4[%c2_55, %c0_56, %c0_57], %60 {strides = array<i32>} : memref<4x256x128xf32, #tpu.memory_space<vmem>>, vector<1x256x128xf32>,
    %61 = tpu.concatenate %15, %18, %24, %27 in 1 : vector<256x128xbf16>, vector<256x128xbf16>, vector<256x128xbf16>, vector<256x128xbf16> -> vector<256x512xbf16>
    %c3 = arith.constant 3 : index
    %c0_58 = arith.constant 0 : index
    %c0_59 = arith.constant 0 : index
    %62 = vector.load %arg2[%c3, %c0_58, %c0_59] : memref<4x512x128xbf16, #tpu.memory_space<vmem>>, vector<1x512x128xbf16>
    %63 = vector.shape_cast %62 : vector<1x512x128xbf16> to vector<512x128xbf16>
    %cst_60 = arith.constant dense<0.000000e+00> : vector<256x128xf32>
    %64 = tpu.matmul %61, %63, %cst_60 {dimension_numbers = #tpu.dot_dimension_numbers<[1], [0], [0], [1], [0, 0, 1, 1], [], []>} : vector<256x512xbf16>, vector<512x128xbf16>, vector<256x128xf32> -> vector<256x128xf32>
    %65 = vector.broadcast %0 : vector<1x128xf32> to vector<256x128xf32>
    %66 = arith.addf %64, %65 : vector<256x128xf32>
    %cst_61 = arith.constant 0.000000e+00 : f32
    %67 = vector.broadcast %cst_61 : f32 to vector<256x128xf32>
    %68 = arith.maximumf %66, %67 : vector<256x128xf32>
    %c3_62 = arith.constant 3 : index
    %c0_63 = arith.constant 0 : index
    %c0_64 = arith.constant 0 : index
    %69 = vector.load %arg4[%c3_62, %c0_63, %c0_64] : memref<4x256x128xf32, #tpu.memory_space<vmem>>, vector<1x256x128xf32>
    %70 = vector.shape_cast %69 : vector<1x256x128xf32> to vector<256x128xf32>
    %71 = vector.shape_cast %68 : vector<256x128xf32> to vector<1x256x128xf32>
    tpu.vector_store %arg4[%c3_62, %c0_63, %c0_64], %71 {strides = array<i32>} : memref<4x256x128xf32, #tpu.memory_space<vmem>>, vector<1x256x128xf32>,
    return
  }
  func.func @transform_0(%arg0: i32) -> (i32, i32, i32, i32) {
    %c0_i32 = arith.constant 0 : i32
    %c0_i32_0 = arith.constant 0 : i32
    %c0_i32_1 = arith.constant 0 : i32
    %c0_i32_2 = arith.constant 0 : i32
    return %arg0, %c0_i32, %c0_i32_0, %c0_i32_1 : i32, i32, i32, i32
  }
  func.func @transform_1(%arg0: i32) -> (i32, i32, i32) {
    %c0_i32 = arith.constant 0 : i32
    %c0_i32_0 = arith.constant 0 : i32
    %c0_i32_1 = arith.constant 0 : i32
    %c0_i32_2 = arith.constant 0 : i32
    return %c0_i32, %c0_i32_0, %c0_i32_1 : i32, i32, i32
  }
  func.func @transform_2(%arg0: i32) -> (i32, i32) {
    %c0_i32 = arith.constant 0 : i32
    %c0_i32_0 = arith.constant 0 : i32
    %c0_i32_1 = arith.constant 0 : i32
    return %c0_i32, %c0_i32_0 : i32, i32
  }
  func.func @transform_3(%arg0: i32) -> (i32, i32, i32) {
    %c0_i32 = arith.constant 0 : i32
    %c0_i32_0 = arith.constant 0 : i32
    %c0_i32_1 = arith.constant 0 : i32
    return %arg0, %c0_i32, %c0_i32_0 : i32, i32, i32
  }
}

</mosaic_0001>

<bundles_post_ra>
// kernel: up_conv_apply.1
= control target key start
LH: loop header
LB: loop body
LE: loop exit
PB: predicated region body
PF: predicated region fallthrough
CT: control target
= control target key end

     0   :  { %s7224_s12 = smov 0   ;;  %s9388_s0 = inlined_call_operand.vmem [shape: bf16[2,18,18,128], index: 0, kind: input, shape index: {}]   ;;  %s9389_s1 = inlined_call_operand.vmem [shape: bf16[4,512,128], index: 1, kind: input, shape index: {}]   ;;  %s9390_s2 = inlined_call_operand.vmem [shape: f32[1,128], index: 2, kind: input, shape index: {}]   ;;  %s9391_s3 = inlined_call_operand.vmem [shape: f32[8,256,128], index: 3, kind: output, shape index: {}]  }
   0x1 LB: > { %s7230_s13 = sadd.s32 4294967295, %s7202_s12   ;;  %p5274_p0 = scmp.ge.s32.totalorder %s7202_s12, 1  ;;  %s7202_s12 = sphi %s7224_s12, %s13_s12  }
   0x2   : > { %p137_p1 = scmp.lt.s32.totalorder %s7202_s12, 3 }
   0x4   : > { %p138_p2 = pnand %p5274_p0, %p137_p1 }
   0x6   : > { %141 = sbr.rel (%p138_p2) target bundleno = 764 (0x2fc), region = 32 }
   0xb   : > { %v6924_v0 = vld [vmem:[%s9389_s1 + $0x78] sm:$0xff]   ;;  %v6928_v4 = vld [vmem:[%s9389_s1 + $0x70] sm:$0xff]   ;;  %v6932_v8 = vld [vmem:[%s9389_s1 + $0x68] sm:$0xff]   ;;  %p162_p3 = scmp.lt.s32.totalorder %s7230_s13, 1  ;;  %vm224_vm0 = vsmask.f32 3328 }
   0xc   : > { %v6925_v1 = vld [vmem:[%s9389_s1 + $0xf8] sm:$0xff]   ;;  %6019 = vmatprep.subr.bf16.mxu0 %v6924_v0  ;;  %v6929_v5 = vld [vmem:[%s9389_s1 + $0xf0] sm:$0xff]   ;;  %v6933_v9 = vld [vmem:[%s9389_s1 + $0xe8] sm:$0xff]   ;;  %vm225_vm1 = vsmask.f32 7440  ;;  %vm675_vm3 = vcmask 1042432  }
   0xd   : > { %v6926_v2 = vld [vmem:[%s9389_s1 + $0x38] sm:$0xff]   ;;  %6131 = vmatprep.subr.bf16.mxu1 %v6925_v1  ;;  %v6930_v6 = vld [vmem:[%s9389_s1 + $0x30] sm:$0xff]   ;;  %v6934_v10 = vld [vmem:[%s9389_s1 + $0x28] sm:$0xff]   ;;  %s163_s6 = scalar_select %p162_p3, %s7230_s13, 1  ;;  %vm676_vm4 = vcmask 1046532  }
   0xe   : > { %v6927_v3 = vld [vmem:[%s9389_s1 + $0xb8] sm:$0xff]   ;;  %6020 = vmatpush3.bf16.msra.mxu0 %v6926_v2  ;;  %v6931_v7 = vld [vmem:[%s9389_s1 + $0xb0] sm:$0xff]   ;;  %v6935_v11 = vld [vmem:[%s9389_s1 + $0xa8] sm:$0xff]   ;;  %s5276_s20 = sshll.u32 %s7230_s13, 2 }
   0xf   : > { %6132 = vmatpush3.bf16.msra.mxu1 %v6927_v3  ;;  %6021 = vmatprep.subr.bf16.mxu0 %v6928_v4  ;;  %v6936_v12 = vld [vmem:[%s9389_s1 + $0x60] sm:$0xff]   ;;  %v6940_v16 = vld [vmem:[%s9389_s1 + $0x58] sm:$0xff]   ;;  %v6944_v20 = vld [vmem:[%s9389_s1 + $0x50] sm:$0xff]   ;;  %s6915_s17 = smul.u32 216, %s163_s6  ;;  %p8253_p4 = scmp.lt.s32.totalorder %s5276_s20, 7 }
  0x10   : > { %6133 = vmatprep.subr.bf16.mxu1 %v6929_v5  ;;  %v6937_v13 = vld [vmem:[%s9389_s1 + $0xe0] sm:$0xff]   ;;  %v6941_v17 = vld [vmem:[%s9389_s1 + $0xd8] sm:$0xff]   ;;  %v6945_v21 = vld [vmem:[%s9389_s1 + $0xd0] sm:$0xff]  }
  0x11   : > { %v6938_v14 = vld [vmem:[%s9389_s1 + $0x20] sm:$0xff]   ;;  %v6942_v18 = vld [vmem:[%s9389_s1 + $0x18] sm:$0xff]   ;;  %v6946_v22 = vld [vmem:[%s9389_s1 + $0x10] sm:$0xff]   ;;  %s7329_s28 = scalar_lea.vmem %s9388_s0, %s6915_s17  ;;  %s9507_s20 = smov (!%p8253_p4, %s5276_s20), 7 }
  0x12   : > { %6022 = vmatpush3.bf16.msra.mxu0 %v6930_v6  ;;  %v6939_v15 = vld [vmem:[%s9389_s1 + $0xa0] sm:$0xff]   ;;  %v6943_v19 = vld [vmem:[%s9389_s1 + $0x98] sm:$0xff]   ;;  %v6947_v23 = vld [vmem:[%s9389_s1 + $0x90] sm:$0xff]   ;;  %s6018_s13 = sshll.u32 %s9507_s20, 8 }
  0x13   : > { %6134 = vmatpush3.bf16.msra.mxu1 %v6931_v7  ;;  %6023 = vmatprep.subr.bf16.mxu0 %v6932_v8  ;;  %v6948_v24 = vld [vmem:[%s9389_s1 + $0x48] sm:$0xff]   ;;  %v6952_v28 = vld [vmem:[%s9389_s1 + $0x40] sm:$0xff]   ;;  %v6958_v41 = vld [vmem:[%s9389_s1 + $0x178] sm:$0xff]   ;;  %s8305_s26 = scalar_lea.vmem %s9391_s3, %s6018_s13 }
  0x14   : > { %6135 = vmatprep.subr.bf16.mxu1 %v6933_v9  ;;  %v6949_v25 = vld [vmem:[%s9389_s1 + $0xc8] sm:$0xff]   ;;  %v6953_v29 = vld [vmem:[%s9389_s1 + $0xc0] sm:$0xff]   ;;  %v5296_v44 = vld [vmem:[%s7329_s28 + $0x10] sm:$0xf] }
  0x15   : > { %v6950_v26 = vld [vmem:[%s9389_s1 + $0x8] sm:$0xff]   ;;  %v6954_v30 = vld [vmem:[%s9389_s1] sm:$0xff]   ;;  %v5327_v45 = vld [vmem:[%s7329_s28 + $0x14] sm:$0x1]  ;;  %v849_v52 = vshll.u32 %v5296_v44, 16  ;;  %v853_v53 = vshrl.u32 %v5296_v44, 16 }
  0x16   : > { %6024 = vmatpush3.bf16.msra.mxu0 %v6934_v10  ;;  %v6951_v27 = vld [vmem:[%s9389_s1 + $0x88] sm:$0xff]   ;;  %v6955_v31 = vld [vmem:[%s9389_s1 + $0x80] sm:$0xff]   ;;  %vm7356_vm2 = vmor %vm224_vm0, %vm225_vm1  ;;  %v859_v57 = vshll.u32 %v5327_v45, 16 }
  0x17   : > { %6136 = vmatpush3.bf16.msra.mxu1 %v6935_v11  ;;  %6025 = vmatprep.subr.bf16.mxu0 %v6936_v12  ;;  %v7338_v32 = vld [vmem:[%s7329_s28] sm:$0xf]  ;;  %v7341_v33 = vld [vmem:[%s7329_s28 + $0x4] sm:$0xf]  ;;  %v208_v34 = vld [vmem:[%s7329_s28 + $0x8] sm:$0x1] }
  0x18   : > { %6137 = vmatprep.subr.bf16.mxu1 %v6937_v13  ;;  %v228_v35 = vshrl.u32 %v7338_v32, 16  ;;  %v231_v36 = vshll.u32 %v7338_v32, 16  ;;  %v237_v37 = vshll.u32 %v7341_v33, 16  ;;  %v241_v38 = vshrl.u32 %v7341_v33, 16  ;;  %v5295_v40 = vld [vmem:[%s7329_s28 + $0xc] sm:$0xf]  ;;  %vm7978_vm5 = vmor %vm675_vm3, %vm676_vm4 }
  0x19   : > { %v247_v39 = vshll.u32 %v208_v34, 16  ;;  %v840_v49 = vshrl.u32 %v5295_v40, 16  ;;  %v843_v51 = vshll.u32 %v5295_v40, 16  ;;  %v851_v60 = vrot.slane %v849_v52, 5  ;;  %v6960_v0 = vld [vmem:[%s9389_s1 + $0x1f8] sm:$0xff]  }
  0x1a   : > { %6026 = vmatpush3.bf16.msra.mxu0 %v6938_v14  ;;  %v230_v42 = vrot.slane %v228_v35, 4  ;;  %v233_v43 = vrot.slane %v231_v36, 5  ;;  %v239_v46 = vrot.slane %v237_v37, 5  ;;  %v243_v47 = vrot.slane %v241_v38, 4  ;;  %v6959_v5 = vld [vmem:[%s9389_s1 + $0x138] sm:$0xff]  }
  0x1b   : > { %6138 = vmatpush3.bf16.msra.mxu1 %v6939_v15  ;;  %6027 = vmatprep.subr.bf16.mxu0 %v6940_v16  ;;  %v249_v48 = vrot.slane %v247_v39, 5  ;;  %v842_v56 = vrot.slane %v840_v49, 4  ;;  %v845_v59 = vrot.slane %v843_v51, 5  ;;  %v855_v61 = vrot.slane %v853_v53, 4  ;;  %v7371_v6 = vld [vmem:[%s7329_s28 + $0xc] sm:$0xf] }
  0x1c   : > { %6139 = vmatprep.subr.bf16.mxu1 %v6941_v17  ;;  %v234_v50 = vor.u32 %v233_v43, %v230_v42  ;;  %v244_v55 = vor.u32 %v243_v47, %v239_v46  ;;  %v861_v63 = vrot.slane %v859_v57, 5  ;;  %v5455_v4 = vcombine.low %v7338_v32, %v7341_v33  ;;  %v7378_v9 = vld [vmem:[%s7329_s28 + $0x10] sm:$0xf]  ;;  %v209_v10 = vld [vmem:[%s7329_s28 + $0x14] sm:$0x1] }
  0x1d   : > { %v846_v2 = vor.u32 %v845_v59, %v842_v56  ;;  %v856_v3 = vor.u32 %v855_v61, %v851_v60  ;;  %v7375_v8 = vcombine.low %v5295_v40, %v5296_v44  ;;  %v252_v11 = vshrl.u32 %v7371_v6, 16  ;;  %v5297_v17 = vld [vmem:[%s7329_s28 + $0x18] sm:$0xf]  ;;  %v7410_v43 = vld [vmem:[%s7329_s28 + $0x1c] sm:$0xf]  ;;  %v6968_v56 = vld [vmem:[%s9389_s1 + $0x1f0] sm:$0xff]  }
  0x1e   : > { %6028 = vmatpush3.bf16.msra.mxu0 %v6942_v18  ;;  %v235_v58 = vrot.slane %v234_v50, 4  ;;  %v245_v62 = vrot.slane %v244_v55, 4  ;;  %v255_v12 = vshll.u32 %v7371_v6, 16  ;;  %v261_v16 = vshll.u32 %v7378_v9, 16  ;;  %v6966_v18 = vld [vmem:[%s9389_s1 + $0x170] sm:$0xff]  }
  0x1f   : > { %6140 = vmatpush3.bf16.msra.mxu1 %v6943_v19  ;;  %6029 = vmatprep.subr.bf16.mxu0 %v6944_v20  ;;  %v847_v14 = vrot.slane %v846_v2, 4  ;;  %v857_v15 = vrot.slane %v856_v3, 4  ;;  %v254_v19 = vrot.slane %v252_v11, 4  ;;  %v867_v35 = vshll.u32 %v5297_v17, 16  ;;  %v7404_v38 = vld [vmem:[%s7329_s28 + $0x18] sm:$0xf] }
  0x20   : > { %6141 = vmatprep.subr.bf16.mxu1 %v6945_v21  ;;  %v240_v1 = vsel %vm7356_vm2, %v235_v58, %v239_v46  ;;  %v250_v7 = vsel %vm7356_vm2, %v245_v62, %v249_v48  ;;  %v257_v20 = vrot.slane %v255_v12, 5  ;;  %v265_v21 = vshrl.u32 %v7378_v9, 16  ;;  %v210_v44 = vld [vmem:[%s7329_s28 + $0x20] sm:$0x1]  ;;  %v5299_v49 = vld [vmem:[%s7329_s28 + $0x24] sm:$0xf] }
  0x21   : > { %v7383_v13 = vcombine.low %v240_v1, %v250_v7  ;;  %v5456_v42 = vcombine.low %v7371_v6, %v7378_v9  ;;  %v869_v45 = vrot.slane %v867_v35, 5  ;;  %v6967_v50 = vld [vmem:[%s9389_s1 + $0x130] sm:$0xff]   ;;  %v276_v55 = vshrl.u32 %v7404_v38, 16  ;;  %v5300_v61 = vld [vmem:[%s7329_s28 + $0x28] sm:$0xf] }
  0x22   : > { %6030 = vmatpush3.bf16.msra.mxu0 %v6946_v22  ;;  %v271_v22 = vshll.u32 %v209_v10, 16  ;;  %v267_v32 = vrot.slane %v265_v21, 4  ;;  %v279_v59 = vshll.u32 %v7404_v38, 16  ;;  %v295_v1 = vshll.u32 %v210_v44, 16  ;;  %v5329_v2 = vld [vmem:[%s7329_s28 + $0x2c] sm:$0x1] }
  0x23   : > { %6142 = vmatpush3.bf16.msra.mxu1 %v6947_v23  ;;  %6031 = vmatprep.subr.bf16.mxu0 %v6948_v24  ;;  %v5298_v23 = vld [vmem:[%s7329_s28 + $0x1c] sm:$0xf]  ;;  %v852_v24 = vsel %vm7356_vm2, %v847_v14, %v851_v60  ;;  %v285_v60 = vshll.u32 %v7410_v43, 16  ;;  %v6969_v3 = vld [vmem:[%s9389_s1 + $0x1b0] sm:$0xff]   ;;  %v6974_v9 = vld [vmem:[%s9389_s1 + $0x168] sm:$0xff]   ;;  %v888_v14 = vshrl.u32 %v5299_v49, 16 }
  0x24   : > { %6143 = vmatprep.subr.bf16.mxu1 %v6949_v25  ;;  %2590 = vmatprep.mubr.bf16.mxu0 %v7383_v13  ;;  %v862_v25 = vsel %vm7356_vm2, %v857_v15, %v861_v63  ;;  %v273_v33 = vrot.slane %v271_v22, 5  ;;  %v873_v36 = vshll.u32 %v5298_v23, 16  ;;  %v877_v37 = vshrl.u32 %v5298_v23, 16  ;;  %v5301_v44 = vld [vmem:[%s7329_s28 + $0x30] sm:$0xf] }
  0x25   : > { %v7414_v48 = vcombine.low %v5297_v17, %v5298_v23  ;;  %v278_v63 = vrot.slane %v276_v55, 4  ;;  %v281_v7 = vrot.slane %v279_v59, 5  ;;  %v287_v10 = vrot.slane %v285_v60, 5 }
  0x26   : > { %6032 = vmatpush3.bf16.msra.mxu0 %v6950_v26  ;;  %v263_v26 = vrot.slane %v261_v16, 5  ;;  %v875_v46 = vrot.slane %v873_v36, 5  ;;  %v879_v47 = vrot.slane %v877_v37, 4  ;;  %v297_v12 = vrot.slane %v295_v1, 5 }
  0x27   : > { %6144 = vmatpush3.bf16.msra.mxu1 %v6951_v27  ;;  %6033 = vmatprep.subr.bf16.mxu0 %v6952_v28  ;;  %v5328_v27 = vld [vmem:[%s7329_s28 + $0x20] sm:$0x1]  ;;  %v864_v28 = vshrl.u32 %v5297_v17, 16  ;;  %9430 = vst [vmem:[#allocation2_spill] sm:$0xff] %v7414_v48  ;;  %v282_v17 = vor.u32 %v281_v7, %v278_v63  ;;  %v890_v22 = vrot.slane %v888_v14, 4  ;;  %v897_v23 = vshll.u32 %v5300_v61, 16 }
  0x28   : > { %6145 = vmatprep.subr.bf16.mxu1 %v6953_v29  ;;  %v7398_v29 = vcombine.low %v852_v24, %v862_v25  ;;  %v268_v40 = vor.u32 %v267_v32, %v263_v26  ;;  %v880_v58 = vor.u32 %v879_v47, %v875_v46  ;;  %v7452_v24 = vld [vmem:[%s7329_s28 + $0x24] sm:$0xf]  ;;  %v6977_v63 = vld [vmem:[%s9389_s1 + $0x1a8] sm:$0xff]  }
  0x29   : > { %v866_v34 = vrot.slane %v864_v28, 4  ;;  %v283_v25 = vrot.slane %v282_v17, 4  ;;  %v907_v28 = vshll.u32 %v5329_v2, 16  ;;  %v899_v32 = vrot.slane %v897_v23, 5  ;;  %v212_v17 = vld [vmem:[%s7329_s28 + $0x38] sm:$0x1] }
  0x2a   : > { %6034 = vmatpush3.bf16.msra.mxu0 %v6954_v30  ;;  %v6961_v30 = vld [vmem:[%s9389_s1 + $0x1b8] sm:$0xff]   ;;  %2751 = vmatprep.mubr.bf16.mxu1 %v7398_v29  ;;  %v269_v52 = vrot.slane %v268_v40, 4  ;;  %v881_v6 = vrot.slane %v880_v58, 4  ;;  %v211_v40 = vld [vmem:[%s7329_s28 + $0x2c] sm:$0x1]  ;;  %v915_v2 = vshll.u32 %v5301_v44, 16 }
  0x2b   : > { %6146 = vmatpush3.bf16.msra.mxu1 %v6955_v31  ;;  %6243 = vmatprep.subr.bf16.mxu0 %v6958_v41  ;;  %v258_v31 = vor.u32 %v257_v20, %v254_v19  ;;  %v883_v41 = vshll.u32 %v5328_v27, 16  ;;  %v870_v57 = vor.u32 %v869_v45, %v866_v34  ;;  %v6975_v19 = vld [vmem:[%s9389_s1 + $0x128] sm:$0xff]   ;;  %v901_v27 = vshrl.u32 %v5300_v61, 16 }
  0x2c   : > { %6355 = vmatprep.subr.bf16.mxu1 %v6960_v0  ;;  %v274_v62 = vsel %vm7356_vm2, %v269_v52, %v273_v33  ;;  %v289_v0 = vshrl.u32 %v7410_v43, 16  ;;  %v5457_v33 = vcombine.low %v7404_v38, %v7410_v43  ;;  %v7460_v34 = vcombine.low %v5299_v49, %v5300_v61  ;;  %v6976_v45 = vld [vmem:[%s9389_s1 + $0x1e8] sm:$0xff]  }
  0x2d   : > { %2591 = vmatmul.mubr.bf16.vlgmr.msra.gmra.mxu0 %v5455_v4  ;;  %v259_v39 = vrot.slane %v258_v31, 4  ;;  %v885_v53 = vrot.slane %v883_v41, 5  ;;  %v288_v35 = vsel %vm7356_vm2, %v283_v25, %v287_v10  ;;  %v903_v37 = vrot.slane %v901_v27, 4  ;;  %v6984_v25 = vld [vmem:[%s9389_s1 + $0x1e0] sm:$0xff]  }
  0x2e   : > { %6244 = vmatpush3.bf16.msra.mxu0 %v6959_v5  ;;  %2752 = vmatmul.mubr.bf16.vlgmr.msra.gmra.mxu1 %v7375_v8  ;;  %v871_v5 = vrot.slane %v870_v57, 4  ;;  %v291_v11 = vrot.slane %v289_v0, 4  ;;  %9431 = vst [vmem:[#allocation3_spill] sm:$0xff] %v7460_v34  ;;  %v303_v38 = vshll.u32 %v7452_v24, 16  ;;  %v5330_v57 = vld [vmem:[%s7329_s28 + $0x38] sm:$0x1] }
  0x2f   : > { %6245 = vmatprep.subr.bf16.mxu0 %v6966_v18  ;;  %6356 = vmatpush3.bf16.msra.mxu1 %v6961_v30  ;;  %v264_v51 = vsel %vm7356_vm2, %v259_v39, %v263_v26  ;;  %v886_v16 = vsel %vm7356_vm2, %v881_v6, %v885_v53  ;;  %v891_v18 = vshll.u32 %v5299_v49, 16  ;;  %v7455_v30 = vld [vmem:[%s7329_s28 + $0x28] sm:$0xf]  ;;  %v909_v39 = vrot.slane %v907_v28, 5 }
  0x30   : > { %6357 = vmatprep.subr.bf16.mxu1 %v6968_v56  ;;  %v7436_v4 = vcombine.low %v264_v51, %v274_v62  ;;  %v876_v15 = vsel %vm7356_vm2, %v871_v5, %v875_v46  ;;  %v292_v21 = vor.u32 %v291_v11, %v287_v10  ;;  %v309_v43 = vshll.u32 %v7455_v30, 16  ;;  %v5302_v51 = vld [vmem:[%s7329_s28 + $0x34] sm:$0xf]  ;;  %v7484_v62 = vld [vmem:[%s7329_s28 + $0x30] sm:$0xf]  ;;  %v6982_v5 = vld [vmem:[%s9389_s1 + $0x160] sm:$0xff]  }
  0x31   : > { %v7449_v20 = vcombine.low %v876_v15, %v886_v16  ;;  %v893_v26 = vrot.slane %v891_v18, 5  ;;  %v904_v49 = vor.u32 %v903_v37, %v899_v32  ;;  %v305_v53 = vrot.slane %v303_v38, 5  ;;  %v7495_v11 = vld [vmem:[%s7329_s28 + $0x34] sm:$0xf]  ;;  %v6983_v18 = vld [vmem:[%s9389_s1 + $0x120] sm:$0xff]  }
  0x32   : > { %6246 = vmatpush3.bf16.msra.mxu0 %v6967_v50  ;;  %2598 = vmatprep.mubr.bf16.mxu0 %v7436_v4  ;;  %v293_v31 = vrot.slane %v292_v21, 4  ;;  %v313_v50 = vshrl.u32 %v7455_v30, 16  ;;  %v311_v55 = vrot.slane %v309_v43, 5  ;;  %v319_v56 = vshll.u32 %v211_v40, 16 }
  0x33   : > { %6358 = vmatpush3.bf16.msra.mxu1 %v6969_v3  ;;  %6247 = vmatprep.subr.bf16.mxu0 %v6974_v9  ;;  %v894_v36 = vor.u32 %v893_v26, %v890_v22  ;;  %v905_v59 = vrot.slane %v904_v49, 4  ;;  %v912_v61 = vshrl.u32 %v5301_v44, 16  ;;  %v921_v3 = vshll.u32 %v5302_v51, 16 }
  0x34   : > { %2759 = vmatprep.mubr.bf16.mxu1 %v7449_v20  ;;  %v298_v41 = vsel %vm7356_vm2, %v293_v31, %v297_v12  ;;  %6359 = vmatprep.subr.bf16.mxu1 %v6976_v45  ;;  %v315_v60 = vrot.slane %v313_v50, 4  ;;  %v321_v1 = vrot.slane %v319_v56, 5  ;;  %v925_v10 = vshrl.u32 %v5302_v51, 16 }
  0x35   : > { %2599 = vmatmul.mubr.bf16.gmra.mxu0 %v5456_v42  ;;  %v300_v42 = vshrl.u32 %v7452_v24, 16  ;;  %v7475_v46 = vcombine.low %v288_v35, %v298_v41  ;;  %v895_v47 = vrot.slane %v894_v36, 4  ;;  %v910_v6 = vsel %vm7356_vm2, %v905_v59, %v909_v39  ;;  %v5303_v36 = vld [vmem:[%s7329_s28 + $0x3c] sm:$0xf] }
  0x36   : > { %6248 = vmatpush3.bf16.msra.mxu0 %v6975_v19  ;;  %2760 = vmatmul.mubr.bf16.gmra.mxu1 %v7414_v48  ;;  %v316_v7 = vor.u32 %v315_v60, %v311_v55  ;;  %v914_v9 = vrot.slane %v912_v61, 4  ;;  %v917_v15 = vrot.slane %v915_v2, 5  ;;  %v923_v16 = vrot.slane %v921_v3, 5  ;;  %v6992_v2 = vld [vmem:[%s9389_s1 + $0x1d8] sm:$0xff]  }
  0x37   : > { %v302_v52 = vrot.slane %v300_v42, 4  ;;  %2606 = vmatprep.mubr.bf16.mxu0 %v7475_v46  ;;  %v900_v58 = vsel %vm7356_vm2, %v895_v47, %v899_v32  ;;  %6360 = vmatpush3.bf16.msra.mxu1 %v6977_v63  ;;  %v927_v21 = vrot.slane %v925_v10, 4  ;;  %v931_v22 = vshll.u32 %v5330_v57, 16  ;;  %v6985_v32 = vld [vmem:[%s9389_s1 + $0x1a0] sm:$0xff]   ;;  %v6990_v42 = vld [vmem:[%s9389_s1 + $0x158] sm:$0xff]  }
  0x38   : > { %v7497_v12 = vcombine.low %v900_v58, %v910_v6  ;;  %6249 = vmatprep.subr.bf16.mxu0 %v6982_v5  ;;  %v317_v19 = vrot.slane %v316_v7, 4  ;;  %v5458_v23 = vcombine.low %v7452_v24, %v7455_v30  ;;  %v918_v27 = vor.u32 %v917_v15, %v914_v9  ;;  %6361 = vmatprep.subr.bf16.mxu1 %v6984_v25  ;;  %v5304_v47 = vld [vmem:[%s7329_s28 + $0x40] sm:$0xf]  ;;  %v6993_v10 = vld [vmem:[%s9389_s1 + $0x198] sm:$0xff]  }
  0x39   : > { %v306_v0 = vor.u32 %v305_v53, %v302_v52  ;;  %v7511_v28 = vcombine.low %v5301_v44, %v5302_v51  ;;  %v324_v31 = vshrl.u32 %v7484_v62, 16  ;;  %v928_v30 = vor.u32 %v927_v21, %v923_v16  ;;  %v5331_v51 = vld [vmem:[%s7329_s28 + $0x44] sm:$0x1]  ;;  %v7548_v9 = vld [vmem:[%s7329_s28 + $0x40] sm:$0xf] }
  0x3a   : > { %2767 = vmatprep.mubr.bf16.mxu1 %v7497_v12  ;;  %6250 = vmatpush3.bf16.msra.mxu0 %v6983_v18  ;;  %v322_v24 = vsel %vm7356_vm2, %v317_v19, %v321_v1  ;;  %v327_v35 = vshll.u32 %v7484_v62, 16  ;;  %v919_v39 = vrot.slane %v918_v27, 4  ;;  %v333_v41 = vshll.u32 %v7495_v11, 16  ;;  %v7542_v1 = vld [vmem:[%s7329_s28 + $0x3c] sm:$0xf]  ;;  %v6998_v19 = vld [vmem:[%s9389_s1 + $0x150] sm:$0xff]  }
  0x3b   : > { %v307_v14 = vrot.slane %v306_v0, 4  ;;  %9432 = vst [vmem:[#allocation4_spill] sm:$0xff] %v7511_v28  ;;  %v326_v40 = vrot.slane %v324_v31, 4  ;;  %6362 = vmatpush3.bf16.msra.mxu1 %v6985_v32  ;;  %v929_v38 = vrot.slane %v928_v30, 4  ;;  %v337_v44 = vshrl.u32 %v7495_v11, 16  ;;  %6251 = vmatprep.subr.bf16.mxu0 %v6990_v42 }
  0x3c   : > { %v329_v43 = vrot.slane %v327_v35, 5  ;;  %v343_v45 = vshll.u32 %v212_v17, 16  ;;  %v924_v49 = vsel %vm7356_vm2, %v919_v39, %v923_v16  ;;  %v335_v50 = vrot.slane %v333_v41, 5  ;;  %v213_v18 = vld [vmem:[%s7329_s28 + $0x44] sm:$0x1]  ;;  %6363 = vmatprep.subr.bf16.mxu1 %v6992_v2 }
  0x3d   : > { %2607 = vmatmul.mubr.bf16.gmra.mxu0 %v5457_v33  ;;  %v312_v26 = vsel %vm7356_vm2, %v307_v14, %v311_v55  ;;  %v933_v33 = vrot.slane %v931_v22, 5  ;;  %v936_v52 = vshrl.u32 %v5303_v36, 16  ;;  %v939_v53 = vshll.u32 %v5303_v36, 16  ;;  %v6991_v55 = vld [vmem:[%s9389_s1 + $0x118] sm:$0xff]   ;;  %v5306_v27 = vld [vmem:[%s7329_s28 + $0x4c] sm:$0xf] }
  0x3e   : > { %2768 = vmatmul.mubr.bf16.gmra.mxu1 %v7460_v34  ;;  %v7522_v37 = vcombine.low %v312_v26, %v322_v24  ;;  %v330_v57 = vor.u32 %v329_v43, %v326_v40  ;;  %v339_v58 = vrot.slane %v337_v44, 4  ;;  %v345_v59 = vrot.slane %v343_v45, 5  ;;  %6252 = vmatpush3.bf16.msra.mxu0 %v6991_v55  ;;  %v5305_v26 = vld [vmem:[%s7329_s28 + $0x48] sm:$0xf]  ;;  %v5332_v30 = vld [vmem:[%s7329_s28 + $0x50] sm:$0x1] }
  0x3f   : > { %v934_v56 = vsel %vm7356_vm2, %v929_v38, %v933_v33  ;;  %v938_v61 = vrot.slane %v936_v52, 4  ;;  %v941_v63 = vrot.slane %v939_v53, 5  ;;  %v945_v0 = vshll.u32 %v5304_v47, 16  ;;  %6364 = vmatpush3.bf16.msra.mxu1 %v6993_v10  ;;  %6253 = vmatprep.subr.bf16.mxu0 %v6998_v19  ;;  %v7000_v53 = vld [vmem:[%s9389_s1 + $0x1d0] sm:$0xff]   ;;  %v7590_v2 = vld [vmem:[%s7329_s28 + $0x48] sm:$0xf] }
  0x40   : > { %2614 = vmatprep.mubr.bf16.mxu0 %v7522_v37  ;;  %v7539_v60 = vcombine.low %v924_v49, %v934_v56  ;;  %v331_v3 = vrot.slane %v330_v57, 4  ;;  %v340_v5 = vor.u32 %v339_v58, %v335_v50  ;;  %v949_v6 = vshrl.u32 %v5304_v47, 16  ;;  %6365 = vmatprep.subr.bf16.mxu1 %v7000_v53  ;;  %v7114_v34 = vld [vmem:[%s7329_s28 + $0x34] sm:$0xf] }
  0x41   : > { %v955_v7 = vshll.u32 %v5331_v51, 16  ;;  %v942_v14 = vor.u32 %v941_v63, %v938_v61  ;;  %v947_v15 = vrot.slane %v945_v0, 5  ;;  %v5459_v16 = vcombine.low %v7484_v62, %v7495_v11  ;;  %v6999_v62 = vld [vmem:[%s9389_s1 + $0x110] sm:$0xff]  }
  0x42   : > { %2775 = vmatprep.mubr.bf16.mxu1 %v7539_v60  ;;  %v7556_v17 = vcombine.low %v5303_v36, %v5304_v47  ;;  %v336_v21 = vsel %vm7356_vm2, %v331_v3, %v335_v50  ;;  %v341_v22 = vrot.slane %v340_v5, 4  ;;  %v348_v31 = vshrl.u32 %v7542_v1, 16  ;;  %6254 = vmatpush3.bf16.msra.mxu0 %v6999_v62  ;;  %v7001_v3 = vld [vmem:[%s9389_s1 + $0x190] sm:$0xff]  }
  0x43   : > { %v957_v25 = vrot.slane %v955_v7, 5  ;;  %v943_v11 = vrot.slane %v942_v14, 4  ;;  %v351_v32 = vshll.u32 %v7542_v1, 16  ;;  %v357_v24 = vshll.u32 %v7548_v9, 16  ;;  %v7596_v14 = vld [vmem:[%s7329_s28 + $0x4c] sm:$0xf]  ;;  %6366 = vmatpush3.bf16.msra.mxu1 %v7001_v3 }
  0x44   : > { %9433 = vst [vmem:[#allocation5_spill] sm:$0xff] %v7556_v17  ;;  %v346_v33 = vsel %vm7356_vm2, %v341_v22, %v345_v59  ;;  %v361_v36 = vshrl.u32 %v7548_v9, 16  ;;  %v367_v39 = vshll.u32 %v213_v18, 16  ;;  %v350_v42 = vrot.slane %v348_v31, 4 }
  0x45   : > { %2615 = vmatmul.mubr.bf16.gmra.mxu0 %v5458_v23  ;;  %v951_v23 = vrot.slane %v949_v6, 4  ;;  %v7577_v40 = vcombine.low %v336_v21, %v346_v33  ;;  %v948_v41 = vsel %vm7356_vm2, %v943_v11, %v947_v15  ;;  %v353_v38 = vrot.slane %v351_v32, 5  ;;  %v214_v21 = vld [vmem:[%s7329_s28 + $0x50] sm:$0x1]  ;;  %v5307_v11 = vld [vmem:[%s7329_s28 + $0x54] sm:$0xf] }
  0x46   : > { %2776 = vmatmul.mubr.bf16.gmra.mxu1 %v7511_v28  ;;  %v359_v44 = vrot.slane %v357_v24, 5  ;;  %v363_v45 = vrot.slane %v361_v36, 4  ;;  %v369_v47 = vrot.slane %v367_v39, 5  ;;  %v960_v50 = vshrl.u32 %v5305_v26, 16 }
  0x47   : > { %v952_v35 = vor.u32 %v951_v23, %v947_v15  ;;  %2622 = vmatprep.mubr.bf16.mxu0 %v7577_v40  ;;  %v354_v49 = vor.u32 %v353_v38, %v350_v42  ;;  %v963_v51 = vshll.u32 %v5305_v26, 16  ;;  %v969_v52 = vshll.u32 %v5306_v27, 16  ;;  %v5333_v42 = vld [vmem:[%s7329_s28 + $0x5c] sm:$0x1] }
  0x48   : > { %v364_v56 = vor.u32 %v363_v45, %v359_v44  ;;  %v973_v57 = vshrl.u32 %v5306_v27, 16  ;;  %v979_v58 = vshll.u32 %v5332_v30, 16  ;;  %v962_v63 = vrot.slane %v960_v50, 4  ;;  %v7630_v50 = vld [vmem:[%s7329_s28 + $0x54] sm:$0xf] }
  0x49   : > { %v953_v43 = vrot.slane %v952_v35, 4  ;;  %v355_v61 = vrot.slane %v354_v49, 4  ;;  %v965_v0 = vrot.slane %v963_v51, 5  ;;  %v971_v6 = vrot.slane %v969_v52, 5  ;;  %v5308_v35 = vld [vmem:[%s7329_s28 + $0x58] sm:$0xf] }
  0x4a   : > { %v365_v5 = vrot.slane %v364_v56, 4  ;;  %v975_v7 = vrot.slane %v973_v57, 4  ;;  %v981_v10 = vrot.slane %v979_v58, 5  ;;  %v5460_v18 = vcombine.low %v7542_v1, %v7548_v9  ;;  %v7633_v51 = vld [vmem:[%s7329_s28 + $0x58] sm:$0xf] }
  0x4b   : > { %v958_v55 = vsel %vm7356_vm2, %v953_v43, %v957_v25  ;;  %v360_v15 = vsel %vm7356_vm2, %v355_v61, %v359_v44  ;;  %v7603_v19 = vcombine.low %v5305_v26, %v5306_v27  ;;  %v372_v25 = vshrl.u32 %v7590_v2, 16  ;;  %v7006_v26 = vld [vmem:[%s9389_s1 + $0x148] sm:$0xff]  }
  0x4c   : > { %v7587_v59 = vcombine.low %v948_v41, %v958_v55  ;;  %v370_v22 = vsel %vm7356_vm2, %v365_v5, %v369_v47  ;;  %v976_v23 = vor.u32 %v975_v7, %v971_v6  ;;  %v375_v62 = vshll.u32 %v7590_v2, 16  ;;  %6255 = vmatprep.subr.bf16.mxu0 %v7006_v26  ;;  %v7007_v43 = vld [vmem:[%s9389_s1 + $0x108] sm:$0xff]  }
  0x4d   : > { %2623 = vmatmul.mubr.bf16.gmra.mxu0 %v5459_v16  ;;  %v966_v16 = vor.u32 %v965_v0, %v962_v63  ;;  %9435 = vst [vmem:[#allocation7_spill] sm:$0xff] %v7603_v19  ;;  %v7612_v31 = vcombine.low %v360_v15, %v370_v22  ;;  %v381_v1 = vshll.u32 %v7596_v14, 16  ;;  %v385_v9 = vshrl.u32 %v7596_v14, 16  ;;  %v215_v0 = vld [vmem:[%s7329_s28 + $0x5c] sm:$0x1] }
  0x4e   : > { %9434 = vst [vmem:[#allocation6_spill] sm:$0xff] %v7587_v59  ;;  %2783 = vmatprep.mubr.bf16.mxu1 %v7587_v59  ;;  %v977_v27 = vrot.slane %v976_v23, 4  ;;  %v374_v24 = vrot.slane %v372_v25, 4  ;;  %v377_v30 = vrot.slane %v375_v62, 5  ;;  %v391_v33 = vshll.u32 %v214_v21, 16  ;;  %6256 = vmatpush3.bf16.msra.mxu0 %v7007_v43  ;;  %v7008_v25 = vld [vmem:[%s9389_s1 + $0x1c8] sm:$0xff]  }
  0x4f   : > { %2784 = vmatmul.mubr.bf16.gmra.mxu1 %v7556_v17  ;;  %v967_v32 = vrot.slane %v966_v16, 4  ;;  %2630 = vmatprep.mubr.bf16.mxu0 %v7612_v31  ;;  %v383_v39 = vrot.slane %v381_v1, 5  ;;  %v387_v41 = vrot.slane %v385_v9, 4  ;;  %v984_v38 = vshrl.u32 %v5307_v11, 16  ;;  %v5310_v9 = vld [vmem:[%s7329_s28 + $0x64] sm:$0xf] }
  0x50   : > { %v982_v44 = vsel %vm7356_vm2, %v977_v27, %v981_v10  ;;  %v378_v45 = vor.u32 %v377_v30, %v374_v24  ;;  %v393_v47 = vrot.slane %v391_v33, 5  ;;  %v987_v49 = vshll.u32 %v5307_v11, 16  ;;  %6367 = vmatprep.subr.bf16.mxu1 %v7008_v25  ;;  %v5334_v43 = vld [vmem:[%s7329_s28 + $0x68] sm:$0x1]  ;;  %v611_v17 = vld [vmem:[%s7329_s28] sm:$0xe] }
  0x51   : > { %v972_v36 = vsel %vm7356_vm2, %v967_v32, %v971_v6  ;;  %v388_v53 = vor.u32 %v387_v41, %v383_v39  ;;  %v986_v55 = vrot.slane %v984_v38, 4  ;;  %v993_v56 = vshll.u32 %v5308_v35, 16  ;;  %v7009_v41 = vld [vmem:[%s9389_s1 + $0x188] sm:$0xff]  }
  0x52   : > { %v7635_v52 = vcombine.low %v972_v36, %v982_v44  ;;  %v379_v57 = vrot.slane %v378_v45, 4  ;;  %v989_v58 = vrot.slane %v987_v49, 5  ;;  %v997_v61 = vshrl.u32 %v5308_v35, 16  ;;  %6368 = vmatpush3.bf16.msra.mxu1 %v7009_v41 }
  0x53   : > { %v1003_v63 = vshll.u32 %v5333_v42, 16  ;;  %v389_v3 = vrot.slane %v388_v53, 4  ;;  %v995_v5 = vrot.slane %v993_v56, 5  ;;  %v5461_v6 = vcombine.low %v7590_v2, %v7596_v14  ;;  %v5309_v14 = vld [vmem:[%s7329_s28 + $0x60] sm:$0xf] }
  0x54   : > { %2791 = vmatprep.mubr.bf16.mxu1 %v7635_v52  ;;  %v7641_v7 = vcombine.low %v5307_v11, %v5308_v35  ;;  %v384_v10 = vsel %vm7356_vm2, %v379_v57, %v383_v39  ;;  %v990_v15 = vor.u32 %v989_v58, %v986_v55  ;;  %v999_v16 = vrot.slane %v997_v61, 4  ;;  %v7672_v57 = vld [vmem:[%s7329_s28 + $0x60] sm:$0xf] }
  0x55   : > { %2631 = vmatmul.mubr.bf16.gmra.mxu0 %v5460_v18  ;;  %v1005_v18 = vrot.slane %v1003_v63, 5  ;;  %v394_v21 = vsel %vm7356_vm2, %v389_v3, %v393_v47  ;;  %v396_v22 = vshrl.u32 %v7630_v50, 16  ;;  %v399_v23 = vshll.u32 %v7630_v50, 16  ;;  %v7014_v47 = vld [vmem:[%s9389_s1 + $0x140] sm:$0xff]  }
  0x56   : > { %9436 = vst [vmem:[#allocation8_spill] sm:$0xff] %v7641_v7  ;;  %v405_v2 = vshll.u32 %v7633_v51, 16  ;;  %v7655_v62 = vcombine.low %v384_v10, %v394_v21  ;;  %v991_v11 = vrot.slane %v990_v15, 4  ;;  %v1000_v32 = vor.u32 %v999_v16, %v995_v5  ;;  %6257 = vmatprep.subr.bf16.mxu0 %v7014_v47  ;;  %v7015_v3 = vld [vmem:[%s9389_s1 + $0x100] sm:$0xff]  }
  0x57   : > { %2792 = vmatmul.mubr.bf16.gmra.mxu1 %v7603_v19  ;;  %v409_v1 = vshrl.u32 %v7633_v51, 16  ;;  %v398_v26 = vrot.slane %v396_v22, 4  ;;  %v401_v27 = vrot.slane %v399_v23, 5  ;;  %v415_v30 = vshll.u32 %v215_v0, 16  ;;  %v7682_v16 = vld [vmem:[%s7329_s28 + $0x64] sm:$0xf]  ;;  %6258 = vmatpush3.bf16.msra.mxu0 %v7015_v3 }
  0x58   : > { %v407_v24 = vrot.slane %v405_v2, 5  ;;  %2638 = vmatprep.mubr.bf16.mxu0 %v7655_v62  ;;  %v996_v33 = vsel %vm7356_vm2, %v991_v11, %v995_v5  ;;  %v1001_v35 = vrot.slane %v1000_v32, 4  ;;  %v1008_v39 = vshrl.u32 %v5309_v14, 16  ;;  %v216_v2 = vld [vmem:[%s7329_s28 + $0x68] sm:$0x1] }
  0x59   : > { %v411_v36 = vrot.slane %v409_v1, 4  ;;  %v402_v42 = vor.u32 %v401_v27, %v398_v26  ;;  %v417_v38 = vrot.slane %v415_v30, 5  ;;  %v1011_v44 = vshll.u32 %v5309_v14, 16 }
  0x5a   : > { %v1017_v45 = vshll.u32 %v5310_v9, 16  ;;  %v1006_v49 = vsel %vm7356_vm2, %v1001_v35, %v1005_v18  ;;  %v1010_v55 = vrot.slane %v1008_v39, 4  ;;  %v1021_v56 = vshrl.u32 %v5310_v9, 16  ;;  %v7016_v18 = vld [vmem:[%s9389_s1 + $0x1c0] sm:$0xff]   ;;  %v7020_v35 = vld [vmem:[%s9389_s1 + $0x278] sm:$0xff]  }
  0x5b   : > { %v412_v53 = vor.u32 %v411_v36, %v407_v24  ;;  %v7674_v58 = vcombine.low %v996_v33, %v1006_v49  ;;  %v403_v61 = vrot.slane %v402_v42, 4  ;;  %v1013_v63 = vrot.slane %v1011_v44, 5  ;;  %6369 = vmatprep.subr.bf16.mxu1 %v7016_v18  ;;  %v5335_v33 = vld [vmem:[%s7329_s28 + $0x74] sm:$0x1]  ;;  %6467 = vmatprep.subr.bf16.mxu0 %v7020_v35 }
  0x5c   : > { %v1019_v0 = vrot.slane %v1017_v45, 5  ;;  %v1027_v10 = vshll.u32 %v5334_v43, 16  ;;  %v5462_v15 = vcombine.low %v7630_v50, %v7633_v51  ;;  %v7690_v23 = vcombine.low %v5309_v14, %v5310_v9  ;;  %v5311_v50 = vld [vmem:[%s7329_s28 + $0x6c] sm:$0xf]  ;;  %v7017_v51 = vld [vmem:[%s9389_s1 + $0x180] sm:$0xff]  }
  0x5d   : > { %2639 = vmatmul.mubr.bf16.gmra.mxu0 %v5461_v6  ;;  %9437 = vst [vmem:[#allocation9_spill] sm:$0xff] %v7674_v58  ;;  %v413_v5 = vrot.slane %v412_v53, 4  ;;  %v1023_v6 = vrot.slane %v1021_v56, 4  ;;  %2799 = vmatprep.mubr.bf16.mxu1 %v7674_v58  ;;  %v408_v21 = vsel %vm7356_vm2, %v403_v61, %v407_v24  ;;  %v1014_v22 = vor.u32 %v1013_v63, %v1010_v55  ;;  %v5312_v9 = vld [vmem:[%s7329_s28 + $0x70] sm:$0xf] }
  0x5e   : > { %9438 = vst [vmem:[#allocation10_spill] sm:$0xff] %v7690_v23  ;;  %v420_v25 = vshrl.u32 %v7672_v57, 16  ;;  %v1029_v1 = vrot.slane %v1027_v10, 5  ;;  %v423_v14 = vshll.u32 %v7672_v57, 16  ;;  %v429_v30 = vshll.u32 %v7682_v16, 16  ;;  %6370 = vmatpush3.bf16.msra.mxu1 %v7017_v51 }
  0x5f   : > { %2800 = vmatmul.mubr.bf16.gmra.mxu1 %v7641_v7  ;;  %v418_v11 = vsel %vm7356_vm2, %v413_v5, %v417_v38  ;;  %v1024_v32 = vor.u32 %v1023_v6, %v1019_v0  ;;  %v1015_v27 = vrot.slane %v1014_v22, 4  ;;  %v433_v41 = vshrl.u32 %v7682_v16, 16  ;;  %v7717_v56 = vld [vmem:[%s7329_s28 + $0x6c] sm:$0xf]  ;;  %v7022_v5 = vld [vmem:[%s9389_s1 + $0x2f8] sm:$0xff]  }
  0x60   : > { %v7703_v26 = vcombine.low %v408_v21, %v418_v11  ;;  %v422_v24 = vrot.slane %v420_v25, 4  ;;  %v425_v39 = vrot.slane %v423_v14, 5  ;;  %v439_v42 = vshll.u32 %v216_v2, 16  ;;  %v217_v11 = vld [vmem:[%s7329_s28 + $0x74] sm:$0x1]  ;;  %6579 = vmatprep.subr.bf16.mxu1 %v7022_v5 }
  0x61   : > { %v1025_v36 = vrot.slane %v1024_v32, 4  ;;  %v1020_v38 = vsel %vm7356_vm2, %v1015_v27, %v1019_v0  ;;  %v431_v43 = vrot.slane %v429_v30, 5  ;;  %v1032_v44 = vshrl.u32 %v5311_v50, 16  ;;  %v7751_v5 = vld [vmem:[%s7329_s28 + $0x78] sm:$0xf] }
  0x62   : > { %2646 = vmatprep.mubr.bf16.mxu0 %v7703_v26  ;;  %v1035_v45 = vshll.u32 %v5311_v50, 16  ;;  %v426_v49 = vor.u32 %v425_v39, %v422_v24  ;;  %v435_v53 = vrot.slane %v433_v41, 4  ;;  %v441_v55 = vrot.slane %v439_v42, 5  ;;  %v5314_v39 = vld [vmem:[%s7329_s28 + $0x7c] sm:$0xf] }
  0x63   : > { %v1030_v47 = vsel %vm7356_vm2, %v1025_v36, %v1029_v1  ;;  %v1034_v63 = vrot.slane %v1032_v44, 4  ;;  %v1041_v0 = vshll.u32 %v5312_v9, 16  ;;  %v1045_v18 = vshrl.u32 %v5312_v9, 16  ;;  %v5313_v36 = vld [vmem:[%s7329_s28 + $0x78] sm:$0xf] }
  0x64   : > { %v7719_v61 = vcombine.low %v1020_v38, %v1030_v47  ;;  %v1037_v3 = vrot.slane %v1035_v45, 5  ;;  %v427_v6 = vrot.slane %v426_v49, 4  ;;  %v436_v10 = vor.u32 %v435_v53, %v431_v43  ;;  %v5336_v44 = vld [vmem:[%s7329_s28 + $0x80] sm:$0x1] }
  0x65   : > { %2647 = vmatmul.mubr.bf16.gmra.mxu0 %v5462_v15  ;;  %v1051_v21 = vshll.u32 %v5335_v33, 16  ;;  %v7725_v15 = vld [vmem:[%s7329_s28 + $0x70] sm:$0xf]  ;;  %v1043_v2 = vrot.slane %v1041_v0, 5  ;;  %v5463_v25 = vcombine.low %v7672_v57, %v7682_v16  ;;  %v7730_v51 = vcombine.low %v5311_v50, %v5312_v9 }
  0x66   : > { %2807 = vmatprep.mubr.bf16.mxu1 %v7719_v61  ;;  %v1038_v22 = vor.u32 %v1037_v3, %v1034_v63  ;;  %v432_v32 = vsel %vm7356_vm2, %v427_v6, %v431_v43  ;;  %v437_v1 = vrot.slane %v436_v10, 4  ;;  %v1047_v14 = vrot.slane %v1045_v18, 4 }
  0x67   : > { %9439 = vst [vmem:[#allocation11_spill] sm:$0xff] %v7730_v51  ;;  %2808 = vmatmul.mubr.bf16.gmra.mxu1 %v7690_v23  ;;  %v1053_v27 = vrot.slane %v1051_v21, 5  ;;  %v444_v30 = vshrl.u32 %v7717_v56, 16  ;;  %v447_v57 = vshll.u32 %v7717_v56, 16  ;;  %v453_v16 = vshll.u32 %v7725_v15, 16 }
  0x68   : > { %v1039_v24 = vrot.slane %v1038_v22, 4  ;;  %v442_v50 = vsel %vm7356_vm2, %v437_v1, %v441_v55  ;;  %v1048_v9 = vor.u32 %v1047_v14, %v1043_v2  ;;  %v457_v33 = vshrl.u32 %v7725_v15, 16  ;;  %v7756_v22 = vld [vmem:[%s7329_s28 + $0x7c] sm:$0xf]  ;;  %v218_v14 = vld [vmem:[%s7329_s28 + $0x80] sm:$0x1] }
  0x69   : > { %v463_v35 = vshll.u32 %v217_v11, 16  ;;  %v7744_v41 = vcombine.low %v432_v32, %v442_v50  ;;  %v446_v38 = vrot.slane %v444_v30, 4  ;;  %v449_v43 = vrot.slane %v447_v57, 5  ;;  %v5315_v50 = vld [vmem:[%s7329_s28 + $0x84] sm:$0xf] }
  0x6a   : > { %v1044_v42 = vsel %vm7356_vm2, %v1039_v24, %v1043_v2  ;;  %v1049_v45 = vrot.slane %v1048_v9, 4  ;;  %v455_v47 = vrot.slane %v453_v16, 5  ;;  %v459_v49 = vrot.slane %v457_v33, 4 }
  0x6b   : > { %v465_v53 = vrot.slane %v463_v35, 5  ;;  %2654 = vmatprep.mubr.bf16.mxu0 %v7744_v41  ;;  %v450_v55 = vor.u32 %v449_v43, %v446_v38  ;;  %v1056_v63 = vshrl.u32 %v5313_v36, 16  ;;  %v1059_v3 = vshll.u32 %v5313_v36, 16 }
  0x6c   : > { %v1065_v0 = vshll.u32 %v5314_v39, 16  ;;  %v1054_v6 = vsel %vm7356_vm2, %v1049_v45, %v1053_v27  ;;  %v460_v10 = vor.u32 %v459_v49, %v455_v47  ;;  %v1069_v18 = vshrl.u32 %v5314_v39, 16 }
  0x6d   : > { %2655 = vmatmul.mubr.bf16.gmra.mxu0 %v5463_v25  ;;  %v1075_v21 = vshll.u32 %v5336_v44, 16  ;;  %v7758_v2 = vcombine.low %v1044_v42, %v1054_v6  ;;  %v451_v11 = vrot.slane %v450_v55, 4  ;;  %v1058_v32 = vrot.slane %v1056_v63, 4  ;;  %v5316_v55 = vld [vmem:[%s7329_s28 + $0x88] sm:$0xf] }
  0x6e   : > { %v1061_v1 = vrot.slane %v1059_v3, 5  ;;  %v461_v24 = vrot.slane %v460_v10, 4  ;;  %v1067_v30 = vrot.slane %v1065_v0, 5  ;;  %v1071_v57 = vrot.slane %v1069_v18, 4  ;;  %v5337_v0 = vld [vmem:[%s7329_s28 + $0x8c] sm:$0x1] }
  0x6f   : > { %9440 = vst [vmem:[#allocation12_spill] sm:$0xff] %v7758_v2  ;;  %v1077_v16 = vrot.slane %v1075_v21, 5  ;;  %2815 = vmatprep.mubr.bf16.mxu1 %v7758_v2  ;;  %v456_v25 = vsel %vm7356_vm2, %v451_v11, %v455_v47  ;;  %v5464_v9 = vcombine.low %v7717_v56, %v7725_v15  ;;  %v7767_v33 = vcombine.low %v5313_v36, %v5314_v39 }
  0x70   : > { %v1062_v27 = vor.u32 %v1061_v1, %v1058_v32  ;;  %2816 = vmatmul.mubr.bf16.gmra.mxu1 %v7730_v51  ;;  %v466_v35 = vsel %vm7356_vm2, %v461_v24, %v465_v53  ;;  %v1072_v42 = vor.u32 %v1071_v57, %v1067_v30  ;;  %v468_v38 = vshrl.u32 %v7751_v5, 16  ;;  %v7788_v57 = vld [vmem:[%s7329_s28 + $0x84] sm:$0xf] }
  0x71   : > { %9441 = vst [vmem:[#allocation13_spill] sm:$0xff] %v7767_v33  ;;  %v471_v43 = vshll.u32 %v7751_v5, 16  ;;  %v7774_v44 = vcombine.low %v456_v25, %v466_v35  ;;  %v477_v47 = vshll.u32 %v7756_v22, 16  ;;  %v481_v56 = vshrl.u32 %v7756_v22, 16 }
  0x72   : > { %v1063_v45 = vrot.slane %v1062_v27, 4  ;;  %v1073_v15 = vrot.slane %v1072_v42, 4  ;;  %v470_v36 = vrot.slane %v468_v38, 4  ;;  %v487_v49 = vshll.u32 %v218_v14, 16  ;;  %v7791_v42 = vld [vmem:[%s7329_s28 + $0x88] sm:$0xf] }
  0x73   : > { %v473_v39 = vrot.slane %v471_v43, 5  ;;  %2662 = vmatprep.mubr.bf16.mxu0 %v7774_v44  ;;  %v479_v63 = vrot.slane %v477_v47, 5  ;;  %v483_v3 = vrot.slane %v481_v56, 4  ;;  %v1080_v6 = vshrl.u32 %v5315_v50, 16 }
  0x74   : > { %v1068_v53 = vsel %vm7356_vm2, %v1063_v45, %v1067_v30  ;;  %v1078_v10 = vsel %vm7356_vm2, %v1073_v15, %v1077_v16  ;;  %v489_v21 = vrot.slane %v487_v49, 5  ;;  %v1083_v11 = vshll.u32 %v5315_v50, 16  ;;  %v219_v45 = vld [vmem:[%s7329_s28 + $0x8c] sm:$0x1]  ;;  %v5318_v49 = vld [vmem:[%s7329_s28 + $0x94] sm:$0xf] }
  0x75   : > { %2663 = vmatmul.mubr.bf16.gmra.mxu0 %v5464_v9  ;;  %v474_v18 = vor.u32 %v473_v39, %v470_v36  ;;  %v7785_v32 = vcombine.low %v1068_v53, %v1078_v10  ;;  %v484_v1 = vor.u32 %v483_v3, %v479_v63  ;;  %v1082_v14 = vrot.slane %v1080_v6, 4  ;;  %v5317_v39 = vld [vmem:[%s7329_s28 + $0x90] sm:$0xf] }
  0x76   : > { %v1089_v24 = vshll.u32 %v5316_v55, 16  ;;  %v1085_v25 = vrot.slane %v1083_v11, 5  ;;  %v1093_v27 = vshrl.u32 %v5316_v55, 16  ;;  %v1099_v35 = vshll.u32 %v5337_v0, 16 }
  0x77   : > { %v475_v30 = vrot.slane %v474_v18, 4  ;;  %2823 = vmatprep.mubr.bf16.mxu1 %v7785_v32  ;;  %v485_v16 = vrot.slane %v484_v1, 4  ;;  %v5465_v38 = vcombine.low %v7751_v5, %v7756_v22  ;;  %v7796_v43 = vcombine.low %v5315_v50, %v5316_v55  ;;  %v5338_v1 = vld [vmem:[%s7329_s28 + $0x98] sm:$0x1] }
  0x78   : > { %v1091_v9 = vrot.slane %v1089_v24, 5  ;;  %2824 = vmatmul.mubr.bf16.gmra.mxu1 %v7767_v33  ;;  %v1086_v56 = vor.u32 %v1085_v25, %v1082_v14  ;;  %v1095_v15 = vrot.slane %v1093_v27, 4  ;;  %v1101_v36 = vrot.slane %v1099_v35, 5  ;;  %v7817_v25 = vld [vmem:[%s7329_s28 + $0x90] sm:$0xf] }
  0x79   : > { %9442 = vst [vmem:[#allocation14_spill] sm:$0xff] %v7796_v43  ;;  %v480_v47 = vsel %vm7356_vm2, %v475_v30, %v479_v63  ;;  %v490_v53 = vsel %vm7356_vm2, %v485_v16, %v489_v21  ;;  %v492_v3 = vshrl.u32 %v7788_v57, 16  ;;  %v495_v5 = vshll.u32 %v7788_v57, 16 }
  0x7a   : > { %v501_v22 = vshll.u32 %v7791_v42, 16  ;;  %v7809_v50 = vcombine.low %v480_v47, %v490_v53  ;;  %v1087_v55 = vrot.slane %v1086_v56, 4  ;;  %v1096_v63 = vor.u32 %v1095_v15, %v1091_v9 }
  0x7b   : > { %v505_v0 = vshrl.u32 %v7791_v42, 16  ;;  %v494_v6 = vrot.slane %v492_v3, 4  ;;  %v497_v10 = vrot.slane %v495_v5, 5  ;;  %v511_v11 = vshll.u32 %v219_v45, 16 }
  0x7c   : > { %v503_v18 = vrot.slane %v501_v22, 5  ;;  %2670 = vmatprep.mubr.bf16.mxu0 %v7809_v50  ;;  %v1092_v21 = vsel %vm7356_vm2, %v1087_v55, %v1091_v9  ;;  %v1097_v14 = vrot.slane %v1096_v63, 4  ;;  %v1104_v30 = vshrl.u32 %v5317_v39, 16 }
  0x7d   : > { %v507_v24 = vrot.slane %v505_v0, 4  ;;  %2671 = vmatmul.mubr.bf16.gmra.mxu0 %v5465_v38  ;;  %v498_v27 = vor.u32 %v497_v10, %v494_v6  ;;  %v513_v35 = vrot.slane %v511_v11, 5  ;;  %v1107_v16 = vshll.u32 %v5317_v39, 16  ;;  %v7826_v6 = vld [vmem:[%s7329_s28 + $0x94] sm:$0xf] }
  0x7e   : > { %v1113_v47 = vshll.u32 %v5318_v49, 16  ;;  %v1102_v45 = vsel %vm7356_vm2, %v1097_v14, %v1101_v36  ;;  %v1106_v15 = vrot.slane %v1104_v30, 4  ;;  %v1117_v53 = vshrl.u32 %v5318_v49, 16  ;;  %v5319_v30 = vld [vmem:[%s7329_s28 + $0x9c] sm:$0xf] }
  0x7f   : > { %v508_v56 = vor.u32 %v507_v24, %v503_v18  ;;  %v7821_v3 = vcombine.low %v1092_v21, %v1102_v45  ;;  %v499_v9 = vrot.slane %v498_v27, 4  ;;  %v1109_v5 = vrot.slane %v1107_v16, 5  ;;  %v220_v21 = vld [vmem:[%s7329_s28 + $0x98] sm:$0x1] }
  0x80   : > { %v1115_v22 = vrot.slane %v1113_v47, 5  ;;  %v1119_v38 = vrot.slane %v1117_v53, 4  ;;  %v1123_v63 = vshll.u32 %v5338_v1, 16  ;;  %v5466_v0 = vcombine.low %v7788_v57, %v7791_v42 }
  0x81   : > { %9443 = vst [vmem:[#allocation15_spill] sm:$0xff] %v7821_v3  ;;  %v509_v55 = vrot.slane %v508_v56, 4  ;;  %2831 = vmatprep.mubr.bf16.mxu1 %v7821_v3  ;;  %v504_v36 = vsel %vm7356_vm2, %v499_v9, %v503_v18  ;;  %v1110_v10 = vor.u32 %v1109_v5, %v1106_v15  ;;  %v7831_v11 = vcombine.low %v5317_v39, %v5318_v49  ;;  %v5320_v49 = vld [vmem:[%s7329_s28 + $0xa0] sm:$0xf] }
  0x82   : > { %v516_v14 = vshrl.u32 %v7817_v25, 16  ;;  %2832 = vmatmul.mubr.bf16.gmra.mxu1 %v7796_v43  ;;  %v1120_v42 = vor.u32 %v1119_v38, %v1115_v22  ;;  %v1125_v1 = vrot.slane %v1123_v63, 5  ;;  %v519_v24 = vshll.u32 %v7817_v25, 16 }
  0x83   : > { %9444 = vst [vmem:[#allocation16_spill] sm:$0xff] %v7831_v11  ;;  %v514_v57 = vsel %vm7356_vm2, %v509_v55, %v513_v35  ;;  %v1111_v18 = vrot.slane %v1110_v10, 4  ;;  %v525_v39 = vshll.u32 %v7826_v6, 16  ;;  %v529_v56 = vshrl.u32 %v7826_v6, 16  ;;  %v5339_v35 = vld [vmem:[%s7329_s28 + $0xa4] sm:$0x1] }
  0x84   : > { %v7840_v27 = vcombine.low %v504_v36, %v514_v57  ;;  %v518_v16 = vrot.slane %v516_v14, 4  ;;  %v1121_v47 = vrot.slane %v1120_v42, 4  ;;  %v521_v45 = vrot.slane %v519_v24, 5  ;;  %v7852_v14 = vld [vmem:[%s7329_s28 + $0x9c] sm:$0xf] }
  0x85   : > { %v535_v15 = vshll.u32 %v220_v21, 16  ;;  %v1116_v53 = vsel %vm7356_vm2, %v1111_v18, %v1115_v22  ;;  %v527_v9 = vrot.slane %v525_v39, 5  ;;  %v1128_v5 = vshrl.u32 %v5319_v30, 16  ;;  %v7855_v21 = vld [vmem:[%s7329_s28 + $0xa0] sm:$0xf] }
  0x86   : > { %2678 = vmatprep.mubr.bf16.mxu0 %v7840_v27  ;;  %v1131_v55 = vshll.u32 %v5319_v30, 16  ;;  %v1126_v38 = vsel %vm7356_vm2, %v1121_v47, %v1125_v1  ;;  %v522_v63 = vor.u32 %v521_v45, %v518_v16  ;;  %v531_v36 = vrot.slane %v529_v56, 4  ;;  %v221_v22 = vld [vmem:[%s7329_s28 + $0xa4] sm:$0x1] }
  0x87   : > { %2679 = vmatmul.mubr.bf16.gmra.mxu0 %v5466_v0  ;;  %v537_v10 = vrot.slane %v535_v15, 5  ;;  %v7857_v57 = vcombine.low %v1116_v53, %v1126_v38  ;;  %v1130_v42 = vrot.slane %v1128_v5, 4  ;;  %v1137_v43 = vshll.u32 %v5320_v49, 16  ;;  %v5321_v38 = vld [vmem:[%s7329_s28 + $0xa8] sm:$0xf] }
  0x88   : > { %v1133_v24 = vrot.slane %v1131_v55, 5  ;;  %v523_v18 = vrot.slane %v522_v63, 4  ;;  %v532_v39 = vor.u32 %v531_v36, %v527_v9  ;;  %v1141_v33 = vshrl.u32 %v5320_v49, 16 }
  0x89   : > { %v1147_v51 = vshll.u32 %v5339_v35, 16  ;;  %2839 = vmatprep.mubr.bf16.mxu1 %v7857_v57  ;;  %v1139_v1 = vrot.slane %v1137_v43, 5  ;;  %v5467_v16 = vcombine.low %v7817_v25, %v7826_v6  ;;  %v7863_v47 = vcombine.low %v5319_v30, %v5320_v49 }
  0x8a   : > { %v1134_v0 = vor.u32 %v1133_v24, %v1130_v42  ;;  %2840 = vmatmul.mubr.bf16.gmra.mxu1 %v7831_v11  ;;  %v528_v45 = vsel %vm7356_vm2, %v523_v18, %v527_v9  ;;  %v533_v56 = vrot.slane %v532_v39, 4  ;;  %v1143_v15 = vrot.slane %v1141_v33, 4  ;;  %v5322_v9 = vld [vmem:[%s7329_s28 + $0xac] sm:$0xf]  ;;  %v5340_v42 = vld [vmem:[%s7329_s28 + $0xb0] sm:$0x1] }
  0x8b   : > { %9445 = vst [vmem:[#allocation17_spill] sm:$0xff] %v7863_v47  ;;  %v1149_v35 = vrot.slane %v1147_v51, 5  ;;  %v540_v5 = vshrl.u32 %v7852_v14, 16  ;;  %v543_v43 = vshll.u32 %v7852_v14, 16  ;;  %v549_v55 = vshll.u32 %v7855_v21, 16 }
  0x8c   : > { %v1135_v53 = vrot.slane %v1134_v0, 4  ;;  %v538_v25 = vsel %vm7356_vm2, %v533_v56, %v537_v10  ;;  %v1144_v6 = vor.u32 %v1143_v15, %v1139_v1  ;;  %v553_v30 = vshrl.u32 %v7855_v21, 16  ;;  %v7883_v11 = vld [vmem:[%s7329_s28 + $0xa8] sm:$0xf] }
  0x8d   : > { %v559_v49 = vshll.u32 %v221_v22, 16  ;;  %v7876_v33 = vcombine.low %v528_v45, %v538_v25  ;;  %v542_v63 = vrot.slane %v540_v5, 4  ;;  %v545_v36 = vrot.slane %v543_v43, 5  ;;  %v7888_v43 = vld [vmem:[%s7329_s28 + $0xac] sm:$0xf] }
  0x8e   : > { %v1140_v51 = vsel %vm7356_vm2, %v1135_v53, %v1139_v1  ;;  %v1145_v24 = vrot.slane %v1144_v6, 4  ;;  %v551_v18 = vrot.slane %v549_v55, 5  ;;  %v555_v39 = vrot.slane %v553_v30, 4 }
  0x8f   : > { %v561_v10 = vrot.slane %v559_v49, 5  ;;  %2686 = vmatprep.mubr.bf16.mxu0 %v7876_v33  ;;  %v546_v0 = vor.u32 %v545_v36, %v542_v63  ;;  %v1152_v22 = vshrl.u32 %v5321_v38, 16  ;;  %v1155_v56 = vshll.u32 %v5321_v38, 16 }
  0x90   : > { %v1161_v15 = vshll.u32 %v5322_v9, 16  ;;  %v1150_v45 = vsel %vm7356_vm2, %v1145_v24, %v1149_v35  ;;  %2687 = vmatmul.mubr.bf16.gmra.mxu0 %v5467_v16  ;;  %v556_v1 = vor.u32 %v555_v39, %v551_v18  ;;  %v1165_v53 = vshrl.u32 %v5322_v9, 16  ;;  %v222_v24 = vld [vmem:[%s7329_s28 + $0xb0] sm:$0x1] }
  0x91   : > { %v1171_v5 = vshll.u32 %v5340_v42, 16  ;;  %v7890_v55 = vcombine.low %v1140_v51, %v1150_v45  ;;  %v547_v25 = vrot.slane %v546_v0, 4  ;;  %v1154_v6 = vrot.slane %v1152_v22, 4 }
  0x92   : > { %v1157_v30 = vrot.slane %v1155_v56, 5  ;;  %v557_v49 = vrot.slane %v556_v1, 4  ;;  %v1163_v63 = vrot.slane %v1161_v15, 5  ;;  %v1167_v36 = vrot.slane %v1165_v53, 4  ;;  %v5323_v15 = vld [vmem:[%s7329_s28 + $0xb4] sm:$0xf] }
  0x93   : > { %v1173_v23 = vrot.slane %v1171_v5, 5  ;;  %2847 = vmatprep.mubr.bf16.mxu1 %v7890_v55  ;;  %v552_v16 = vsel %vm7356_vm2, %v547_v25, %v551_v18  ;;  %v5468_v51 = vcombine.low %v7852_v14, %v7855_v21  ;;  %v7897_v42 = vcombine.low %v5321_v38, %v5322_v9  ;;  %v5324_v18 = vld [vmem:[%s7329_s28 + $0xb8] sm:$0xf]  ;;  %v5341_v38 = vld [vmem:[%s7329_s28 + $0xbc] sm:$0x1] }
  0x94   : > { %v1158_v35 = vor.u32 %v1157_v30, %v1154_v6  ;;  %2848 = vmatmul.mubr.bf16.gmra.mxu1 %v7863_v47  ;;  %v562_v39 = vsel %vm7356_vm2, %v557_v49, %v561_v10  ;;  %v1168_v0 = vor.u32 %v1167_v36, %v1163_v63  ;;  %v564_v22 = vshrl.u32 %v7883_v11, 16 }
  0x95   : > { %9446 = vst [vmem:[#allocation18_spill] sm:$0xff] %v7897_v42  ;;  %v567_v56 = vshll.u32 %v7883_v11, 16  ;;  %v7907_v45 = vcombine.low %v552_v16, %v562_v39  ;;  %v573_v14 = vshll.u32 %v7888_v43, 16  ;;  %v577_v21 = vshrl.u32 %v7888_v43, 16 }
  0x96   : > { %v1159_v1 = vrot.slane %v1158_v35, 4  ;;  %v1169_v9 = vrot.slane %v1168_v0, 4  ;;  %v566_v53 = vrot.slane %v564_v22, 4  ;;  %v583_v5 = vshll.u32 %v222_v24, 16  ;;  %v7918_v0 = vld [vmem:[%s7329_s28 + $0xb4] sm:$0xf] }
  0x97   : > { %v569_v10 = vrot.slane %v567_v56, 5  ;;  %2694 = vmatprep.mubr.bf16.mxu0 %v7907_v45  ;;  %v575_v6 = vrot.slane %v573_v14, 5  ;;  %v579_v30 = vrot.slane %v577_v21, 4  ;;  %v1176_v49 = vshrl.u32 %v5323_v15, 16  ;;  %v7921_v22 = vld [vmem:[%s7329_s28 + $0xb8] sm:$0xf] }
  0x98   : > { %v1164_v25 = vsel %vm7356_vm2, %v1159_v1, %v1163_v63  ;;  %v1174_v36 = vsel %vm7356_vm2, %v1169_v9, %v1173_v23  ;;  %2695 = vmatmul.mubr.bf16.gmra.mxu0 %v5468_v51  ;;  %v585_v35 = vrot.slane %v583_v5, 5  ;;  %v1179_v39 = vshll.u32 %v5323_v15, 16  ;;  %v7931_v5 = vld [vmem:[%s7329_s28 + $0xbc] sm:$0x1] }
  0x99   : > { %v570_v16 = vor.u32 %v569_v10, %v566_v53  ;;  %v7923_v24 = vcombine.low %v1164_v25, %v1174_v36  ;;  %v580_v56 = vor.u32 %v579_v30, %v575_v6  ;;  %v1178_v47 = vrot.slane %v1176_v49, 4  ;;  %v5325_v36 = vld [vmem:[%s7329_s28 + $0xc0] sm:$0xf] }
  0x9a   : > { %v1185_v63 = vshll.u32 %v5324_v18, 16  ;;  %v1181_v14 = vrot.slane %v1179_v39, 5  ;;  %v1189_v21 = vshrl.u32 %v5324_v18, 16  ;;  %v1195_v23 = vshll.u32 %v5341_v38, 16 }
  0x9b   : > { %v571_v1 = vrot.slane %v570_v16, 4  ;;  %2855 = vmatprep.mubr.bf16.mxu1 %v7923_v24  ;;  %v581_v51 = vrot.slane %v580_v56, 4  ;;  %v5469_v53 = vcombine.low %v7883_v11, %v7888_v43  ;;  %v7928_v10 = vcombine.low %v5323_v15, %v5324_v18  ;;  %v7938_v16 = vld [vmem:[%s7329_s28 + $0xc4] sm:$0xf] }
  0x9c   : > { %v1187_v9 = vrot.slane %v1185_v63, 5  ;;  %2856 = vmatmul.mubr.bf16.gmra.mxu1 %v7897_v42  ;;  %v1182_v30 = vor.u32 %v1181_v14, %v1178_v47  ;;  %v1191_v49 = vrot.slane %v1189_v21, 4  ;;  %v1197_v38 = vrot.slane %v1195_v23, 5  ;;  %v7950_v23 = vld [vmem:[%s7329_s28 + $0xc8] sm:$0x1] }
  0x9d   : > { %9447 = vst [vmem:[#allocation19_spill] sm:$0xff] %v7928_v10  ;;  %v576_v25 = vsel %vm7356_vm2, %v571_v1, %v575_v6  ;;  %v586_v39 = vsel %vm7356_vm2, %v581_v51, %v585_v35  ;;  %v588_v11 = vshrl.u32 %v7918_v0, 16  ;;  %v591_v43 = vshll.u32 %v7918_v0, 16 }
  0x9e   : > { %v597_v15 = vshll.u32 %v7921_v22, 16  ;;  %v7945_v18 = vcombine.low %v576_v25, %v586_v39  ;;  %v1183_v56 = vrot.slane %v1182_v30, 4  ;;  %v1192_v6 = vor.u32 %v1191_v49, %v1187_v9 }
  0x9f   : > { %v601_v47 = vshrl.u32 %v7921_v22, 16  ;;  %v590_v63 = vrot.slane %v588_v11, 4  ;;  %v593_v1 = vrot.slane %v591_v43, 5  ;;  %v607_v21 = vshll.u32 %v7931_v5, 16 }
  0xa0   : > { %v599_v14 = vrot.slane %v597_v15, 5  ;;  %2702 = vmatprep.mubr.bf16.mxu0 %v7945_v18  ;;  %v1188_v35 = vsel %vm7356_vm2, %v1183_v56, %v1187_v9  ;;  %v1193_v51 = vrot.slane %v1192_v6, 4  ;;  %v1200_v25 = vshrl.u32 %v5325_v36, 16 }
  0xa1   : > { %v603_v42 = vrot.slane %v601_v47, 4  ;;  %2703 = vmatmul.mubr.bf16.gmra.mxu0 %v5469_v53  ;;  %v594_v30 = vor.u32 %v593_v1, %v590_v63  ;;  %v609_v49 = vrot.slane %v607_v21, 5  ;;  %v1203_v39 = vshll.u32 %v5325_v36, 16 }
  0xa2   : > { %v1209_v11 = vshll.u32 %v7938_v16, 16  ;;  %v1198_v43 = vsel %vm7356_vm2, %v1193_v51, %v1197_v38  ;;  %v1202_v7 = vrot.slane %v1200_v25, 4  ;;  %v1213_v19 = vshrl.u32 %v7938_v16, 16  ;;  %v5343_v51 = vld [vmem:[%s7329_s28 + $0xc] sm:$0xe] }
  0xa3   : > { %v604_v15 = vor.u32 %v603_v42, %v599_v14  ;;  %v7959_v9 = vcombine.low %v1188_v35, %v1198_v43  ;;  %v595_v56 = vrot.slane %v594_v30, 4  ;;  %v1205_v6 = vrot.slane %v1203_v39, 5 }
  0xa4   : > { %v1211_v53 = vrot.slane %v1209_v11, 5  ;;  %v1215_v63 = vrot.slane %v1213_v19, 4  ;;  %v1219_v1 = vshll.u32 %v7950_v23, 16  ;;  %v5470_v21 = vcombine.low %v7918_v0, %v7921_v22  ;;  %v612_v19 = vld [vmem:[%s7329_s28 + $0xc] sm:$0xe] }
  0xa5   : > { %v605_v47 = vrot.slane %v604_v15, 4  ;;  %2863 = vmatprep.mubr.bf16.mxu1 %v7959_v9  ;;  %v600_v42 = vsel %vm7356_vm2, %v595_v56, %v599_v14  ;;  %v1206_v38 = vor.u32 %v1205_v6, %v1202_v7  ;;  %v7969_v35 = vcombine.low %v5325_v36, %v7938_v16  ;;  %v7100_v11 = vld [vmem:[%s7329_s28 + $0x4] sm:$0xf]  ;;  %v7101_v56 = vld [vmem:[%s7329_s28 + $0x8] sm:$0x1] }
  0xa6   : > { %2864 = vmatmul.mubr.bf16.gmra.mxu1 %v7928_v10  ;;  %v1216_v25 = vor.u32 %v1215_v63, %v1211_v53  ;;  %v1221_v30 = vrot.slane %v1219_v1, 5  ;;  %v5279_v14 = vrot.slane %v611_v17, 9  ;;  %v680_v43 = vrot.slane %v7100_v11, 5  ;;  %v7103_v17 = vld [vmem:[%s7329_s28 + $0x14] sm:$0x1] }
  0xa7   : > { %9448 = vst [vmem:[#allocation20_spill] sm:$0xff] %v7969_v35  ;;  %v610_v0 = vsel %vm7356_vm2, %v605_v47, %v609_v49  ;;  %v1207_v7 = vrot.slane %v1206_v38, 4  ;;  %v683_v6 = vrot.slane %v7101_v56, 5  ;;  %v5359_v10 = vrot.slane %v5343_v51, 9  ;;  %v7102_v49 = vld [vmem:[%s7329_s28 + $0x10] sm:$0xf] }
  0xa8   : > { %v7976_v39 = vcombine.low %v600_v42, %v610_v0  ;;  %v1217_v15 = vrot.slane %v1216_v25, 4  ;;  %v1289_v47 = vrot.slane %v7102_v49, 5  ;;  %v681_v1 = vsel %vm7978_vm5, %v5279_v14, %v680_v43  ;;  %v5344_v0 = vld [vmem:[%s7329_s28 + $0x18] sm:$0xe] }
  0xa9   : > { %v1212_v63 = vsel %vm7356_vm2, %v1207_v7, %v1211_v53  ;;  %v682_v42 = vrot.slane %v680_v43, 4  ;;  %v1292_v38 = vrot.slane %v7103_v17, 5  ;;  %v5280_v56 = vrot.slane %v612_v19, 9  ;;  %v7104_v7 = vld [vmem:[%s7329_s28 + $0x10] sm:$0xf] }
  0xaa   : > { %2710 = vmatprep.mubr.bf16.mxu0 %v7976_v39  ;;  %v1222_v51 = vsel %vm7356_vm2, %v1217_v15, %v1221_v30  ;;  %v1290_v25 = vsel %vm7978_vm5, %v5359_v10, %v1289_v47  ;;  %v1291_v11 = vrot.slane %v1289_v47, 4  ;;  %v687_v14 = vrot.slane %v7104_v7, 5  ;;  %v7105_v43 = vld [vmem:[%s7329_s28 + $0x14] sm:$0x1]  ;;  %v7106_v15 = vld [vmem:[%s7329_s28 + $0x1c] sm:$0xf] }
  0xab   : > { %2711 = vmatmul.mubr.bf16.gmra.mxu0 %v5470_v21  ;;  %v7996_v49 = vcombine.low %v1212_v63, %v1222_v51  ;;  %v684_v53 = vsel %vm7978_vm5, %v682_v42, %v683_v6  ;;  %v690_v17 = vrot.slane %v7105_v43, 5  ;;  %v5360_v30 = vrot.slane %v5344_v0, 9  ;;  %v613_v47 = vld [vmem:[%s7329_s28 + $0x18] sm:$0xe]  ;;  %v7107_v42 = vld [vmem:[%s7329_s28 + $0x20] sm:$0x1] }
  0xac   : > { %v5552_v28 = vcombine.low %v681_v1, %v684_v53  ;;  %v1293_v21 = vsel %vm7978_vm5, %v1291_v11, %v1292_v38  ;;  %v1296_v10 = vrot.slane %v7106_v15, 5  ;;  %v688_v6 = vsel %vm7978_vm5, %v5280_v56, %v687_v14  ;;  %v7021_v38 = vld [vmem:[%s9389_s1 + $0x238] sm:$0xff]   ;;  %v7024_v11 = vld [vmem:[%s9389_s1 + $0x270] sm:$0xff]   ;;  %v7109_v7 = vld [vmem:[%s7329_s28 + $0x20] sm:$0x1] }
  0xad   : > { %2871 = vmatprep.mubr.bf16.mxu1 %v7996_v49  ;;  %v8007_v19 = vcombine.low %v1290_v25, %v1293_v21  ;;  %v689_v63 = vrot.slane %v687_v14, 4  ;;  %v1299_v1 = vrot.slane %v7107_v42, 5  ;;  %v7108_v51 = vld [vmem:[%s7329_s28 + $0x1c] sm:$0xf]  ;;  %v5281_v53 = vrot.slane %v613_v47, 9 }
  0xae   : > { %2872 = vmatmul.mubr.bf16.gmra.mxu1 %v7969_v35  ;;  %3361 = vmatprep.mubr.bf16.mxu0 %v5552_v28  ;;  %v1298_v0 = vrot.slane %v1296_v10, 4  ;;  %v694_v25 = vrot.slane %v7108_v51, 5  ;;  %v1297_v28 = vsel %vm7978_vm5, %v5360_v30, %v1296_v10  ;;  %v697_v14 = vrot.slane %v7109_v7, 5  ;;  %v5345_v43 = vld [vmem:[%s7329_s28 + $0x24] sm:$0xe]  ;;  %v7028_v7 = vld [vmem:[%s9389_s1 + $0x268] sm:$0xff]  }
  0xaf   : > { %9451 = vst [vmem:[#allocation21_spill] sm:$0xff] %v8007_v19  ;;  %3522 = vmatprep.mubr.bf16.mxu1 %v8007_v19  ;;  %v691_v56 = vsel %vm7978_vm5, %v689_v63, %v690_v17  ;;  %v7110_v51 = vld [vmem:[%s7329_s28 + $0x28] sm:$0xf]  ;;  %v7023_v17 = vld [vmem:[%s9389_s1 + $0x2b8] sm:$0xff]   ;;  %v5361_v47 = vrot.slane %v5345_v43, 9  ;;  %v1310_v48 = vrot.slane %v7114_v34, 5 }
  0xb0   : > { %v5553_v21 = vcombine.low %v688_v6, %v691_v56  ;;  %v1300_v15 = vsel %vm7978_vm5, %v1298_v0, %v1299_v1  ;;  %v696_v42 = vrot.slane %v694_v25, 4  ;;  %v1303_v35 = vrot.slane %v7110_v51, 5  ;;  %v7025_v6 = vld [vmem:[%s9389_s1 + $0x230] sm:$0xff]   ;;  %v7111_v1 = vld [vmem:[%s7329_s28 + $0x2c] sm:$0x1] }
  0xb1   : > { %v8034_v30 = vcombine.low %v1297_v28, %v1300_v15  ;;  %v695_v10 = vsel %vm7978_vm5, %v5281_v53, %v694_v25  ;;  %v7026_v0 = vld [vmem:[%s9389_s1 + $0x2f0] sm:$0xff]   ;;  %v614_v56 = vld [vmem:[%s7329_s28 + $0x24] sm:$0xe]  ;;  %v7112_v28 = vld [vmem:[%s7329_s28 + $0x28] sm:$0xf] }
  0xb2   : > { %v1305_v63 = vrot.slane %v1303_v35, 4  ;;  %v701_v25 = vrot.slane %v7112_v28, 5  ;;  %v7027_v53 = vld [vmem:[%s9389_s1 + $0x2b0] sm:$0xff]   ;;  %v7030_v43 = vld [vmem:[%s9389_s1 + $0x2e8] sm:$0xff]   ;;  %v5282_v15 = vrot.slane %v614_v56, 9 }
  0xb3   : > { %3362 = vmatmul.mubr.bf16.vlgmr.msra.gmra.mxu0 %v7383_v13  ;;  %v698_v13 = vsel %vm7978_vm5, %v696_v42, %v697_v14  ;;  %v5346_v14 = vld [vmem:[%s7329_s28 + $0x30] sm:$0xe]  ;;  %v7113_v42 = vld [vmem:[%s7329_s28 + $0x2c] sm:$0x1]  ;;  %v7116_v56 = vld [vmem:[%s7329_s28 + $0x34] sm:$0xf] }
  0xb4   : > { %6468 = vmatpush3.bf16.msra.mxu0 %v7021_v38  ;;  %3369 = vmatprep.mubr.bf16.mxu0 %v5553_v21  ;;  %v1306_v38 = vrot.slane %v7111_v1, 5  ;;  %v5554_v21 = vcombine.low %v695_v10, %v698_v13  ;;  %v704_v51 = vrot.slane %v7113_v42, 5  ;;  %v1304_v1 = vsel %vm7978_vm5, %v5361_v47, %v1303_v35  ;;  %v7031_v34 = vld [vmem:[%s9389_s1 + $0x2a8] sm:$0xff]  }
  0xb5   : > { %6469 = vmatprep.subr.bf16.mxu0 %v7024_v11  ;;  %v7029_v11 = vld [vmem:[%s9389_s1 + $0x228] sm:$0xff]   ;;  %v703_v19 = vrot.slane %v701_v25, 4  ;;  %v702_v10 = vsel %vm7978_vm5, %v5282_v15, %v701_v25  ;;  %v5362_v47 = vrot.slane %v5346_v14, 9  ;;  %v1312_v13 = vrot.slane %v1310_v48, 4  ;;  %v7034_v25 = vld [vmem:[%s9389_s1 + $0x2e0] sm:$0xff]   ;;  %v7037_v15 = vld [vmem:[%s9389_s1 + $0x218] sm:$0xff]  }
  0xb6   : > { %3523 = vmatmul.mubr.bf16.vlgmr.msra.gmra.mxu1 %v7398_v29  ;;  %v1307_v28 = vsel %vm7978_vm5, %v1305_v63, %v1306_v38  ;;  %v7115_v63 = vld [vmem:[%s7329_s28 + $0x38] sm:$0x1]  ;;  %v5347_v14 = vld [vmem:[%s7329_s28 + $0x3c] sm:$0xe] }
  0xb7   : > { %6580 = vmatpush3.bf16.msra.mxu1 %v7023_v17  ;;  %3530 = vmatprep.mubr.bf16.mxu1 %v8034_v30  ;;  %v7032_v17 = vld [vmem:[%s9389_s1 + $0x260] sm:$0xff]   ;;  %v8074_v35 = vcombine.low %v1304_v1, %v1307_v28  ;;  %v1313_v38 = vrot.slane %v7115_v63, 5  ;;  %v7117_v1 = vld [vmem:[%s7329_s28 + $0x38] sm:$0x1] }
  0xb8   : > { %6470 = vmatpush3.bf16.msra.mxu0 %v7025_v6  ;;  %6581 = vmatprep.subr.bf16.mxu1 %v7026_v0  ;;  %v7033_v6 = vld [vmem:[%s9389_s1 + $0x220] sm:$0xff]   ;;  %v615_v0 = vld [vmem:[%s7329_s28 + $0x30] sm:$0xe]  ;;  %v711_v28 = vrot.slane %v7117_v1, 5  ;;  %v7045_v1 = vld [vmem:[%s9389_s1 + $0x208] sm:$0xff]  }
  0xb9   : > { %6471 = vmatprep.subr.bf16.mxu0 %v7028_v7  ;;  %v7035_v7 = vld [vmem:[%s9389_s1 + $0x2a0] sm:$0xff]   ;;  %v1314_v42 = vsel %vm7978_vm5, %v1312_v13, %v1313_v38  ;;  %v7041_v13 = vld [vmem:[%s9389_s1 + $0x210] sm:$0xff]  }
  0xbb   : > { %3370 = vmatmul.mubr.bf16.gmra.mxu0 %v7436_v4  ;;  %6582 = vmatpush3.bf16.msra.mxu1 %v7027_v53  ;;  %v705_v4 = vsel %vm7978_vm5, %v703_v19, %v704_v51  ;;  %v708_v53 = vrot.slane %v7116_v56, 5  ;;  %v7036_v19 = vld [vmem:[%s9389_s1 + $0x258] sm:$0xff]  }
  0xbc   : > { %3377 = vmatprep.mubr.bf16.mxu0 %v5554_v21  ;;  %6472 = vmatpush3.bf16.msra.mxu0 %v7029_v11  ;;  %v5555_v11 = vcombine.low %v702_v10, %v705_v4  ;;  %v5283_v21 = vrot.slane %v615_v0, 9  ;;  %v7040_v10 = vld [vmem:[%s9389_s1 + $0x250] sm:$0xff]   ;;  %v7039_v4 = vld [vmem:[%s9389_s1 + $0x298] sm:$0xff]   ;;  %v7119_v0 = vld [vmem:[%s7329_s28 + $0x44] sm:$0x1] }
  0xbd   : > { %6583 = vmatprep.subr.bf16.mxu1 %v7030_v43  ;;  %6473 = vmatprep.subr.bf16.mxu0 %v7032_v17  ;;  %v1311_v43 = vsel %vm7978_vm5, %v5362_v47, %v1310_v48  ;;  %v710_v51 = vrot.slane %v708_v53, 4  ;;  %v7118_v17 = vld [vmem:[%s7329_s28 + $0x40] sm:$0xf]  ;;  %v7038_v48 = vld [vmem:[%s9389_s1 + $0x2d8] sm:$0xff]   ;;  %v1320_v56 = vrot.slane %v7119_v0, 5 }
  0xbe   : > { %3531 = vmatmul.mubr.bf16.gmra.mxu1 %v7449_v20  ;;  %v1317_v63 = vrot.slane %v7118_v17, 5  ;;  %v8117_v47 = vcombine.low %v1311_v43, %v1314_v42  ;;  %v7043_v43 = vld [vmem:[%s9389_s1 + $0x290] sm:$0xff]   ;;  %v7121_v42 = vld [vmem:[%s7329_s28 + $0x44] sm:$0x1] }
  0xbf   : > { %3538 = vmatprep.mubr.bf16.mxu1 %v8074_v35  ;;  %6584 = vmatpush3.bf16.msra.mxu1 %v7031_v34  ;;  %v709_v34 = vsel %vm7978_vm5, %v5283_v21, %v708_v53  ;;  %v7120_v53 = vld [vmem:[%s7329_s28 + $0x40] sm:$0xf] }
  0xc0   : > { %6474 = vmatpush3.bf16.msra.mxu0 %v7033_v6  ;;  %6585 = vmatprep.subr.bf16.mxu1 %v7034_v25  ;;  %v5363_v6 = vrot.slane %v5347_v14, 9  ;;  %v1319_v38 = vrot.slane %v1317_v63, 4  ;;  %v616_v25 = vld [vmem:[%s7329_s28 + $0x3c] sm:$0xe]  ;;  %v7044_v14 = vld [vmem:[%s9389_s1 + $0x248] sm:$0xff]  }
  0xc1   : > { %6475 = vmatprep.subr.bf16.mxu0 %v7036_v19  ;;  %v715_v19 = vrot.slane %v7120_v53, 5  ;;  %v7123_v53 = vld [vmem:[%s7329_s28 + $0x50] sm:$0x1] }
  0xc2   : > { %v1318_v17 = vsel %vm7978_vm5, %v5363_v6, %v1317_v63 }
  0xc3   : > { %3378 = vmatmul.mubr.bf16.gmra.mxu0 %v7475_v46  ;;  %6586 = vmatpush3.bf16.msra.mxu1 %v7035_v7  ;;  %v712_v46 = vsel %vm7978_vm5, %v710_v51, %v711_v28  ;;  %v7042_v7 = vld [vmem:[%s9389_s1 + $0x2d0] sm:$0xff]   ;;  %v718_v51 = vrot.slane %v7121_v42, 5  ;;  %v7046_v28 = vld [vmem:[%s9389_s1 + $0x2c8] sm:$0xff]   ;;  %v7055_v42 = vld [vmem:[%s9389_s1 + $0x3f8] sm:$0xff]  }
  0xc4   : > { %3385 = vmatprep.mubr.bf16.mxu0 %v5555_v11  ;;  %6476 = vmatpush3.bf16.msra.mxu0 %v7037_v15  ;;  %v5348_v11 = vld [vmem:[%s7329_s28 + $0x48] sm:$0xe]  ;;  %v5556_v21 = vcombine.low %v709_v34, %v712_v46  ;;  %v5284_v15 = vrot.slane %v616_v25, 9  ;;  %v7122_v34 = vld [vmem:[%s7329_s28 + $0x4c] sm:$0xf] }
  0xc5   : > { %6587 = vmatprep.subr.bf16.mxu1 %v7038_v48  ;;  %6477 = vmatprep.subr.bf16.mxu0 %v7040_v10  ;;  %v1321_v48 = vsel %vm7978_vm5, %v1319_v38, %v1320_v56  ;;  %v717_v10 = vrot.slane %v715_v19, 4  ;;  %v1324_v46 = vrot.slane %v7122_v34, 5  ;;  %v5364_v6 = vrot.slane %v5348_v11, 9  ;;  %v617_v38 = vld [vmem:[%s7329_s28 + $0x48] sm:$0xe]  ;;  %v7050_v11 = vld [vmem:[%s9389_s1 + $0x2c0] sm:$0xff]  }
  0xc6   : > { %3539 = vmatmul.mubr.bf16.gmra.mxu1 %v7497_v12  ;;  %v8160_v0 = vcombine.low %v1318_v17, %v1321_v48  ;;  %v716_v63 = vsel %vm7978_vm5, %v5284_v15, %v715_v19  ;;  %v7049_v19 = vld [vmem:[%s9389_s1 + $0x200] sm:$0xff]  }
  0xc7   : > { %3546 = vmatprep.mubr.bf16.mxu1 %v8117_v47  ;;  %6588 = vmatpush3.bf16.msra.mxu1 %v7039_v4  ;;  %v7048_v4 = vld [vmem:[%s9389_s1 + $0x240] sm:$0xff]   ;;  %v719_v56 = vsel %vm7978_vm5, %v717_v10, %v718_v51  ;;  %v1326_v25 = vrot.slane %v1324_v46, 4  ;;  %v1325_v48 = vsel %vm7978_vm5, %v5364_v6, %v1324_v46 }
  0xc8   : > { %6478 = vmatpush3.bf16.msra.mxu0 %v7041_v13  ;;  %6589 = vmatprep.subr.bf16.mxu1 %v7042_v7  ;;  %v7047_v13 = vld [vmem:[%s9389_s1 + $0x288] sm:$0xff]   ;;  %v7051_v15 = vld [vmem:[%s9389_s1 + $0x280] sm:$0xff]   ;;  %v5557_v51 = vcombine.low %v716_v63, %v719_v56  ;;  %v7127_v56 = vld [vmem:[%s7329_s28 + $0x5c] sm:$0x1] }
  0xc9   : > { %6479 = vmatprep.subr.bf16.mxu0 %v7044_v14  ;;  %v7124_v7 = vld [vmem:[%s7329_s28 + $0x4c] sm:$0xf] }
  0xca   : > { %v722_v14 = vrot.slane %v7124_v7, 5  ;;  %v7128_v7 = vld [vmem:[%s7329_s28 + $0x58] sm:$0xf] }
  0xcb   : > { %3386 = vmatmul.mubr.bf16.gmra.mxu0 %v7522_v37  ;;  %6590 = vmatpush3.bf16.msra.mxu1 %v7043_v43  ;;  %v1327_v37 = vrot.slane %v7123_v53, 5  ;;  %v7053_v43 = vld [vmem:[%s9389_s1 + $0x378] sm:$0xff]  }
  0xcc   : > { %3393 = vmatprep.mubr.bf16.mxu0 %v5556_v21  ;;  %6480 = vmatpush3.bf16.msra.mxu0 %v7045_v1  ;;  %v5349_v21 = vld [vmem:[%s7329_s28 + $0x54] sm:$0xe]  ;;  %v5285_v1 = vrot.slane %v617_v38, 9  ;;  %v724_v34 = vrot.slane %v722_v14, 4 }
  0xcd   : > { %6591 = vmatprep.subr.bf16.mxu1 %v7046_v28  ;;  %6481 = vmatprep.subr.bf16.mxu0 %v7048_v4  ;;  %v7125_v28 = vld [vmem:[%s7329_s28 + $0x50] sm:$0x1]  ;;  %v1328_v10 = vsel %vm7978_vm5, %v1326_v25, %v1327_v37  ;;  %v7126_v4 = vld [vmem:[%s7329_s28 + $0x58] sm:$0xf]  ;;  %v5365_v6 = vrot.slane %v5349_v21, 9  ;;  %v1334_v25 = vrot.slane %v7127_v56, 5 }
  0xce   : > { %3547 = vmatmul.mubr.bf16.gmra.mxu1 %v7539_v60  ;;  %v725_v17 = vrot.slane %v7125_v28, 5  ;;  %v1331_v53 = vrot.slane %v7126_v4, 5  ;;  %v8197_v63 = vcombine.low %v1325_v48, %v1328_v10  ;;  %v723_v46 = vsel %vm7978_vm5, %v5285_v1, %v722_v14  ;;  %v618_v37 = vld [vmem:[%s7329_s28 + $0x54] sm:$0xe]  ;;  %v5350_v14 = vld [vmem:[%s7329_s28 + $0x60] sm:$0xe] }
  0xcf   : > { %3554 = vmatprep.mubr.bf16.mxu1 %v8160_v0  ;;  %6592 = vmatpush3.bf16.msra.mxu1 %v7047_v13  ;;  %v7130_v1 = vld [vmem:[%s7329_s28 + $0x5c] sm:$0x1]  ;;  %v7131_v48 = vld [vmem:[%s7329_s28 + $0x68] sm:$0x1]  ;;  %v626_v4 = vld [vmem:[%s7329_s28 + $0xb4] sm:$0xe] }
  0xd0   : > { %6482 = vmatpush3.bf16.msra.mxu0 %v7049_v19  ;;  %6593 = vmatprep.subr.bf16.mxu1 %v7050_v11  ;;  %9452 = vst [vmem:[#allocation22_spill] sm:$0xff] %v8197_v63  ;;  %v726_v38 = vsel %vm7978_vm5, %v724_v34, %v725_v17  ;;  %v1333_v13 = vrot.slane %v1331_v53, 4  ;;  %v5286_v11 = vrot.slane %v618_v37, 9  ;;  %v732_v28 = vrot.slane %v7130_v1, 5  ;;  %v619_v34 = vld [vmem:[%s7329_s28 + $0x60] sm:$0xe] }
  0xd1   : > { %6691 = vmatprep.subr.bf16.mxu0 %v7053_v43  ;;  %v5558_v19 = vcombine.low %v723_v46, %v726_v38  ;;  %v7129_v43 = vld [vmem:[%s7329_s28 + $0x64] sm:$0xf]  ;;  %v5366_v17 = vrot.slane %v5350_v14, 9  ;;  %v1341_v10 = vrot.slane %v7131_v48, 5  ;;  %v5358_v46 = vld [vmem:[%s7329_s28 + $0xc0] sm:$0xe] }
  0xd2   : > { %v1338_v21 = vrot.slane %v7129_v43, 5  ;;  %v5294_v37 = vrot.slane %v626_v4, 9  ;;  %v1394_v43 = vrot.slane %v7938_v16, 5  ;;  %v7134_v48 = vld [vmem:[%s7329_s28 + $0x70] sm:$0xf] }
  0xd3   : > { %3394 = vmatmul.mubr.bf16.gmra.mxu0 %v7577_v40  ;;  %6594 = vmatpush3.bf16.msra.mxu1 %v7051_v15  ;;  %v729_v40 = vrot.slane %v7128_v7, 5  ;;  %v1332_v15 = vsel %vm7978_vm5, %v5365_v6, %v1331_v53  ;;  %v785_v7 = vrot.slane %v7921_v22, 5 }
  0xd4   : > { %3401 = vmatprep.mubr.bf16.mxu0 %v5557_v51  ;;  %6803 = vmatprep.subr.bf16.mxu1 %v7055_v42  ;;  %v1335_v51 = vsel %vm7978_vm5, %v1333_v13, %v1334_v25  ;;  %v1340_v6 = vrot.slane %v1338_v21, 4  ;;  %v7132_v13 = vld [vmem:[%s7329_s28 + $0x64] sm:$0xf]  ;;  %v1339_v14 = vsel %vm7978_vm5, %v5366_v17, %v1338_v21  ;;  %v5351_v17 = vld [vmem:[%s7329_s28 + $0x6c] sm:$0xe] }
  0xd5   : > { %v731_v42 = vrot.slane %v729_v40, 4  ;;  %v8220_v38 = vcombine.low %v1332_v15, %v1335_v51  ;;  %v730_v53 = vsel %vm7978_vm5, %v5286_v11, %v729_v40  ;;  %v736_v56 = vrot.slane %v7132_v13, 5  ;;  %v7133_v15 = vld [vmem:[%s7329_s28 + $0x68] sm:$0x1] }
  0xd6   : > { %3555 = vmatmul.mubr.bf16.gmra.mxu1 %v7587_v59  ;;  %v5287_v40 = vrot.slane %v619_v34, 9  ;;  %v8236_v11 = vsel %vm7978_vm5, %v5294_v37, %v785_v7  ;;  %v787_v22 = vrot.slane %v785_v7, 4  ;;  %v739_v51 = vrot.slane %v7133_v15, 5 }
  0xd7   : > { %3562 = vmatprep.mubr.bf16.mxu1 %v8197_v63  ;;  %9453 = vst [vmem:[#allocation23_spill] sm:$0xff] %v8220_v38  ;;  %v733_v25 = vsel %vm7978_vm5, %v731_v42, %v732_v28  ;;  %v1396_v42 = vrot.slane %v1394_v43, 4  ;;  %v1342_v1 = vsel %vm7978_vm5, %v1340_v6, %v1341_v10  ;;  %v738_v28 = vrot.slane %v736_v56, 4 }
  0xd8   : > { %v5559_v21 = vcombine.low %v730_v53, %v733_v25  ;;  %v1345_v34 = vrot.slane %v7134_v48, 5  ;;  %v8265_v6 = vcombine.low %v1339_v14, %v1342_v1  ;;  %v737_v13 = vsel %vm7978_vm5, %v5287_v40, %v736_v56  ;;  %v8276_v14 = vld [vmem:[%s9390_s2] ss:$0 sm:$0xff] }
  0xd9   : > { %v5367_v25 = vrot.slane %v5351_v17, 9  ;;  %v740_v7 = vsel %vm7978_vm5, %v738_v28, %v739_v51  ;;  %v5352_v28 = vld [vmem:[%s7329_s28 + $0x78] sm:$0xe] }
  0xda   : > { %9456 = vst [vmem:[#allocation25_spill] sm:$0xff] %v8265_v6 }
  0xdb   : > { %3402 = vmatmul.mubr.bf16.gmra.mxu0 %v7612_v31  ;;  %v788_v31 = vrot.slane %v7931_v5, 5  ;;  %v1397_v5 = vrot.slane %v7950_v23, 5  ;;  %v1346_v15 = vsel %vm7978_vm5, %v5367_v25, %v1345_v34  ;;  %v5368_v25 = vrot.slane %v5352_v28, 9 }
  0xdc   : > { %3409 = vmatprep.mubr.bf16.mxu0 %v5558_v19  ;;  %v5374_v19 = vrot.slane %v5358_v46, 9  ;;  %v620_v46 = vld [vmem:[%s7329_s28 + $0x6c] sm:$0xe] }
  0xdd   : > { %v8249_v23 = vsel %vm7978_vm5, %v787_v22, %v788_v31  ;;  %v1398_v10 = vsel %vm7978_vm5, %v1396_v42, %v1397_v5  ;;  %v1347_v31 = vrot.slane %v1345_v34, 4  ;;  %v7137_v42 = vld [vmem:[%s7329_s28 + $0x74] sm:$0x1] }
  0xde   : > { %3563 = vmatmul.mubr.bf16.gmra.mxu1 %v7635_v52  ;;  %v1395_v16 = vsel %vm7978_vm5, %v5374_v19, %v1394_v43  ;;  %v7135_v19 = vld [vmem:[%s7329_s28 + $0x74] sm:$0x1]  ;;  %v7136_v43 = vld [vmem:[%s7329_s28 + $0x70] sm:$0xf]  ;;  %v746_v1 = vrot.slane %v7137_v42, 5 }
  0xdf   : > { %3570 = vmatprep.mubr.bf16.mxu1 %v8220_v38  ;;  %v8263_v53 = vcombine.low %v1395_v16, %v1398_v10  ;;  %v743_v22 = vrot.slane %v7136_v43, 5  ;;  %v5288_v16 = vrot.slane %v620_v46, 9 }
  0xe1   : > { %9455 = vst [vmem:[#allocation24_spill] sm:$0xff] %v8263_v53 }
  0xe3   : > { %3410 = vmatmul.mubr.bf16.gmra.mxu0 %v7655_v62  ;;  %v1348_v62 = vrot.slane %v7135_v19, 5  ;;  %v7138_v19 = vld [vmem:[%s7329_s28 + $0x7c] sm:$0xf] }
  0xe4   : > { %3417 = vmatprep.mubr.bf16.mxu0 %v5559_v21  ;;  %v5560_v21 = vcombine.low %v737_v13, %v740_v7  ;;  %v1352_v43 = vrot.slane %v7138_v19, 5 }
  0xe5   : > { %v1349_v17 = vsel %vm7978_vm5, %v1347_v31, %v1348_v62  ;;  %v744_v62 = vsel %vm7978_vm5, %v5288_v16, %v743_v22 }
  0xe6   : > { %3571 = vmatmul.mubr.bf16.gmra.mxu1 %v7674_v58  ;;  %v8297_v42 = vcombine.low %v1346_v15, %v1349_v17  ;;  %v1354_v15 = vrot.slane %v1352_v43, 4 }
  0xe7   : > { %3578 = vmatprep.mubr.bf16.mxu1 %v8265_v6 }
  0xe8   : > { %9457 = vst [vmem:[#allocation26_spill] sm:$0xff] %v8297_v42 }
  0xeb   : > { %3418 = vmatmul.mubr.bf16.gmra.mxu0 %v7703_v26 }
  0xec   : > { %3425 = vmatprep.mubr.bf16.mxu0 %v5560_v21 }
  0xed   : > { %v6035_v37 = vpop.f32.mrf.mxu0 }
  0xee   : > { %v6147_v56 = vpop.f32.mrf.mxu1  ;;  %3579 = vmatmul.mubr.bf16.gmra.mxu1 %v7719_v61 }
  0xef   : > { %v6036_v5 = vpop.f32.mrf.mxu0  ;;  %3586 = vmatprep.mubr.bf16.mxu1 %v8297_v42  ;;  %v7146_v42 = vld [vmem:[%s7329_s28 + $0x94] sm:$0xf] }
  0xf0   : > { %v6037_v40 = vadd.f32 %v6036_v5, %v6035_v37  ;;  %v6148_v10 = vpop.f32.mrf.mxu1  ;;  %v745_v37 = vrot.slane %v743_v22, 4  ;;  %v621_v5 = vld [vmem:[%s7329_s28 + $0x78] sm:$0xe]  ;;  %v1366_v6 = vrot.slane %v7146_v42, 5 }
  0xf1   : > { %v6038_v51 = vpop.f32.mrf.mxu0  ;;  %v6149_v13 = vadd.f32 %v6148_v10, %v6147_v56 }
  0xf2   : > { %v2593_v48 = vadd.f32 %v6037_v40, %v8276_v14  ;;  %v6150_v34 = vpop.f32.mrf.mxu1  ;;  %v7139_v40 = vld [vmem:[%s7329_s28 + $0x80] sm:$0x1]  ;;  %v747_v21 = vsel %vm7978_vm5, %v745_v37, %v746_v1  ;;  %v5289_v1 = vrot.slane %v621_v5, 9  ;;  %v5353_v37 = vld [vmem:[%s7329_s28 + $0x84] sm:$0xe] }
  0xf3   : > { %v6039_v7 = vpop.f32.mrf.mxu0  ;;  %v1355_v4 = vrot.slane %v7139_v40, 5  ;;  %v5561_v19 = vcombine.low %v744_v62, %v747_v21  ;;  %3426 = vmatmul.mubr.bf16.gmra.mxu0 %v7744_v41  ;;  %v622_v21 = vld [vmem:[%s7329_s28 + $0x84] sm:$0xe] }
  0xf4   : > { %v6040_v46 = vadd.f32 %v6039_v7, %v6038_v51  ;;  %v2754_v31 = vadd.f32 %v6149_v13, %v2593_v48  ;;  %v6151_v56 = vpop.f32.mrf.mxu1  ;;  %v7140_v51 = vld [vmem:[%s7329_s28 + $0x7c] sm:$0xf]  ;;  %v1353_v48 = vsel %vm7978_vm5, %v5368_v25, %v1352_v43  ;;  %v7141_v7 = vld [vmem:[%s7329_s28 + $0x88] sm:$0xf]  ;;  %v7142_v43 = vld [vmem:[%s7329_s28 + $0x80] sm:$0x1] }
  0xf5   : > { %v750_v28 = vrot.slane %v7140_v51, 5  ;;  %v6152_v16 = vadd.f32 %v6151_v56, %v6150_v34  ;;  %v6041_v17 = vpop.f32.mrf.mxu0  ;;  %v1356_v34 = vsel %vm7978_vm5, %v1354_v15, %v1355_v4  ;;  %v753_v25 = vrot.slane %v7142_v43, 5  ;;  %3433 = vmatprep.mubr.bf16.mxu0 %v5561_v19 }
  0xf6   : > { %v2596_v26 = vadd.f32 %v6040_v46, %v8276_v14  ;;  %v2880_v22 = vmax.f32 %v2754_v31, 0.0  ;;  %v1359_v46 = vrot.slane %v7141_v7, 5  ;;  %v6153_v31 = vpop.f32.mrf.mxu1  ;;  %3587 = vmatmul.mubr.bf16.gmra.mxu1 %v7758_v2 }
  0xf7   : > { %v6042_v13 = vpop.f32.mrf.mxu0  ;;  %v752_v56 = vrot.slane %v750_v28, 4  ;;  %v751_v41 = vsel %vm7978_vm5, %v5289_v1, %v750_v28  ;;  %v5354_v1 = vld [vmem:[%s7329_s28 + $0x90] sm:$0xe] }
  0xf8   : > { %2912 = vst [vmem:[%s8305_s26] sm:$0xff] %v2880_v22  ;;  %v2757_v10 = vadd.f32 %v6152_v16, %v2596_v26  ;;  %v6043_v40 = vadd.f32 %v6042_v13, %v6041_v17  ;;  %v6154_v62 = vpop.f32.mrf.mxu1  ;;  %v5369_v26 = vrot.slane %v5353_v37, 9  ;;  %v8325_v16 = vcombine.low %v1353_v48, %v1356_v34  ;;  %v7143_v13 = vld [vmem:[%s7329_s28 + $0x8c] sm:$0x1] }
  0xf9   : > { %v6044_v22 = vpop.f32.mrf.mxu0  ;;  %v6155_v4 = vadd.f32 %v6154_v62, %v6153_v31  ;;  %v1361_v17 = vrot.slane %v1359_v46, 4  ;;  %v1362_v7 = vrot.slane %v7143_v13, 5  ;;  %v754_v37 = vsel %vm7978_vm5, %v752_v56, %v753_v25 }
  0xfa   : > { %v2881_v51 = vmax.f32 %v2757_v10, 0.0  ;;  %v2601_v5 = vadd.f32 %v6043_v40, %v8276_v14  ;;  %9458 = vst [vmem:[#allocation27_spill] sm:$0xff] %v8325_v16  ;;  %v6156_v10 = vpop.f32.mrf.mxu1  ;;  %v7144_v40 = vld [vmem:[%s7329_s28 + $0x88] sm:$0xf]  ;;  %v5290_v62 = vrot.slane %v622_v21, 9  ;;  %3594 = vmatprep.mubr.bf16.mxu1 %v8325_v16 }
  0xfb   : > { %v6045_v15 = vpop.f32.mrf.mxu0  ;;  %3434 = vmatmul.mubr.bf16.gmra.mxu0 %v7774_v44 }
  0xfc   : > { %2913 = vst [vmem:[%s8305_s26 + $0x8] sm:$0xff] %v2881_v51  ;;  %v6046_v43 = vadd.f32 %v6045_v15, %v6044_v22  ;;  %v757_v51 = vrot.slane %v7144_v40, 5  ;;  %v2762_v19 = vadd.f32 %v6155_v4, %v2601_v5  ;;  %v6157_v31 = vpop.f32.mrf.mxu1  ;;  %v1360_v22 = vsel %vm7978_vm5, %v5369_v26, %v1359_v46  ;;  %v7145_v15 = vld [vmem:[%s7329_s28 + $0x8c] sm:$0x1] }
  0xfd   : > { %v6047_v48 = vpop.f32.mrf.mxu0  ;;  %v760_v28 = vrot.slane %v7145_v15, 5  ;;  %v6158_v25 = vadd.f32 %v6157_v31, %v6156_v10  ;;  %v5562_v5 = vcombine.low %v751_v41, %v754_v37  ;;  %v1363_v4 = vsel %vm7978_vm5, %v1361_v17, %v1362_v7  ;;  %v623_v15 = vld [vmem:[%s7329_s28 + $0x90] sm:$0xe] }
  0xfe   : > { %v2604_v34 = vadd.f32 %v6046_v43, %v8276_v14  ;;  %v2882_v56 = vmax.f32 %v2762_v19, 0.0  ;;  %v759_v43 = vrot.slane %v757_v51, 4  ;;  %v8345_v21 = vcombine.low %v1360_v22, %v1363_v4  ;;  %v6159_v10 = vpop.f32.mrf.mxu1  ;;  %v7147_v19 = vld [vmem:[%s7329_s28 + $0x98] sm:$0x1]  ;;  %3595 = vmatmul.mubr.bf16.gmra.mxu1 %v7785_v32 }
  0xff   : > { %v6048_v13 = vpop.f32.mrf.mxu0  ;;  %v5370_v41 = vrot.slane %v5354_v1, 9  ;;  %3441 = vmatprep.mubr.bf16.mxu0 %v5562_v5  ;;  %v758_v42 = vsel %vm7978_vm5, %v5290_v62, %v757_v51  ;;  %v1368_v22 = vrot.slane %v1366_v6, 4 }
 0x100   : > { %v6049_v40 = vadd.f32 %v6048_v13, %v6047_v48  ;;  %2914 = vst [vmem:[%s8305_s26 + $0x10] sm:$0xff] %v2882_v56  ;;  %v2765_v46 = vadd.f32 %v6158_v25, %v2604_v34  ;;  %9459 = vst [vmem:[#allocation28_spill] sm:$0xff] %v8345_v21  ;;  %v1369_v48 = vrot.slane %v7147_v19, 5  ;;  %v6160_v34 = vpop.f32.mrf.mxu1  ;;  %v761_v44 = vsel %vm7978_vm5, %v759_v43, %v760_v28  ;;  %v7148_v56 = vld [vmem:[%s7329_s28 + $0x94] sm:$0xf] }
 0x101   : > { %v6050_v26 = vpop.f32.mrf.mxu0  ;;  %v764_v1 = vrot.slane %v7148_v56, 5  ;;  %v6161_v25 = vadd.f32 %v6160_v34, %v6159_v10  ;;  %v1367_v51 = vsel %vm7978_vm5, %v5370_v41, %v1366_v6  ;;  %3602 = vmatprep.mubr.bf16.mxu1 %v8345_v21  ;;  %v5563_v13 = vcombine.low %v758_v42, %v761_v44  ;;  %v5355_v43 = vld [vmem:[%s7329_s28 + $0x9c] sm:$0xe]  ;;  %v7150_v6 = vld [vmem:[%s7329_s28 + $0xa0] sm:$0xf] }
 0x102   : > { %v2883_v37 = vmax.f32 %v2765_v46, 0.0  ;;  %v2609_v17 = vadd.f32 %v6049_v40, %v8276_v14  ;;  %v6162_v5 = vpop.f32.mrf.mxu1  ;;  %v5291_v40 = vrot.slane %v623_v15, 9  ;;  %v1373_v41 = vrot.slane %v7150_v6, 5 }
 0x103   : > { %v6051_v7 = vpop.f32.mrf.mxu0  ;;  %3442 = vmatmul.mubr.bf16.gmra.mxu0 %v7809_v50  ;;  %v5371_v44 = vrot.slane %v5355_v43, 9 }
 0x104   : > { %v6052_v31 = vadd.f32 %v6051_v7, %v6050_v26  ;;  %2915 = vst [vmem:[%s8305_s26 + $0x18] sm:$0xff] %v2883_v37  ;;  %v2770_v4 = vadd.f32 %v6161_v25, %v2609_v17  ;;  %v6163_v46 = vpop.f32.mrf.mxu1  ;;  %v1370_v26 = vsel %vm7978_vm5, %v1368_v22, %v1369_v48  ;;  %v766_v37 = vrot.slane %v764_v1, 4  ;;  %v7149_v7 = vld [vmem:[%s7329_s28 + $0x98] sm:$0x1]  ;;  %3449 = vmatprep.mubr.bf16.mxu0 %v5563_v13 }
 0x105   : > { %v6053_v62 = vpop.f32.mrf.mxu0  ;;  %v767_v19 = vrot.slane %v7149_v7, 5  ;;  %v6164_v56 = vadd.f32 %v6163_v46, %v6162_v5  ;;  %v8368_v48 = vcombine.low %v1367_v51, %v1370_v26  ;;  %v765_v25 = vsel %vm7978_vm5, %v5291_v40, %v764_v1  ;;  %v624_v5 = vld [vmem:[%s7329_s28 + $0x9c] sm:$0xe] }
 0x106   : > { %v2612_v28 = vadd.f32 %v6052_v31, %v8276_v14  ;;  %v2884_v34 = vmax.f32 %v2770_v4, 0.0  ;;  %v6165_v42 = vpop.f32.mrf.mxu1  ;;  %v1375_v46 = vrot.slane %v1373_v41, 4  ;;  %3603 = vmatmul.mubr.bf16.gmra.mxu1 %v7821_v3  ;;  %v1374_v40 = vsel %vm7978_vm5, %v5371_v44, %v1373_v41 }
 0x107   : > { %v6054_v10 = vpop.f32.mrf.mxu0  ;;  %9460 = vst [vmem:[#allocation29_spill] sm:$0xff] %v8368_v48  ;;  %v768_v50 = vsel %vm7978_vm5, %v766_v37, %v767_v19  ;;  %3610 = vmatprep.mubr.bf16.mxu1 %v8368_v48 }
 0x108   : > { %v6055_v17 = vadd.f32 %v6054_v10, %v6053_v62  ;;  %2916 = vst [vmem:[%s8305_s26 + $0x20] sm:$0xff] %v2884_v34  ;;  %v2773_v15 = vadd.f32 %v6164_v56, %v2612_v28  ;;  %v6166_v62 = vpop.f32.mrf.mxu1  ;;  %v7151_v10 = vld [vmem:[%s7329_s28 + $0xa4] sm:$0x1]  ;;  %v7152_v28 = vld [vmem:[%s7329_s28 + $0xa0] sm:$0xf]  ;;  %v5564_v6 = vcombine.low %v765_v25, %v768_v50  ;;  %v5292_v34 = vrot.slane %v624_v5, 9 }
 0x109   : > { %v6056_v31 = vpop.f32.mrf.mxu0  ;;  %v1376_v43 = vrot.slane %v7151_v10, 5  ;;  %v771_v13 = vrot.slane %v7152_v28, 5  ;;  %v6167_v26 = vadd.f32 %v6166_v62, %v6165_v42  ;;  %v5356_v56 = vld [vmem:[%s7329_s28 + $0xa8] sm:$0xe]  ;;  %v7153_v62 = vld [vmem:[%s7329_s28 + $0xa4] sm:$0x1] }
 0x10a   : > { %v2617_v22 = vadd.f32 %v6055_v17, %v8276_v14  ;;  %v2885_v51 = vmax.f32 %v2773_v15, 0.0  ;;  %v6168_v1 = vpop.f32.mrf.mxu1  ;;  %v7154_v10 = vld [vmem:[%s7329_s28 + $0xac] sm:$0xf]  ;;  %v5372_v25 = vrot.slane %v5356_v56, 9  ;;  %v625_v56 = vld [vmem:[%s7329_s28 + $0xa8] sm:$0xe] }
 0x10b   : > { %v6057_v4 = vpop.f32.mrf.mxu0  ;;  %v1377_v42 = vsel %vm7978_vm5, %v1375_v46, %v1376_v43  ;;  %v773_v15 = vrot.slane %v771_v13, 4  ;;  %v1380_v41 = vrot.slane %v7154_v10, 5  ;;  %3450 = vmatmul.mubr.bf16.gmra.mxu0 %v7840_v27  ;;  %v772_v43 = vsel %vm7978_vm5, %v5292_v34, %v771_v13  ;;  %v7155_v27 = vld [vmem:[%s7329_s28 + $0xb0] sm:$0x1]  ;;  %v5357_v10 = vld [vmem:[%s7329_s28 + $0xb4] sm:$0xe] }
 0x10c   : > { %v6058_v7 = vadd.f32 %v6057_v4, %v6056_v31  ;;  %2917 = vst [vmem:[%s8305_s26 + $0x28] sm:$0xff] %v2885_v51  ;;  %v2778_v37 = vadd.f32 %v6167_v26, %v2617_v22  ;;  %v6169_v17 = vpop.f32.mrf.mxu1  ;;  %v774_v4 = vrot.slane %v7153_v62, 5  ;;  %3457 = vmatprep.mubr.bf16.mxu0 %v5564_v6  ;;  %v8391_v50 = vcombine.low %v1374_v40, %v1377_v42 }
 0x10d   : > { %v6059_v31 = vpop.f32.mrf.mxu0  ;;  %v6170_v28 = vadd.f32 %v6169_v17, %v6168_v1  ;;  %v1382_v1 = vrot.slane %v1380_v41, 4  ;;  %v7156_v17 = vld [vmem:[%s7329_s28 + $0xac] sm:$0xf]  ;;  %v1381_v42 = vsel %vm7978_vm5, %v5372_v25, %v1380_v41 }
 0x10e   : > { %v2620_v19 = vadd.f32 %v6058_v7, %v8276_v14  ;;  %v2886_v44 = vmax.f32 %v2778_v37, 0.0  ;;  %9461 = vst [vmem:[#allocation30_spill] sm:$0xff] %v8391_v50  ;;  %v775_v7 = vsel %vm7978_vm5, %v773_v15, %v774_v4  ;;  %v1383_v37 = vrot.slane %v7155_v27, 5  ;;  %3611 = vmatmul.mubr.bf16.gmra.mxu1 %v7857_v57 }
 0x10f   : > { %v6060_v22 = vpop.f32.mrf.mxu0  ;;  %v6171_v51 = vpop.f32.mrf.mxu1  ;;  %3618 = vmatprep.mubr.bf16.mxu1 %v8391_v50  ;;  %v5565_v62 = vcombine.low %v772_v43, %v775_v7  ;;  %v5293_v4 = vrot.slane %v625_v56, 9 }
 0x110   : > { %2918 = vst [vmem:[%s8305_s26 + $0x30] sm:$0xff] %v2886_v44  ;;  %v2781_v5 = vadd.f32 %v6170_v28, %v2620_v19  ;;  %v6061_v46 = vadd.f32 %v6060_v22, %v6059_v31  ;;  %v778_v19 = vrot.slane %v7156_v17, 5  ;;  %v1384_v28 = vsel %vm7978_vm5, %v1382_v1, %v1383_v37  ;;  %v7158_v17 = vld [vmem:[%s7329_s28 + $0xb8] sm:$0xf] }
 0x111   : > { %v6062_v26 = vpop.f32.mrf.mxu0  ;;  %v6172_v13 = vpop.f32.mrf.mxu1  ;;  %v1387_v41 = vrot.slane %v7158_v17, 5  ;;  %v8413_v37 = vcombine.low %v1381_v42, %v1384_v28 }
 0x112   : > { %v2887_v6 = vmax.f32 %v2781_v5, 0.0  ;;  %v2625_v40 = vadd.f32 %v6061_v46, %v8276_v14  ;;  %v6173_v31 = vadd.f32 %v6172_v13, %v6171_v51  ;;  %v780_v5 = vrot.slane %v778_v19, 4  ;;  %v7157_v46 = vld [vmem:[%s7329_s28 + $0xb0] sm:$0x1]  ;;  %v8416_v13 = vld [vmem:[%s7329_s28 + $0x18] sm:$0xf] }
 0x113   : > { %v6063_v34 = vpop.f32.mrf.mxu0  ;;  %v6174_v44 = vpop.f32.mrf.mxu1  ;;  %v781_v27 = vrot.slane %v7157_v46, 5  ;;  %3458 = vmatmul.mubr.bf16.gmra.mxu0 %v7876_v33  ;;  %9462 = vst [vmem:[#allocation31_spill] sm:$0xff] %v8413_v37  ;;  %v779_v33 = vsel %vm7978_vm5, %v5293_v4, %v778_v19  ;;  %v1389_v46 = vrot.slane %v1387_v41, 4 }
 0x114   : > { %2919 = vst [vmem:[%s8305_s26 + $0x38] sm:$0xff] %v2887_v6  ;;  %v6064_v15 = vadd.f32 %v6063_v34, %v6062_v26  ;;  %v2786_v25 = vadd.f32 %v6173_v31, %v2625_v40  ;;  %v5373_v26 = vrot.slane %v5357_v10, 9  ;;  %3465 = vmatprep.mubr.bf16.mxu0 %v5565_v62  ;;  %v8419_v34 = vld [vmem:[%s7329_s28 + $0x1c] sm:$0xf] }
 0x115   : > { %v6065_v22 = vpop.f32.mrf.mxu0  ;;  %v6175_v43 = vpop.f32.mrf.mxu1  ;;  %v7159_v10 = vld [vmem:[%s7329_s28 + $0xbc] sm:$0x1]  ;;  %v1458_v19 = vshll.u32 %v8419_v34, 16  ;;  %v1462_v4 = vshrl.u32 %v8419_v34, 16 }
 0x116   : > { %v2628_v6 = vadd.f32 %v6064_v15, %v8276_v14  ;;  %v2888_v7 = vmax.f32 %v2786_v25, 0.0  ;;  %v6176_v1 = vadd.f32 %v6175_v43, %v6174_v44  ;;  %v782_v15 = vsel %vm7978_vm5, %v780_v5, %v781_v27  ;;  %3619 = vmatmul.mubr.bf16.gmra.mxu1 %v7890_v55 }
 0x117   : > { %v6066_v51 = vpop.f32.mrf.mxu0  ;;  %v6177_v40 = vpop.f32.mrf.mxu1  ;;  %v1390_v17 = vrot.slane %v7159_v10, 5  ;;  %v1452_v25 = vshll.u32 %v8416_v13, 16  ;;  %3626 = vmatprep.mubr.bf16.mxu1 %v8413_v37  ;;  %v5566_v43 = vcombine.low %v779_v33, %v782_v15 }
 0x118   : > { %v6067_v56 = vadd.f32 %v6066_v51, %v6065_v22  ;;  %2920 = vst [vmem:[%s8305_s26 + $0x40] sm:$0xff] %v2888_v7  ;;  %v2789_v62 = vadd.f32 %v6176_v1, %v2628_v6  ;;  %v1449_v22 = vshrl.u32 %v8416_v13, 16  ;;  %v1388_v7 = vsel %vm7978_vm5, %v5373_v26, %v1387_v41 }
 0x119   : > { %v6068_v31 = vpop.f32.mrf.mxu0  ;;  %v6178_v44 = vpop.f32.mrf.mxu1  ;;  %v1391_v1 = vsel %vm7978_vm5, %v1389_v46, %v1390_v17  ;;  %v1454_v15 = vrot.slane %v1452_v25, 5  ;;  %v1464_v41 = vrot.slane %v1462_v4, 4 }
 0x11a   : > { %v2633_v42 = vadd.f32 %v6067_v56, %v8276_v14  ;;  %v2889_v5 = vmax.f32 %v2789_v62, 0.0  ;;  %v6179_v27 = vadd.f32 %v6178_v44, %v6177_v40  ;;  %v1451_v33 = vrot.slane %v1449_v22, 4 }
 0x11b   : > { %v6069_v28 = vpop.f32.mrf.mxu0  ;;  %v6180_v51 = vpop.f32.mrf.mxu1  ;;  %3466 = vmatmul.mubr.bf16.gmra.mxu0 %v7907_v45  ;;  %v8442_v62 = vrot.slane %v1458_v19, 5  ;;  %v8444_v46 = vcombine.low %v1388_v7, %v1391_v1 }
 0x11c   : > { %v6070_v6 = vadd.f32 %v6069_v28, %v6068_v31  ;;  %2921 = vst [vmem:[%s8305_s26 + $0x48] sm:$0xff] %v2889_v5  ;;  %v2794_v56 = vadd.f32 %v6179_v27, %v2633_v42  ;;  %v5407_v31 = vld [vmem:[%s7329_s28 + $0x20] sm:$0x1]  ;;  %3473 = vmatprep.mubr.bf16.mxu0 %v5566_v43  ;;  %v8447_v42 = vld [vmem:[%s7329_s28 + $0x24] sm:$0xf]  ;;  %v1455_v19 = vor.u32 %v1454_v15, %v1451_v33 }
 0x11d   : > { %v6071_v50 = vpop.f32.mrf.mxu0  ;;  %v6181_v40 = vpop.f32.mrf.mxu1  ;;  %9463 = vst [vmem:[#allocation32_spill] sm:$0xff] %v8444_v46  ;;  %v8450_v5 = vld [vmem:[%s7329_s28 + $0x28] sm:$0xf]  ;;  %v1468_v22 = vshll.u32 %v5407_v31, 16  ;;  %v1465_v4 = vor.u32 %v1464_v41, %v8442_v62  ;;  %v1476_v43 = vshll.u32 %v8447_v42, 16 }
 0x11e   : > { %v2636_v10 = vadd.f32 %v6070_v6, %v8276_v14  ;;  %v2890_v26 = vmax.f32 %v2794_v56, 0.0  ;;  %v6182_v44 = vadd.f32 %v6181_v40, %v6180_v51  ;;  %3627 = vmatmul.mubr.bf16.gmra.mxu1 %v7923_v24  ;;  %v1473_v6 = vshrl.u32 %v8447_v42, 16 }
 0x11f   : > { %v6072_v17 = vpop.f32.mrf.mxu0  ;;  %v6183_v25 = vpop.f32.mrf.mxu1  ;;  %3634 = vmatprep.mubr.bf16.mxu1 %v8444_v46  ;;  %v1482_v1 = vshll.u32 %v8450_v5, 16  ;;  %v1486_v56 = vshrl.u32 %v8450_v5, 16  ;;  %v1470_v33 = vrot.slane %v1468_v22, 5 }
 0x120   : > { %v6073_v28 = vadd.f32 %v6072_v17, %v6071_v50  ;;  %2922 = vst [vmem:[%s8305_s26 + $0x50] sm:$0xff] %v2890_v26  ;;  %v2797_v45 = vadd.f32 %v6182_v44, %v2636_v10  ;;  %v1456_v26 = vrot.slane %v1455_v19, 4  ;;  %v1466_v44 = vrot.slane %v1465_v4, 4  ;;  %v5408_v17 = vld [vmem:[%s7329_s28 + $0x2c] sm:$0x1] }
 0x121   : > { %v6074_v27 = vpop.f32.mrf.mxu0  ;;  %v6184_v10 = vpop.f32.mrf.mxu1  ;;  %v1488_v22 = vrot.slane %v1486_v56, 4 }
 0x122   : > { %v2891_v51 = vmax.f32 %v2797_v45, 0.0  ;;  %v2641_v50 = vadd.f32 %v6073_v28, %v8276_v14  ;;  %v6185_v31 = vadd.f32 %v6184_v10, %v6183_v25  ;;  %v1475_v28 = vrot.slane %v1473_v6, 4 }
 0x123   : > { %v6075_v7 = vpop.f32.mrf.mxu0  ;;  %3474 = vmatmul.mubr.bf16.gmra.mxu0 %v7945_v18  ;;  %v6186_v15 = vpop.f32.mrf.mxu1  ;;  %v1478_v45 = vrot.slane %v1476_v43, 5  ;;  %v8471_v18 = vld [vmem:[%s7329_s28 + $0x30] sm:$0xf]  ;;  %v1492_v6 = vshll.u32 %v5408_v17, 16  ;;  %v8474_v43 = vld [vmem:[%s7329_s28 + $0x34] sm:$0xf] }
 0x124   : > { %v6076_v40 = vadd.f32 %v6075_v7, %v6074_v27  ;;  %2923 = vst [vmem:[%s8305_s26 + $0x58] sm:$0xff] %v2891_v51  ;;  %v2802_v46 = vadd.f32 %v6185_v31, %v2641_v50  ;;  %v9464_v27 = vcombine.low %v8236_v11, %v8249_v23  ;;  %v8468_v51 = vrot.slane %v1482_v1, 5 }
 0x125   : > { %v6077_v41 = vpop.f32.mrf.mxu0  ;;  %v6187_v25 = vpop.f32.mrf.mxu1  ;;  %v1461_v11 = vsel %vm7356_vm2, %v1456_v26, %v8442_v62  ;;  %v1471_v23 = vsel %vm7356_vm2, %v1466_v44, %v1470_v33  ;;  %v1479_v1 = vor.u32 %v1478_v45, %v1475_v28  ;;  %v1506_v33 = vshll.u32 %v8474_v43, 16  ;;  %v8491_v45 = vld [vmem:[%s7329_s28 + $0x3c] sm:$0xf] }
 0x126   : > { %v2644_v37 = vadd.f32 %v6076_v40, %v8276_v14  ;;  %3481 = vmatprep.mubr.bf16.mxu0 %v9464_v27  ;;  %v2892_v4 = vmax.f32 %v2802_v46, 0.0  ;;  %v6188_v7 = vadd.f32 %v6187_v25, %v6186_v15  ;;  %3635 = vmatmul.mubr.bf16.gmra.mxu1 %v7959_v9  ;;  %v1497_v46 = vshrl.u32 %v8471_v18, 16 }
 0x127   : > { %v6078_v19 = vpop.f32.mrf.mxu0  ;;  %v6189_v50 = vpop.f32.mrf.mxu1  ;;  %3642 = vmatprep.mubr.bf16.mxu1 %v8263_v53  ;;  %v1489_v15 = vor.u32 %v1488_v22, %v8468_v51  ;;  %v1510_v44 = vshrl.u32 %v8474_v43, 16  ;;  %v8494_v22 = vcombine.low %v1461_v11, %v1471_v23  ;;  %v1480_v25 = vrot.slane %v1479_v1, 4 }
 0x128   : > { %v6079_v10 = vadd.f32 %v6078_v19, %v6077_v41  ;;  %2924 = vst [vmem:[%s8305_s26 + $0x60] sm:$0xff] %v2892_v4  ;;  %v2805_v56 = vadd.f32 %v6188_v7, %v2644_v37  ;;  %v1500_v41 = vshll.u32 %v8471_v18, 16  ;;  %v1494_v19 = vrot.slane %v1492_v6, 5  ;;  %v8497_v7 = vld [vmem:[%s7329_s28 + $0x40] sm:$0xf] }
 0x129   : > { %v6080_v40 = vpop.f32.mrf.mxu0  ;;  %v6190_v62 = vpop.f32.mrf.mxu1  ;;  %v1499_v4 = vrot.slane %v1497_v46, 4  ;;  %v1512_v11 = vrot.slane %v1510_v44, 4  ;;  %v1521_v6 = vshrl.u32 %v8491_v45, 16  ;;  %v1524_v23 = vshll.u32 %v8491_v45, 16 }
 0x12a   : > { %v2649_v31 = vadd.f32 %v6079_v10, %v8276_v14  ;;  %v2893_v17 = vmax.f32 %v2805_v56, 0.0  ;;  %v6191_v28 = vadd.f32 %v6190_v62, %v6189_v50  ;;  %v1490_v50 = vrot.slane %v1489_v15, 4 }
 0x12b   : > { %v6081_v26 = vpop.f32.mrf.mxu0  ;;  %3482 = vmatmul.mubr.bf16.gmra.mxu0 %v7976_v39  ;;  %v6192_v27 = vpop.f32.mrf.mxu1  ;;  %v1502_v56 = vrot.slane %v1500_v41, 5  ;;  %v1485_v41 = vsel %vm7356_vm2, %v1480_v25, %v8468_v51  ;;  %v5410_v25 = vld [vmem:[%s7329_s28 + $0x44] sm:$0x1] }
 0x12c   : > { %v6082_v37 = vadd.f32 %v6081_v26, %v6080_v40  ;;  %2925 = vst [vmem:[%s8305_s26 + $0x68] sm:$0xff] %v2893_v17  ;;  %v2810_v10 = vadd.f32 %v6191_v28, %v2649_v31  ;;  %4149 = vmatprep.mubr.bf16.mxu0 %v7398_v29  ;;  %v5409_v40 = vld [vmem:[%s7329_s28 + $0x38] sm:$0x1]  ;;  %v8503_v26 = vrot.slane %v1506_v33, 5  ;;  %v1530_v31 = vshll.u32 %v8497_v7, 16 }
 0x12d   : > { %v6193_v62 = vpop.f32.mrf.mxu1  ;;  %v6083_v39 = vpop.f32.mrf.mxu0  ;;  %v1534_v17 = vshrl.u32 %v8497_v7, 16  ;;  %v1516_v33 = vshll.u32 %v5409_v40, 16  ;;  %v7054_v28 = vld [vmem:[%s9389_s1 + $0x338] sm:$0xff]   ;;  %v1523_v40 = vrot.slane %v1521_v6, 4 }
 0x12e   : > { %v2652_v53 = vadd.f32 %v6082_v37, %v8276_v14  ;;  %v2894_v1 = vmax.f32 %v2810_v10, 0.0  ;;  %v6194_v46 = vadd.f32 %v6193_v62, %v6192_v27  ;;  %3643 = vmatmul.mubr.bf16.gmra.mxu1 %v7996_v49  ;;  %v1495_v27 = vsel %vm7356_vm2, %v1490_v50, %v1494_v19 }
 0x12f   : > { %v6084_v15 = vpop.f32.mrf.mxu0  ;;  %4310 = vmatprep.mubr.bf16.mxu1 %v8494_v22  ;;  %v1503_v10 = vor.u32 %v1502_v56, %v1499_v4  ;;  %v1513_v51 = vor.u32 %v1512_v11, %v8503_v26  ;;  %v1536_v19 = vrot.slane %v1534_v17, 4  ;;  %v8529_v4 = vld [vmem:[%s7329_s28 + $0x48] sm:$0xf]  ;;  %v5712_v50 = vcombine.low %v8416_v13, %v8419_v34 }
 0x130   : > { %2926 = vst [vmem:[%s8305_s26 + $0x70] sm:$0xff] %v2894_v1  ;;  %v2813_v44 = vadd.f32 %v6194_v46, %v2652_v53  ;;  %v6085_v37 = vadd.f32 %v6084_v15, %v6083_v39  ;;  %v6195_v62 = vpop.f32.mrf.mxu1  ;;  %v7059_v53 = vld [vmem:[%s9389_s1 + $0x370] sm:$0xff]   ;;  %v1526_v1 = vrot.slane %v1524_v23, 5  ;;  %v8526_v39 = vrot.slane %v1530_v31, 5  ;;  %v7056_v23 = vld [vmem:[%s9389_s1 + $0x3b8] sm:$0xff]  }
 0x131   : > { %v6086_v48 = vpop.f32.mrf.mxu0  ;;  %v8534_v15 = vcombine.low %v1485_v41, %v1495_v27  ;;  %v1504_v17 = vrot.slane %v1503_v10, 4  ;;  %v1514_v34 = vrot.slane %v1513_v51, 4  ;;  %v7060_v41 = vld [vmem:[%s9389_s1 + $0x330] sm:$0xff]   ;;  %v1548_v51 = vshll.u32 %v8529_v4, 16 }
 0x132   : > { %v2895_v46 = vmax.f32 %v2813_v44, 0.0  ;;  %v2657_v21 = vadd.f32 %v6085_v37, %v8276_v14  ;;  %v6196_v56 = vpop.f32.mrf.mxu1  ;;  %v1518_v44 = vrot.slane %v1516_v33, 5  ;;  %v8542_v37 = vld [vmem:[%s7329_s28 + $0x4c] sm:$0xf]  ;;  %v1527_v27 = vor.u32 %v1526_v1, %v1523_v40 }
 0x133   : > { %4150 = vmatmul.mubr.bf16.vlgmr.msra.gmra.mxu0 %v7375_v8  ;;  %v6087_v11 = vpop.f32.mrf.mxu0  ;;  %v6197_v6 = vadd.f32 %v6196_v56, %v6195_v62  ;;  %v1545_v62 = vshrl.u32 %v8529_v4, 16  ;;  %v1554_v16 = vshll.u32 %v8542_v37, 16 }
 0x134   : > { %2927 = vst [vmem:[%s8305_s26 + $0x78] sm:$0xff] %v2895_v46  ;;  %6692 = vmatpush3.bf16.msra.mxu0 %v7054_v28  ;;  %v6088_v31 = vadd.f32 %v6087_v11, %v6086_v48  ;;  %4157 = vmatprep.mubr.bf16.mxu0 %v7449_v20  ;;  %v6198_v13 = vpop.f32.mrf.mxu1  ;;  %v7061_v28 = vld [vmem:[%s9389_s1 + $0x3f0] sm:$0xff]   ;;  %v1540_v48 = vshll.u32 %v5410_v25, 16  ;;  %v1537_v46 = vor.u32 %v1536_v19, %v8526_v39  ;;  %v1558_v25 = vshrl.u32 %v8542_v37, 16 }
 0x135   : > { %v6089_v8 = vpop.f32.mrf.mxu0  ;;  %6693 = vmatprep.subr.bf16.mxu0 %v7059_v53  ;;  %v2818_v10 = vadd.f32 %v6197_v6, %v2657_v21  ;;  %v7065_v53 = vld [vmem:[%s9389_s1 + $0x368] sm:$0xff]   ;;  %v1509_v19 = vsel %vm7356_vm2, %v1504_v17, %v8503_v26  ;;  %v1519_v38 = vsel %vm7356_vm2, %v1514_v34, %v1518_v44 }
 0x136   : > { %v2660_v33 = vadd.f32 %v6088_v31, %v8276_v14  ;;  %4311 = vmatmul.mubr.bf16.vlgmr.msra.gmra.mxu1 %v5712_v50  ;;  %v6199_v56 = vpop.f32.mrf.mxu1  ;;  %v7062_v50 = vld [vmem:[%s9389_s1 + $0x3b0] sm:$0xff]   ;;  %v7066_v26 = vld [vmem:[%s9389_s1 + $0x328] sm:$0xff]   ;;  %v1538_v34 = vrot.slane %v1537_v46, 4 }
 0x137   : > { %v6090_v11 = vpop.f32.mrf.mxu0  ;;  %v2896_v40 = vmax.f32 %v2818_v10, 0.0  ;;  %6804 = vmatpush3.bf16.msra.mxu1 %v7056_v23  ;;  %v6200_v21 = vadd.f32 %v6199_v56, %v6198_v13  ;;  %4318 = vmatprep.mubr.bf16.mxu1 %v8534_v15  ;;  %v8568_v23 = vrot.slane %v1527_v27, 4  ;;  %v8570_v13 = vrot.slane %v1540_v48, 5  ;;  %v7067_v17 = vld [vmem:[%s9389_s1 + $0x3e8] sm:$0xff]   ;;  %v9465_v27 = vld [vmem:[#allocation2_spill] sm:$0xff] }
 0x138   : > { %v6091_v1 = vadd.f32 %v6090_v11, %v6089_v8  ;;  %v6201_v6 = vpop.f32.mrf.mxu1  ;;  %6694 = vmatpush3.bf16.msra.mxu0 %v7060_v41  ;;  %6805 = vmatprep.subr.bf16.mxu1 %v7061_v28  ;;  %v8572_v8 = vrot.slane %v1545_v62, 4  ;;  %v1550_v41 = vrot.slane %v1548_v51, 5  ;;  %v7071_v28 = vld [vmem:[%s9389_s1 + $0x360] sm:$0xff]   ;;  %v5713_v48 = vcombine.low %v8447_v42, %v8450_v5  ;;  %v7068_v42 = vld [vmem:[%s9389_s1 + $0x3a8] sm:$0xff]   ;;  %v8598_v5 = vld [vmem:[%s7329_s28 + $0x54] sm:$0xf] }
 0x139   : > { %v6092_v31 = vpop.f32.mrf.mxu0  ;;  %2928 = vst [vmem:[%s8305_s26 + $0x80] sm:$0xff] %v2896_v40  ;;  %v2821_v10 = vadd.f32 %v6200_v21, %v2660_v33  ;;  %6695 = vmatprep.subr.bf16.mxu0 %v7065_v53  ;;  %v8588_v33 = vrot.slane %v1554_v16, 5  ;;  %v1560_v11 = vrot.slane %v1558_v25, 4  ;;  %v8591_v40 = vcombine.low %v1509_v19, %v1519_v38  ;;  %v5411_v21 = vld [vmem:[%s7329_s28 + $0x50] sm:$0x1]  ;;  %v7072_v38 = vld [vmem:[%s9389_s1 + $0x320] sm:$0xff]  }
 0x13a   : > { %v2665_v44 = vadd.f32 %v6091_v1, %v8276_v14  ;;  %v6202_v62 = vpop.f32.mrf.mxu1  ;;  %v1533_v16 = vsel %vm7356_vm2, %v8568_v23, %v8526_v39  ;;  %v8605_v25 = vld [vmem:[%s7329_s28 + $0x58] sm:$0xf]  ;;  %v7073_v19 = vld [vmem:[%s9389_s1 + $0x3e0] sm:$0xff]   ;;  %v1543_v39 = vsel %vm7356_vm2, %v1538_v34, %v8570_v13  ;;  %v1551_v23 = vor.u32 %v1550_v41, %v8572_v8 }
 0x13b   : > { %4158 = vmatmul.mubr.bf16.gmra.mxu0 %v9465_v27  ;;  %v6093_v56 = vpop.f32.mrf.mxu0  ;;  %v2897_v46 = vmax.f32 %v2821_v10, 0.0  ;;  %v6203_v51 = vadd.f32 %v6202_v62, %v6201_v6  ;;  %6806 = vmatpush3.bf16.msra.mxu1 %v7062_v50  ;;  %v1561_v10 = vor.u32 %v1560_v11, %v8588_v33  ;;  %v1564_v27 = vshll.u32 %v5411_v21, 16  ;;  %v7074_v41 = vld [vmem:[%s9389_s1 + $0x3a0] sm:$0xff]   ;;  %v7079_v11 = vld [vmem:[%s9389_s1 + $0x3d8] sm:$0xff]  }
 0x13c   : > { %v6094_v53 = vadd.f32 %v6093_v56, %v6092_v31  ;;  %4165 = vmatprep.mubr.bf16.mxu0 %v7497_v12  ;;  %v6204_v1 = vpop.f32.mrf.mxu1  ;;  %6696 = vmatpush3.bf16.msra.mxu0 %v7066_v26  ;;  %v7077_v26 = vld [vmem:[%s9389_s1 + $0x358] sm:$0xff]   ;;  %v1578_v8 = vshll.u32 %v8605_v25, 16  ;;  %v1582_v34 = vshrl.u32 %v8605_v25, 16  ;;  %v8640_v21 = vcombine.low %v1533_v16, %v1543_v39 }
 0x13d   : > { %6807 = vmatprep.subr.bf16.mxu1 %v7067_v17  ;;  %2929 = vst [vmem:[%s8305_s26 + $0x88] sm:$0xff] %v2897_v46  ;;  %v2826_v50 = vadd.f32 %v6203_v51, %v2665_v44  ;;  %v6095_v31 = vpop.f32.mrf.mxu0  ;;  %6697 = vmatprep.subr.bf16.mxu0 %v7071_v28  ;;  %v1572_v44 = vshll.u32 %v8598_v5, 16  ;;  %v5714_v51 = vcombine.low %v8471_v18, %v8474_v43  ;;  %v8656_v18 = vrot.slane %v1564_v27, 5 }
 0x13e   : > { %v2668_v6 = vadd.f32 %v6094_v53, %v8276_v14  ;;  %4319 = vmatmul.mubr.bf16.gmra.mxu1 %v5713_v48  ;;  %v6205_v17 = vpop.f32.mrf.mxu1  ;;  %v1569_v14 = vshrl.u32 %v8598_v5, 16  ;;  %v7078_v48 = vld [vmem:[%s9389_s1 + $0x318] sm:$0xff]   ;;  %9466 = vst [vmem:[#allocation2_spill] sm:$0xff] %v8640_v21  ;;  %v8672_v27 = vrot.slane %v1582_v34, 4  ;;  %v7085_v34 = vld [vmem:[%s9389_s1 + $0x3d0] sm:$0xff]  }
 0x13f   : > { %v2898_v62 = vmax.f32 %v2826_v50, 0.0  ;;  %v6206_v56 = vadd.f32 %v6205_v17, %v6204_v1  ;;  %4326 = vmatprep.mubr.bf16.mxu1 %v8591_v40  ;;  %v6096_v13 = vpop.f32.mrf.mxu0  ;;  %6808 = vmatpush3.bf16.msra.mxu1 %v7068_v42  ;;  %v8642_v42 = vrot.slane %v1551_v23, 4  ;;  %v8645_v1 = vld [vmem:[%s7329_s28 + $0x60] sm:$0xf]  ;;  %v8660_v16 = vrot.slane %v1572_v44, 5 }
 0x140   : > { %v6097_v28 = vadd.f32 %v6096_v13, %v6095_v31  ;;  %6698 = vmatpush3.bf16.msra.mxu0 %v7072_v38  ;;  %6809 = vmatprep.subr.bf16.mxu1 %v7073_v19  ;;  %v8648_v38 = vld [vmem:[%s7329_s28 + $0x64] sm:$0xf]  ;;  %v7083_v19 = vld [vmem:[%s9389_s1 + $0x350] sm:$0xff]   ;;  %v8654_v31 = vrot.slane %v1561_v10, 4  ;;  %v8658_v43 = vrot.slane %v1569_v14, 4  ;;  %v7080_v14 = vld [vmem:[%s9389_s1 + $0x398] sm:$0xff]  }
 0x141   : > { %2930 = vst [vmem:[%s8305_s26 + $0x90] sm:$0xff] %v2898_v62  ;;  %v2829_v46 = vadd.f32 %v6206_v56, %v2668_v6  ;;  %v6098_v53 = vpop.f32.mrf.mxu0  ;;  %6699 = vmatprep.subr.bf16.mxu0 %v7077_v26  ;;  %v9467_v6 = vld [vmem:[#allocation3_spill] sm:$0xff]  ;;  %v8665_v23 = vld [vmem:[%s9390_s2] ss:$0 sm:$0xff]  ;;  %v5412_v10 = vld [vmem:[%s7329_s28 + $0x5c] sm:$0x1] }
 0x142   : > { %v6207_v50 = vpop.f32.mrf.mxu1  ;;  %v2673_v26 = vadd.f32 %v8665_v23, %v6097_v28  ;;  %v8670_v62 = vrot.slane %v1578_v8, 5  ;;  %v1593_v13 = vshrl.u32 %v8645_v1, 16  ;;  %v1596_v28 = vshll.u32 %v8645_v1, 16  ;;  %v7084_v8 = vld [vmem:[%s9389_s1 + $0x310] sm:$0xff]  }
 0x143   : > { %4166 = vmatmul.mubr.bf16.gmra.mxu0 %v9467_v6  ;;  %v2899_v39 = vmax.f32 %v2829_v46, 0.0  ;;  %v6099_v17 = vpop.f32.mrf.mxu0  ;;  %6810 = vmatpush3.bf16.msra.mxu1 %v7074_v41  ;;  %v1602_v46 = vshll.u32 %v8648_v38, 16  ;;  %v7089_v6 = vld [vmem:[%s9389_s1 + $0x348] sm:$0xff]  }
 0x144   : > { %4173 = vmatprep.mubr.bf16.mxu0 %v7539_v60  ;;  %v6208_v44 = vpop.f32.mrf.mxu1  ;;  %v6100_v56 = vadd.f32 %v6099_v17, %v6098_v53  ;;  %6700 = vmatpush3.bf16.msra.mxu0 %v7078_v48  ;;  %v1606_v53 = vshrl.u32 %v8648_v38, 16  ;;  %v1557_v17 = vsel %vm7356_vm2, %v8642_v42, %v8588_v33  ;;  %v7086_v33 = vld [vmem:[%s9389_s1 + $0x390] sm:$0xff]  }
 0x145   : > { %6811 = vmatprep.subr.bf16.mxu1 %v7079_v11  ;;  %2931 = vst [vmem:[%s8305_s26 + $0x98] sm:$0xff] %v2899_v39  ;;  %v6209_v41 = vadd.f32 %v6208_v44, %v6207_v50  ;;  %6701 = vmatprep.subr.bf16.mxu0 %v7083_v19  ;;  %v1567_v50 = vsel %vm7356_vm2, %v8654_v31, %v8656_v18  ;;  %v1588_v44 = vshll.u32 %v5412_v10, 16  ;;  %v1595_v18 = vrot.slane %v1593_v13, 4 }
 0x146   : > { %4327 = vmatmul.mubr.bf16.gmra.mxu1 %v5714_v51  ;;  %v6210_v48 = vpop.f32.mrf.mxu1  ;;  %v2676_v19 = vadd.f32 %v8665_v23, %v6100_v56  ;;  %v1575_v51 = vor.u32 %v8660_v16, %v8658_v43  ;;  %v1585_v31 = vor.u32 %v8672_v27, %v8670_v62  ;;  %v8708_v56 = vrot.slane %v1602_v46, 5  ;;  %v7090_v43 = vld [vmem:[%s9389_s1 + $0x308] sm:$0xff]  }
 0x147   : > { %v6101_v11 = vpop.f32.mrf.mxu0  ;;  %v2834_v39 = vadd.f32 %v6209_v41, %v2673_v26  ;;  %4334 = vmatprep.mubr.bf16.mxu1 %v8640_v21  ;;  %6812 = vmatpush3.bf16.msra.mxu1 %v7080_v14  ;;  %v1598_v26 = vrot.slane %v1596_v28, 5  ;;  %v7091_v16 = vld [vmem:[%s9389_s1 + $0x3c8] sm:$0xff]   ;;  %v1608_v13 = vrot.slane %v1606_v53, 4  ;;  %v7095_v28 = vld [vmem:[%s9389_s1 + $0x340] sm:$0xff]   ;;  %v1590_v53 = vrot.slane %v1588_v44, 5 }
 0x148   : > { %v6211_v42 = vpop.f32.mrf.mxu1  ;;  %6702 = vmatpush3.bf16.msra.mxu0 %v7084_v8  ;;  %6813 = vmatprep.subr.bf16.mxu1 %v7085_v34  ;;  %v5413_v27 = vld [vmem:[%s7329_s28 + $0x68] sm:$0x1]  ;;  %v9468_v8 = vld [vmem:[#allocation4_spill] sm:$0xff]  ;;  %v5715_v34 = vcombine.low %v8491_v45, %v8497_v7 }
 0x149   : > { %v6102_v63 = vpop.f32.mrf.mxu0  ;;  %v2900_v10 = vmax.f32 %v2834_v39, 0.0  ;;  %v6212_v14 = vadd.f32 %v6211_v42, %v6210_v48  ;;  %6703 = vmatprep.subr.bf16.mxu0 %v7089_v6  ;;  %v8729_v6 = vld [vmem:[%s7329_s28 + $0x6c] sm:$0xf] }
 0x14a   : > { %v6103_v41 = vadd.f32 %v6102_v63, %v6101_v11  ;;  %v6213_v46 = vpop.f32.mrf.mxu1  ;;  %v8726_v63 = vcombine.low %v1557_v17, %v1567_v50  ;;  %v8732_v11 = vld [vmem:[%s7329_s28 + $0x70] sm:$0xf]  ;;  %v7092_v42 = vld [vmem:[%s9389_s1 + $0x388] sm:$0xff]   ;;  %v7096_v17 = vld [vmem:[%s9389_s1 + $0x300] sm:$0xff]  }
 0x14b   : > { %4174 = vmatmul.mubr.bf16.gmra.mxu0 %v9468_v8  ;;  %v6104_v21 = vpop.f32.mrf.mxu0  ;;  %2932 = vst [vmem:[%s8305_s26 + $0xa0] sm:$0xff] %v2900_v10  ;;  %v2837_v39 = vadd.f32 %v6212_v14, %v2676_v19  ;;  %6814 = vmatpush3.bf16.msra.mxu1 %v7086_v33  ;;  %v1576_v10 = vrot.slane %v1575_v51, 4  ;;  %v1586_v19 = vrot.slane %v1585_v31, 4  ;;  %v1599_v14 = vor.u32 %v1598_v26, %v1595_v18  ;;  %v7097_v50 = vld [vmem:[%s9389_s1 + $0x3c0] sm:$0xff]  }
 0x14c   : > { %v2681_v48 = vadd.f32 %v8665_v23, %v6103_v41  ;;  %4181 = vmatprep.mubr.bf16.mxu0 %v7587_v59  ;;  %9469 = vst [vmem:[#allocation3_spill] sm:$0xff] %v8726_v63  ;;  %v6214_v45 = vpop.f32.mrf.mxu1  ;;  %v1612_v41 = vshll.u32 %v5413_v27, 16  ;;  %6704 = vmatpush3.bf16.msra.mxu0 %v7090_v43  ;;  %v1609_v59 = vor.u32 %v1608_v13, %v8708_v56  ;;  %v1617_v31 = vshrl.u32 %v8729_v6, 16 }
 0x14d   : > { %v6105_v7 = vpop.f32.mrf.mxu0  ;;  %6815 = vmatprep.subr.bf16.mxu1 %v7091_v16  ;;  %v2901_v44 = vmax.f32 %v2837_v39, 0.0  ;;  %v6215_v33 = vadd.f32 %v6214_v45, %v6213_v46  ;;  %6705 = vmatprep.subr.bf16.mxu0 %v7095_v28  ;;  %v1620_v18 = vshll.u32 %v8729_v6, 16  ;;  %v1626_v26 = vshll.u32 %v8732_v11, 16 }
 0x14e   : > { %v6106_v8 = vadd.f32 %v6105_v7, %v6104_v21  ;;  %4335 = vmatmul.mubr.bf16.gmra.mxu1 %v5715_v34  ;;  %v6216_v51 = vpop.f32.mrf.mxu1  ;;  %v1630_v43 = vshrl.u32 %v8732_v11, 16  ;;  %v7098_v21 = vld [vmem:[%s9389_s1 + $0x380] sm:$0xff]   ;;  %v5716_v46 = vcombine.low %v8529_v4, %v8542_v37  ;;  %v1581_v34 = vsel %vm7356_vm2, %v1576_v10, %v8670_v62  ;;  %v5414_v4 = vld [vmem:[%s7329_s28 + $0x74] sm:$0x1] }
 0x14f   : > { %2933 = vst [vmem:[%s8305_s26 + $0xa8] sm:$0xff] %v2901_v44  ;;  %v2842_v16 = vadd.f32 %v6215_v33, %v2681_v48  ;;  %4342 = vmatprep.mubr.bf16.mxu1 %v8726_v63  ;;  %6816 = vmatpush3.bf16.msra.mxu1 %v7092_v42  ;;  %v1591_v39 = vsel %vm7356_vm2, %v1586_v19, %v1590_v53  ;;  %v1600_v48 = vrot.slane %v1599_v14, 4  ;;  %v1610_v7 = vrot.slane %v1609_v59, 4  ;;  %v9470_v33 = vld [vmem:[#allocation5_spill] sm:$0xff] }
 0x150   : > { %v2684_v27 = vadd.f32 %v8665_v23, %v6106_v8  ;;  %v6217_v13 = vpop.f32.mrf.mxu1  ;;  %v6107_v28 = vpop.f32.mrf.mxu0  ;;  %6706 = vmatpush3.bf16.msra.mxu0 %v7096_v17  ;;  %6817 = vmatprep.subr.bf16.mxu1 %v7097_v50  ;;  %v1614_v44 = vrot.slane %v1612_v41, 5  ;;  %v1619_v37 = vrot.slane %v1617_v31, 4  ;;  %v1622_v63 = vrot.slane %v1620_v18, 5  ;;  %v8770_v17 = vld [vmem:[%s7329_s28 + $0x78] sm:$0xf] }
 0x151   : > { %v2902_v42 = vmax.f32 %v2842_v16, 0.0  ;;  %v6218_v45 = vadd.f32 %v6217_v13, %v6216_v51  ;;  %v8763_v62 = vrot.slane %v1626_v26, 5  ;;  %v1632_v10 = vrot.slane %v1630_v43, 4  ;;  %v8777_v26 = vld [vmem:[%s7329_s28 + $0x7c] sm:$0xf] }
 0x152   : > { %v6108_v8 = vpop.f32.mrf.mxu0  ;;  %v8767_v14 = vcombine.low %v1581_v34, %v1591_v39  ;;  %v1605_v31 = vsel %vm7356_vm2, %v1600_v48, %v8708_v56  ;;  %v1636_v18 = vshll.u32 %v5414_v4, 16  ;;  %v1623_v13 = vor.u32 %v1622_v63, %v1619_v37  ;;  %v9472_v37 = vld [vmem:[#allocation7_spill] sm:$0xff] }
 0x153   : > { %4182 = vmatmul.mubr.bf16.gmra.mxu0 %v9470_v33  ;;  %2934 = vst [vmem:[%s8305_s26 + $0xb0] sm:$0xff] %v2902_v42  ;;  %v2845_v53 = vadd.f32 %v6218_v45, %v2684_v27  ;;  %v6109_v19 = vadd.f32 %v6108_v8, %v6107_v28  ;;  %6818 = vmatpush3.bf16.msra.mxu1 %v7098_v21  ;;  %v1641_v28 = vshrl.u32 %v8770_v17, 16  ;;  %v1644_v56 = vshll.u32 %v8770_v17, 16  ;;  %v8794_v8 = vld [vmem:[%s7329_s28 + $0x84] sm:$0xf] }
 0x154   : > { %4189 = vmatprep.mubr.bf16.mxu0 %v7635_v52  ;;  %9471 = vst [vmem:[#allocation4_spill] sm:$0xff] %v8767_v14  ;;  %v6219_v59 = vpop.f32.mrf.mxu1  ;;  %v6110_v41 = vpop.f32.mrf.mxu0  ;;  %v1615_v27 = vsel %vm7356_vm2, %v1610_v7, %v1614_v44  ;;  %v1633_v21 = vor.u32 %v1632_v10, %v8763_v62  ;;  %v1650_v42 = vshll.u32 %v8777_v26, 16  ;;  %v1654_v45 = vshrl.u32 %v8777_v26, 16 }
 0x155   : > { %v2903_v50 = vmax.f32 %v2845_v53, 0.0  ;;  %v2689_v51 = vadd.f32 %v8665_v23, %v6109_v19  ;;  %v5717_v44 = vcombine.low %v8598_v5, %v8605_v25  ;;  %v8791_v33 = vcombine.low %v1605_v31, %v1615_v27  ;;  %v5415_v27 = vld [vmem:[%s7329_s28 + $0x80] sm:$0x1] }
 0x156   : > { %4343 = vmatmul.mubr.bf16.gmra.mxu1 %v5716_v46  ;;  %v6220_v43 = vpop.f32.mrf.mxu1  ;;  %v6111_v16 = vpop.f32.mrf.mxu0  ;;  %v1624_v53 = vrot.slane %v1623_v13, 4  ;;  %v1634_v19 = vrot.slane %v1633_v21, 4  ;;  %v1646_v5 = vrot.slane %v1644_v56, 5  ;;  %v1665_v13 = vshrl.u32 %v8794_v8, 16 }
 0x157   : > { %2935 = vst [vmem:[%s8305_s26 + $0xb8] sm:$0xff] %v2903_v50  ;;  %v6221_v34 = vadd.f32 %v6220_v43, %v6219_v59  ;;  %v6112_v39 = vadd.f32 %v6111_v16, %v6110_v41  ;;  %4350 = vmatprep.mubr.bf16.mxu1 %v8767_v14  ;;  %v1638_v59 = vrot.slane %v1636_v18, 5  ;;  %v1643_v41 = vrot.slane %v1641_v28, 4  ;;  %v8798_v50 = vld [vmem:[%s7329_s28 + $0x88] sm:$0xf] }
 0x158   : > { %v6222_v48 = vpop.f32.mrf.mxu1  ;;  %v6113_v46 = vpop.f32.mrf.mxu0  ;;  %v1668_v21 = vshll.u32 %v8794_v8, 16 }
 0x159   : > { %v2850_v63 = vadd.f32 %v6221_v34, %v2689_v51  ;;  %v2692_v7 = vadd.f32 %v8665_v23, %v6112_v39  ;;  %v8802_v34 = vrot.slane %v1650_v42, 5  ;;  %v1656_v39 = vrot.slane %v1654_v45, 4 }
 0x15a   : > { %v6223_v4 = vpop.f32.mrf.mxu1  ;;  %v6114_v10 = vpop.f32.mrf.mxu0  ;;  %v1629_v42 = vsel %vm7356_vm2, %v1624_v53, %v8763_v62  ;;  %v1639_v45 = vsel %vm7356_vm2, %v1634_v19, %v1638_v59 }
 0x15b   : > { %4190 = vmatmul.mubr.bf16.gmra.mxu0 %v9472_v37  ;;  %v2904_v51 = vmax.f32 %v2850_v63, 0.0  ;;  %v6224_v43 = vadd.f32 %v6223_v4, %v6222_v48  ;;  %v6115_v16 = vadd.f32 %v6114_v10, %v6113_v46  ;;  %v1674_v48 = vshll.u32 %v8798_v50, 16 }
 0x15c   : > { %4197 = vmatprep.mubr.bf16.mxu0 %v7674_v58  ;;  %v6225_v25 = vpop.f32.mrf.mxu1  ;;  %v6116_v31 = vpop.f32.mrf.mxu0  ;;  %v1678_v46 = vshrl.u32 %v8798_v50, 16  ;;  %v1660_v10 = vshll.u32 %v5415_v27, 16  ;;  %v1670_v58 = vrot.slane %v1668_v21, 5  ;;  %v8826_v21 = vcombine.low %v1629_v42, %v1639_v45 }
 0x15d   : > { %2936 = vst [vmem:[%s8305_s26 + $0xc0] sm:$0xff] %v2904_v51  ;;  %v2853_v18 = vadd.f32 %v6224_v43, %v2692_v7  ;;  %v2697_v28 = vadd.f32 %v8665_v23, %v6115_v16  ;;  %v1647_v43 = vor.u32 %v1646_v5, %v1643_v41  ;;  %v1667_v16 = vrot.slane %v1665_v13, 4  ;;  %v5416_v5 = vld [vmem:[%s7329_s28 + $0x8c] sm:$0x1] }
 0x15e   : > { %4351 = vmatmul.mubr.bf16.gmra.mxu1 %v5717_v44  ;;  %v6226_v56 = vpop.f32.mrf.mxu1  ;;  %v6117_v63 = vpop.f32.mrf.mxu0  ;;  %v1657_v44 = vor.u32 %v1656_v39, %v8802_v34  ;;  %v8819_v19 = vrot.slane %v1674_v48, 5  ;;  %v1680_v59 = vrot.slane %v1678_v46, 4  ;;  %v5718_v41 = vcombine.low %v8645_v1, %v8648_v38  ;;  %v8832_v48 = vld [vmem:[%s7329_s28 + $0x94] sm:$0xf] }
 0x15f   : > { %v2905_v4 = vmax.f32 %v2853_v18, 0.0  ;;  %v6227_v37 = vadd.f32 %v6226_v56, %v6225_v25  ;;  %v6118_v7 = vadd.f32 %v6117_v63, %v6116_v31  ;;  %4358 = vmatprep.mubr.bf16.mxu1 %v8791_v33  ;;  %v9473_v31 = vld [vmem:[#allocation8_spill] sm:$0xff]  ;;  %v1662_v18 = vrot.slane %v1660_v10, 5 }
 0x160   : > { %v6228_v51 = vpop.f32.mrf.mxu1  ;;  %v1648_v56 = vrot.slane %v1647_v43, 4  ;;  %v1658_v63 = vrot.slane %v1657_v44, 4  ;;  %v1681_v38 = vor.u32 %v1680_v59, %v8819_v19  ;;  %v1698_v10 = vshll.u32 %v8832_v48, 16 }
 0x161   : > { %2937 = vst [vmem:[%s8305_s26 + $0xc8] sm:$0xff] %v2905_v4  ;;  %v2858_v14 = vadd.f32 %v6227_v37, %v2697_v28  ;;  %v2700_v62 = vadd.f32 %v8665_v23, %v6118_v7  ;;  %v6119_v53 = vpop.f32.mrf.mxu0  ;;  %v8829_v28 = vld [vmem:[%s7329_s28 + $0x90] sm:$0xf]  ;;  %v1671_v4 = vor.u32 %v1670_v58, %v1667_v16 }
 0x162   : > { %v6229_v25 = vpop.f32.mrf.mxu1  ;;  %v1689_v42 = vshrl.u32 %v8829_v28, 16  ;;  %v1692_v45 = vshll.u32 %v8829_v28, 16  ;;  %v1663_v59 = vsel %vm7356_vm2, %v1658_v63, %v1662_v18 }
 0x163   : > { %4198 = vmatmul.mubr.bf16.gmra.mxu0 %v9473_v31  ;;  %v2906_v27 = vmax.f32 %v2858_v14, 0.0  ;;  %v6230_v39 = vadd.f32 %v6229_v25, %v6228_v51  ;;  %v6120_v13 = vpop.f32.mrf.mxu0  ;;  %v1684_v14 = vshll.u32 %v5416_v5, 16  ;;  %v1702_v51 = vshrl.u32 %v8832_v48, 16 }
 0x164   : > { %4205 = vmatprep.mubr.bf16.mxu0 %v7719_v61  ;;  %v6121_v46 = vadd.f32 %v6120_v13, %v6119_v53  ;;  %v1653_v53 = vsel %vm7356_vm2, %v1648_v56, %v8802_v34  ;;  %v1672_v25 = vrot.slane %v1671_v4, 4  ;;  %v1682_v5 = vrot.slane %v1681_v38, 4 }
 0x165   : > { %2938 = vst [vmem:[%s8305_s26 + $0xd0] sm:$0xff] %v2906_v27  ;;  %v2861_v37 = vadd.f32 %v6230_v39, %v2700_v62  ;;  %v6122_v1 = vpop.f32.mrf.mxu0  ;;  %v1686_v27 = vrot.slane %v1684_v14, 5  ;;  %v5417_v39 = vld [vmem:[%s7329_s28 + $0x98] sm:$0x1]  ;;  %v1694_v34 = vrot.slane %v1692_v45, 5  ;;  %v8852_v56 = vrot.slane %v1698_v10, 5 }
 0x166   : > { %v6231_v7 = vpop.f32.mrf.mxu1  ;;  %4359 = vmatmul.mubr.bf16.gmra.mxu1 %v5718_v41  ;;  %v2705_v58 = vadd.f32 %v8665_v23, %v6121_v46  ;;  %v5719_v41 = vcombine.low %v8729_v6, %v8732_v11  ;;  %v1704_v18 = vrot.slane %v1702_v51, 4  ;;  %v8859_v6 = vld [vmem:[%s7329_s28 + $0x9c] sm:$0xf]  ;;  %v1677_v14 = vsel %vm7356_vm2, %v1672_v25, %v8819_v19  ;;  %v8865_v45 = vld [vmem:[%s7329_s28 + $0xa0] sm:$0xf] }
 0x167   : > { %v2907_v43 = vmax.f32 %v2861_v37, 0.0  ;;  %v6123_v44 = vpop.f32.mrf.mxu0  ;;  %4366 = vmatprep.mubr.bf16.mxu1 %v8826_v21  ;;  %v9474_v37 = vld [vmem:[#allocation10_spill] sm:$0xff]  ;;  %v1716_v19 = vshll.u32 %v8859_v6, 16 }
 0x168   : > { %v6232_v16 = vpop.f32.mrf.mxu1  ;;  %v6124_v62 = vadd.f32 %v6123_v44, %v6122_v1  ;;  %v1691_v1 = vrot.slane %v1689_v42, 4  ;;  %v1708_v42 = vshll.u32 %v5417_v39, 16 }
 0x169   : > { %2939 = vst [vmem:[%s8305_s26 + $0xd8] sm:$0xff] %v2907_v43  ;;  %v6233_v31 = vadd.f32 %v6232_v16, %v6231_v7  ;;  %v8856_v7 = vcombine.low %v1653_v53, %v1663_v59  ;;  %v1705_v53 = vor.u32 %v1704_v18, %v8852_v56  ;;  %v1713_v59 = vshrl.u32 %v8859_v6, 16 }
 0x16a   : > { %v6234_v13 = vpop.f32.mrf.mxu1  ;;  %v2708_v4 = vadd.f32 %v8665_v23, %v6124_v62  ;;  %v1695_v62 = vor.u32 %v1694_v34, %v1691_v1  ;;  %v1710_v18 = vrot.slane %v1708_v42, 5 }
 0x16b   : > { %v6125_v46 = vpop.f32.mrf.mxu0  ;;  %4206 = vmatmul.mubr.bf16.gmra.mxu0 %v9474_v37  ;;  %v2866_v63 = vadd.f32 %v6233_v31, %v2705_v58  ;;  %9475 = vst [vmem:[#allocation5_spill] sm:$0xff] %v8856_v7  ;;  %v1687_v58 = vsel %vm7356_vm2, %v1682_v5, %v1686_v27  ;;  %v1722_v5 = vshll.u32 %v8865_v45, 16 }
 0x16c   : > { %4213 = vmatprep.mubr.bf16.mxu0 %v7758_v2  ;;  %v6235_v11 = vpop.f32.mrf.mxu1  ;;  %v1718_v2 = vrot.slane %v1716_v19, 5 }
 0x16d   : > { %v6126_v38 = vpop.f32.mrf.mxu0  ;;  %v2908_v10 = vmax.f32 %v2866_v63, 0.0  ;;  %v6236_v51 = vadd.f32 %v6235_v11, %v6234_v13  ;;  %v5720_v13 = vcombine.low %v8770_v17, %v8777_v26  ;;  %v8882_v63 = vld [vmem:[%s7329_s28 + $0xa8] sm:$0xf]  ;;  %v8892_v42 = vrot.slane %v1722_v5, 5 }
 0x16e   : > { %v6127_v43 = vadd.f32 %v6126_v38, %v6125_v46  ;;  %v6237_v44 = vpop.f32.mrf.mxu1  ;;  %4367 = vmatmul.mubr.bf16.gmra.mxu1 %v5719_v41  ;;  %v1726_v41 = vshrl.u32 %v8865_v45, 16  ;;  %v8879_v46 = vcombine.low %v1677_v14, %v1687_v58  ;;  %v5418_v14 = vld [vmem:[%s7329_s28 + $0xa4] sm:$0x1] }
 0x16f   : > { %v6128_v16 = vpop.f32.mrf.mxu0  ;;  %2940 = vst [vmem:[%s8305_s26 + $0xe0] sm:$0xff] %v2908_v10  ;;  %v2869_v25 = vadd.f32 %v6236_v51, %v2708_v4  ;;  %4374 = vmatprep.mubr.bf16.mxu1 %v8856_v7  ;;  %v8885_v4 = vld [vmem:[%s7329_s28 + $0xac] sm:$0xf]  ;;  %v1696_v51 = vrot.slane %v1695_v62, 4  ;;  %v1715_v7 = vrot.slane %v1713_v59, 4  ;;  %v1740_v62 = vshll.u32 %v8882_v63, 16 }
 0x170   : > { %v2713_v31 = vadd.f32 %v8665_v23, %v6127_v43  ;;  %v6238_v27 = vpop.f32.mrf.mxu1  ;;  %v9476_v10 = vld [vmem:[#allocation11_spill] sm:$0xff]  ;;  %v1706_v43 = vrot.slane %v1705_v53, 4  ;;  %v1728_v58 = vrot.slane %v1726_v41, 4  ;;  %v1746_v53 = vshll.u32 %v8885_v4, 16 }
 0x171   : > { %v6129_v39 = vpop.f32.mrf.mxu0  ;;  %v2909_v37 = vmax.f32 %v2869_v25, 0.0  ;;  %v6239_v1 = vadd.f32 %v6238_v27, %v6237_v44  ;;  %v1737_v25 = vshrl.u32 %v8882_v63, 16  ;;  %v1750_v59 = vshrl.u32 %v8885_v4, 16 }
 0x172   : > { %v6130_v34 = vadd.f32 %v6129_v39, %v6128_v16  ;;  %v6240_v11 = vpop.f32.mrf.mxu1  ;;  %v1701_v5 = vsel %vm7356_vm2, %v1696_v51, %v8852_v56  ;;  %v1719_v41 = vor.u32 %v1718_v2, %v1715_v7  ;;  %v8907_v56 = vrot.slane %v1746_v53, 5 }
 0x173   : > { %v6259_v38 = vpop.f32.mrf.mxu0  ;;  %4214 = vmatmul.mubr.bf16.gmra.mxu0 %v9476_v10  ;;  %2941 = vst [vmem:[%s8305_s26 + $0xe8] sm:$0xff] %v2909_v37  ;;  %v2874_v17 = vadd.f32 %v6239_v1, %v2713_v31  ;;  %v1732_v1 = vshll.u32 %v5418_v14, 16  ;;  %v1752_v2 = vrot.slane %v1750_v59, 4  ;;  %v5419_v14 = vld [vmem:[%s7329_s28 + $0xb0] sm:$0x1] }
 0x174   : > { %v2716_v26 = vadd.f32 %v8665_v23, %v6130_v34  ;;  %4221 = vmatprep.mubr.bf16.mxu0 %v7785_v32  ;;  %v6241_v44 = vpop.f32.mrf.mxu1  ;;  %v8919_v59 = vld [vmem:[%s7329_s28 + $0xb4] sm:$0xf] }
 0x175   : > { %v6260_v16 = vpop.f32.mrf.mxu0  ;;  %v2910_v19 = vmax.f32 %v2874_v17, 0.0  ;;  %v6242_v31 = vadd.f32 %v6241_v44, %v6240_v11  ;;  %v1711_v11 = vsel %vm7356_vm2, %v1706_v43, %v1710_v18  ;;  %v1739_v44 = vrot.slane %v1737_v25, 4 }
 0x176   : > { %v6261_v27 = vadd.f32 %v6260_v16, %v6259_v38  ;;  %v6371_v39 = vpop.f32.mrf.mxu1  ;;  %4375 = vmatmul.mubr.bf16.gmra.mxu1 %v5720_v13  ;;  %v1729_v38 = vor.u32 %v1728_v58, %v8892_v42  ;;  %v1742_v16 = vrot.slane %v1740_v62, 5  ;;  %v5721_v18 = vcombine.low %v8794_v8, %v8798_v50 }
 0x177   : > { %v6262_v37 = vpop.f32.mrf.mxu0  ;;  %2942 = vst [vmem:[%s8305_s26 + $0xf0] sm:$0xff] %v2910_v19  ;;  %v2877_v34 = vadd.f32 %v6242_v31, %v2716_v26  ;;  %4382 = vmatprep.mubr.bf16.mxu1 %v8879_v46  ;;  %v8913_v43 = vcombine.low %v1701_v5, %v1711_v11  ;;  %v1720_v62 = vrot.slane %v1719_v41, 4  ;;  %v1734_v53 = vrot.slane %v1732_v1, 5 }
 0x178   : > { %v3364_v10 = vadd.f32 %v8665_v23, %v6261_v27  ;;  %v6372_v13 = vpop.f32.mrf.mxu1  ;;  %v9477_v27 = vld [vmem:[#allocation13_spill] sm:$0xff]  ;;  %v1753_v8 = vor.u32 %v1752_v2, %v8907_v56  ;;  %v1756_v50 = vshll.u32 %v5419_v14, 16  ;;  %v1761_v41 = vshrl.u32 %v8919_v59, 16 }
 0x179   : > { %v6263_v17 = vpop.f32.mrf.mxu0  ;;  %v2911_v7 = vmax.f32 %v2877_v34, 0.0  ;;  %v6373_v51 = vadd.f32 %v6372_v13, %v6371_v39  ;;  %9478 = vst [vmem:[#allocation7_spill] sm:$0xff] %v8913_v43  ;;  %v8922_v39 = vld [vmem:[%s7329_s28 + $0xb8] sm:$0xf]  ;;  %v1730_v13 = vrot.slane %v1729_v38, 4  ;;  %v1764_v1 = vshll.u32 %v8919_v59, 16 }
 0x17a   : > { %v6264_v26 = vadd.f32 %v6263_v17, %v6262_v37  ;;  %v6374_v19 = vpop.f32.mrf.mxu1  ;;  %v1743_v17 = vor.u32 %v1742_v16, %v1739_v44  ;;  %v1725_v16 = vsel %vm7356_vm2, %v1720_v62, %v8892_v42  ;;  %v5420_v42 = vld [vmem:[%s7329_s28 + $0xbc] sm:$0x1]  ;;  %v1763_v62 = vrot.slane %v1761_v41, 4  ;;  %v8957_v41 = vld [vmem:[%s7329_s28 + $0xc4] sm:$0xf] }
 0x17b   : > { %v6265_v31 = vpop.f32.mrf.mxu0  ;;  %4222 = vmatmul.mubr.bf16.gmra.mxu0 %v9477_v27  ;;  %2943 = vst [vmem:[%s8305_s26 + $0xf8] sm:$0xff] %v2911_v7  ;;  %v3525_v58 = vadd.f32 %v6373_v51, %v3364_v10  ;;  %v1774_v27 = vshrl.u32 %v8922_v39, 16 }
 0x17c   : > { %v3367_v25 = vadd.f32 %v8665_v23, %v6264_v26  ;;  %4229 = vmatprep.mubr.bf16.mxu0 %v7821_v3  ;;  %v6375_v37 = vpop.f32.mrf.mxu1  ;;  %v1770_v26 = vshll.u32 %v8922_v39, 16  ;;  %v1766_v3 = vrot.slane %v1764_v1, 5 }
 0x17d   : > { %v6266_v34 = vpop.f32.mrf.mxu0  ;;  %v3651_v5 = vmax.f32 %v3525_v58, 0.0  ;;  %v6376_v10 = vadd.f32 %v6375_v37, %v6374_v19  ;;  %v1735_v19 = vsel %vm7356_vm2, %v1730_v13, %v1734_v53  ;;  %v1758_v58 = vrot.slane %v1756_v50, 5 }
 0x17e   : > { %v6267_v11 = vadd.f32 %v6266_v34, %v6265_v31  ;;  %v6377_v7 = vpop.f32.mrf.mxu1  ;;  %4383 = vmatmul.mubr.bf16.gmra.mxu1 %v5721_v18  ;;  %v1744_v31 = vrot.slane %v1743_v17, 4  ;;  %v1754_v18 = vrot.slane %v1753_v8, 4  ;;  %v8941_v53 = vrot.slane %v1770_v26, 5 }
 0x17f   : > { %v6268_v51 = vpop.f32.mrf.mxu0  ;;  %5680 = vst [vmem:[%s8305_s26 + $0x100] sm:$0xff] %v3651_v5  ;;  %v3528_v38 = vadd.f32 %v6376_v10, %v3367_v25  ;;  %4390 = vmatprep.mubr.bf16.mxu1 %v8913_v43  ;;  %v5722_v5 = vcombine.low %v8829_v28, %v8832_v48  ;;  %v9479_v43 = vld [vmem:[#allocation14_spill] sm:$0xff]  ;;  %v1776_v13 = vrot.slane %v1774_v27, 4  ;;  %v8946_v50 = vcombine.low %v1725_v16, %v1735_v19 }
 0x180   : > { %v3372_v44 = vadd.f32 %v8665_v23, %v6267_v11  ;;  %v6378_v2 = vpop.f32.mrf.mxu1  ;;  %v8949_v28 = vld [vmem:[%s7329_s28 + $0xc0] sm:$0xf] }
 0x181   : > { %v6269_v14 = vpop.f32.mrf.mxu0  ;;  %v3652_v37 = vmax.f32 %v3528_v38, 0.0  ;;  %v6379_v25 = vadd.f32 %v6378_v2, %v6377_v7  ;;  %v1749_v7 = vsel %vm7356_vm2, %v1744_v31, %v8907_v56  ;;  %v1780_v38 = vshll.u32 %v5420_v42, 16 }
 0x182   : > { %v6270_v34 = vadd.f32 %v6269_v14, %v6268_v51  ;;  %v6380_v10 = vpop.f32.mrf.mxu1  ;;  %v1759_v51 = vsel %vm7356_vm2, %v1754_v18, %v1758_v58  ;;  %v1767_v2 = vor.u32 %v1766_v3, %v1763_v62  ;;  %v1777_v14 = vor.u32 %v1776_v13, %v8941_v53 }
 0x183   : > { %v6271_v11 = vpop.f32.mrf.mxu0  ;;  %4230 = vmatmul.mubr.bf16.gmra.mxu0 %v9479_v43  ;;  %5681 = vst [vmem:[%s8305_s26 + $0x108] sm:$0xff] %v3652_v37  ;;  %v3533_v17 = vadd.f32 %v6379_v25, %v3372_v44  ;;  %v1785_v19 = vshrl.u32 %v8949_v28, 16  ;;  %v1788_v37 = vshll.u32 %v8949_v28, 16  ;;  %v1794_v18 = vshll.u32 %v8957_v41, 16 }
 0x184   : > { %v3375_v8 = vadd.f32 %v8665_v23, %v6270_v34  ;;  %4237 = vmatprep.mubr.bf16.mxu0 %v7857_v57  ;;  %v6381_v48 = vpop.f32.mrf.mxu1  ;;  %v1798_v58 = vshrl.u32 %v8957_v41, 16  ;;  %v5723_v3 = vcombine.low %v8859_v6, %v8865_v45  ;;  %v1782_v62 = vrot.slane %v1780_v38, 5  ;;  %v5421_v45 = vld [vmem:[%s7329_s28 + $0xc8] sm:$0x1] }
 0x185   : > { %v6272_v43 = vpop.f32.mrf.mxu0  ;;  %v3653_v1 = vmax.f32 %v3533_v17, 0.0  ;;  %v6382_v26 = vadd.f32 %v6381_v48, %v6380_v10  ;;  %v1768_v48 = vrot.slane %v1767_v2, 4 }
 0x186   : > { %v6273_v27 = vadd.f32 %v6272_v43, %v6271_v11  ;;  %v6383_v44 = vpop.f32.mrf.mxu1  ;;  %4391 = vmatmul.mubr.bf16.gmra.mxu1 %v5722_v5  ;;  %v8969_v5 = vcombine.low %v1749_v7, %v1759_v51  ;;  %v1778_v43 = vrot.slane %v1777_v14, 4  ;;  %v8976_v7 = vrot.slane %v1794_v18, 5  ;;  %v8979_v14 = vld [vmem:[%s7329_s28 + $0xcc] sm:$0xf] }
 0x187   : > { %v6274_v16 = vpop.f32.mrf.mxu0  ;;  %5682 = vst [vmem:[%s8305_s26 + $0x110] sm:$0xff] %v3653_v1  ;;  %v3536_v56 = vadd.f32 %v6382_v26, %v3375_v8  ;;  %4398 = vmatprep.mubr.bf16.mxu1 %v8946_v50  ;;  %v9480_v8 = vld [vmem:[#allocation16_spill] sm:$0xff]  ;;  %v1787_v1 = vrot.slane %v1785_v19, 4  ;;  %v1790_v26 = vrot.slane %v1788_v37, 5  ;;  %v1800_v51 = vrot.slane %v1798_v58, 4 }
 0x188   : > { %v3380_v31 = vadd.f32 %v8665_v23, %v6273_v27  ;;  %v6384_v25 = vpop.f32.mrf.mxu1  ;;  %v8982_v19 = vld [vmem:[%s7329_s28 + $0xd0] sm:$0xf]  ;;  %v1783_v18 = vsel %vm7356_vm2, %v1778_v43, %v1782_v62  ;;  %v1804_v58 = vshll.u32 %v5421_v45, 16 }
 0x189   : > { %v6275_v34 = vpop.f32.mrf.mxu0  ;;  %v3654_v10 = vmax.f32 %v3536_v56, 0.0  ;;  %v6385_v11 = vadd.f32 %v6384_v25, %v6383_v44  ;;  %v1773_v25 = vsel %vm7356_vm2, %v1768_v48, %v8941_v53  ;;  %v1812_v53 = vshll.u32 %v8979_v14, 16 }
 0x18a   : > { %v6276_v42 = vadd.f32 %v6275_v34, %v6274_v16  ;;  %v6386_v13 = vpop.f32.mrf.mxu1  ;;  %v1822_v62 = vshrl.u32 %v8982_v19, 16 }
 0x18b   : > { %v6277_v17 = vpop.f32.mrf.mxu0  ;;  %4238 = vmatmul.mubr.bf16.gmra.mxu0 %v9480_v8  ;;  %5683 = vst [vmem:[%s8305_s26 + $0x118] sm:$0xff] %v3654_v10  ;;  %v3541_v27 = vadd.f32 %v6385_v11, %v3380_v31  ;;  %v1791_v11 = vor.u32 %v1790_v26, %v1787_v1  ;;  %v1818_v8 = vshll.u32 %v8982_v19, 16  ;;  %v5724_v1 = vcombine.low %v8882_v63, %v8885_v4 }
 0x18c   : > { %v3383_v6 = vadd.f32 %v8665_v23, %v6276_v42  ;;  %4245 = vmatprep.mubr.bf16.mxu0 %v7890_v55  ;;  %v6387_v38 = vpop.f32.mrf.mxu1  ;;  %v1801_v42 = vor.u32 %v1800_v51, %v8976_v7  ;;  %v9000_v26 = vcombine.low %v1773_v25, %v1783_v18  ;;  %v1806_v51 = vrot.slane %v1804_v58, 5  ;;  %v5422_v58 = vld [vmem:[%s7329_s28 + $0xd4] sm:$0x1] }
 0x18d   : > { %v6278_v44 = vpop.f32.mrf.mxu0  ;;  %v3655_v16 = vmax.f32 %v3541_v27, 0.0  ;;  %v6388_v2 = vadd.f32 %v6387_v38, %v6386_v13  ;;  %v9481_v38 = vld [vmem:[#allocation17_spill] sm:$0xff]  ;;  %v1824_v63 = vrot.slane %v1822_v62, 4 }
 0x18e   : > { %v6279_v56 = vadd.f32 %v6278_v44, %v6277_v17  ;;  %v6389_v37 = vpop.f32.mrf.mxu1  ;;  %4399 = vmatmul.mubr.bf16.gmra.mxu1 %v5723_v3  ;;  %v1809_v17 = vshrl.u32 %v8979_v14, 16 }
 0x18f   : > { %v6280_v31 = vpop.f32.mrf.mxu0  ;;  %5684 = vst [vmem:[%s8305_s26 + $0x120] sm:$0xff] %v3655_v16  ;;  %v3544_v34 = vadd.f32 %v6388_v2, %v3383_v6  ;;  %4406 = vmatprep.mubr.bf16.mxu1 %v8969_v5  ;;  %v1792_v2 = vrot.slane %v1791_v11, 4 }
 0x190   : > { %v3388_v10 = vadd.f32 %v8665_v23, %v6279_v56  ;;  %v6390_v3 = vpop.f32.mrf.mxu1  ;;  %v1802_v56 = vrot.slane %v1801_v42, 4 }
 0x191   : > { %v6281_v13 = vpop.f32.mrf.mxu0  ;;  %v3656_v48 = vmax.f32 %v3544_v34, 0.0  ;;  %v6391_v43 = vadd.f32 %v6390_v3, %v6389_v37  ;;  %v1811_v34 = vrot.slane %v1809_v17, 4  ;;  %v1814_v3 = vrot.slane %v1812_v53, 5 }
 0x192   : > { %v6282_v27 = vadd.f32 %v6281_v13, %v6280_v31  ;;  %v6392_v6 = vpop.f32.mrf.mxu1  ;;  %v9005_v13 = vrot.slane %v1818_v8, 5  ;;  %v1797_v11 = vsel %vm7356_vm2, %v1792_v2, %v8976_v7  ;;  %v1807_v53 = vsel %vm7356_vm2, %v1802_v56, %v1806_v51 }
 0x193   : > { %v6283_v45 = vpop.f32.mrf.mxu0  ;;  %4246 = vmatmul.mubr.bf16.gmra.mxu0 %v9481_v38  ;;  %5685 = vst [vmem:[%s8305_s26 + $0x128] sm:$0xff] %v3656_v48  ;;  %v3549_v44 = vadd.f32 %v6391_v43, %v3388_v10  ;;  %v1815_v8 = vor.u32 %v1814_v3, %v1811_v34  ;;  %v9023_v51 = vcombine.low %v1797_v11, %v1807_v53 }
 0x194   : > { %v3391_v16 = vadd.f32 %v8665_v23, %v6282_v27  ;;  %4253 = vmatprep.mubr.bf16.mxu0 %v7923_v24  ;;  %v6393_v37 = vpop.f32.mrf.mxu1  ;;  %v1825_v62 = vor.u32 %v1824_v63, %v9005_v13 }
 0x195   : > { %v6284_v31 = vpop.f32.mrf.mxu0  ;;  %v3657_v4 = vmax.f32 %v3549_v44, 0.0  ;;  %v6394_v25 = vadd.f32 %v6393_v37, %v6392_v6  ;;  %v1828_v6 = vshll.u32 %v5422_v58, 16  ;;  %v9482_v37 = vld [vmem:[#allocation18_spill] sm:$0xff]  ;;  %v1816_v3 = vrot.slane %v1815_v8, 4 }
 0x196   : > { %v6285_v18 = vadd.f32 %v6284_v31, %v6283_v45  ;;  %v6395_v48 = vpop.f32.mrf.mxu1  ;;  %4407 = vmatmul.mubr.bf16.gmra.mxu1 %v5724_v1  ;;  %v5725_v31 = vcombine.low %v8919_v59, %v8922_v39  ;;  %v1826_v63 = vrot.slane %v1825_v62, 4 }
 0x197   : > { %v6286_v10 = vpop.f32.mrf.mxu0  ;;  %5686 = vst [vmem:[%s8305_s26 + $0x130] sm:$0xff] %v3657_v4  ;;  %v3552_v43 = vadd.f32 %v6394_v25, %v3391_v16  ;;  %4414 = vmatprep.mubr.bf16.mxu1 %v9000_v26  ;;  %v1830_v4 = vrot.slane %v1828_v6, 5  ;;  %v1821_v11 = vsel %vm7356_vm2, %v1816_v3, %v9005_v13 }
 0x198   : > { %v3396_v27 = vadd.f32 %v8665_v23, %v6285_v18  ;;  %v6396_v42 = vpop.f32.mrf.mxu1 }
 0x199   : > { %v6287_v17 = vpop.f32.mrf.mxu0  ;;  %v3658_v45 = vmax.f32 %v3552_v43, 0.0  ;;  %v6397_v38 = vadd.f32 %v6396_v42, %v6395_v48  ;;  %v1831_v42 = vsel %vm7356_vm2, %v1826_v63, %v1830_v4 }
 0x19a   : > { %v6288_v1 = vadd.f32 %v6287_v17, %v6286_v10  ;;  %v6398_v44 = vpop.f32.mrf.mxu1  ;;  %v7162_v17 = vld [vmem:[%s7329_s28 + $0x1c] sm:$0xf]  ;;  %v9046_v13 = vcombine.low %v1821_v11, %v1831_v42 }
 0x19b   : > { %v6289_v16 = vpop.f32.mrf.mxu0  ;;  %4254 = vmatmul.mubr.bf16.gmra.mxu0 %v9482_v37  ;;  %5687 = vst [vmem:[%s8305_s26 + $0x138] sm:$0xff] %v3658_v45  ;;  %v3557_v7 = vadd.f32 %v6397_v38, %v3396_v27  ;;  %v1898_v53 = vrot.slane %v7162_v17, 5  ;;  %v5423_v45 = vld [vmem:[%s7329_s28 + $0x18] sm:$0xe] }
 0x19c   : > { %v3399_v2 = vadd.f32 %v8665_v23, %v6288_v1  ;;  %4261 = vmatprep.mubr.bf16.mxu0 %v7959_v9  ;;  %v6399_v56 = vpop.f32.mrf.mxu1  ;;  %v9029_v23 = vld [vmem:[%s9390_s2] ss:$0 sm:$0xff] }
 0x19d   : > { %v6290_v34 = vpop.f32.mrf.mxu0  ;;  %v3659_v25 = vmax.f32 %v3557_v7, 0.0  ;;  %v6400_v18 = vadd.f32 %v6399_v56, %v6398_v44  ;;  %v9483_v44 = vld [vmem:[#allocation19_spill] sm:$0xff]  ;;  %v1900_v56 = vrot.slane %v1898_v53, 4 }
 0x19e   : > { %v6291_v58 = vadd.f32 %v6290_v34, %v6289_v16  ;;  %v6401_v48 = vpop.f32.mrf.mxu1  ;;  %4415 = vmatmul.mubr.bf16.gmra.mxu1 %v5725_v31  ;;  %v5726_v16 = vcombine.low %v8949_v28, %v8957_v41  ;;  %v7163_v34 = vld [vmem:[%s7329_s28 + $0x20] sm:$0x1] }
 0x19f   : > { %v6292_v59 = vpop.f32.mrf.mxu0  ;;  %5688 = vst [vmem:[%s8305_s26 + $0x140] sm:$0xff] %v3659_v25  ;;  %v3560_v39 = vadd.f32 %v6400_v18, %v3399_v2  ;;  %4422 = vmatprep.mubr.bf16.mxu1 %v9023_v51  ;;  %v5439_v2 = vrot.slane %v5423_v45, 9  ;;  %v1901_v3 = vrot.slane %v7163_v34, 5  ;;  %v9484_v45 = vld [vmem:[#allocation20_spill] sm:$0xff] }
 0x1a0   : > { %v3404_v10 = vadd.f32 %v9029_v23, %v6291_v58  ;;  %v6402_v43 = vpop.f32.mrf.mxu1 }
 0x1a1   : > { %v6293_v27 = vpop.f32.mrf.mxu0  ;;  %v3660_v8 = vmax.f32 %v3560_v39, 0.0  ;;  %v6403_v62 = vadd.f32 %v6402_v43, %v6401_v48  ;;  %v1899_v39 = vsel %vm7978_vm5, %v5439_v2, %v1898_v53  ;;  %v7164_v43 = vld [vmem:[%s7329_s28 + $0x28] sm:$0xf]  ;;  %v7165_v2 = vld [vmem:[%s7329_s28 + $0x2c] sm:$0x1] }
 0x1a2   : > { %v6294_v6 = vadd.f32 %v6293_v27, %v6292_v59  ;;  %v6404_v38 = vpop.f32.mrf.mxu1  ;;  %v1905_v27 = vrot.slane %v7164_v43, 5 }
 0x1a3   : > { %v6295_v1 = vpop.f32.mrf.mxu0  ;;  %4262 = vmatmul.mubr.bf16.gmra.mxu0 %v9483_v44  ;;  %5689 = vst [vmem:[%s8305_s26 + $0x148] sm:$0xff] %v3660_v8  ;;  %v3565_v37 = vadd.f32 %v6403_v62, %v3404_v10  ;;  %v1902_v10 = vsel %vm7978_vm5, %v1900_v56, %v1901_v3  ;;  %v5424_v8 = vld [vmem:[%s7329_s28 + $0x24] sm:$0xe]  ;;  %v9485_v44 = vld [vmem:[#allocation21_spill] sm:$0xff]  ;;  %v1908_v56 = vrot.slane %v7165_v2, 5 }
 0x1a4   : > { %v3407_v54 = vadd.f32 %v9029_v23, %v6294_v6  ;;  %4269 = vmatprep.mubr.bf16.mxu0 %v7996_v49  ;;  %v6405_v31 = vpop.f32.mrf.mxu1 }
 0x1a5   : > { %v6296_v7 = vpop.f32.mrf.mxu0  ;;  %v3661_v63 = vmax.f32 %v3565_v37, 0.0  ;;  %v6406_v4 = vadd.f32 %v6405_v31, %v6404_v38  ;;  %v5727_v38 = vcombine.low %v8979_v14, %v8982_v19  ;;  %v5440_v31 = vrot.slane %v5424_v8, 9 }
 0x1a6   : > { %v6297_v25 = vadd.f32 %v6296_v7, %v6295_v1  ;;  %v6407_v28 = vpop.f32.mrf.mxu1  ;;  %4423 = vmatmul.mubr.bf16.gmra.mxu1 %v5726_v16  ;;  %v5872_v16 = vcombine.low %v1899_v39, %v1902_v10  ;;  %v1907_v7 = vrot.slane %v1905_v27, 4 }
 0x1a7   : > { %v6298_v41 = vpop.f32.mrf.mxu0  ;;  %5690 = vst [vmem:[%s8305_s26 + $0x150] sm:$0xff] %v3661_v63  ;;  %v3568_v18 = vadd.f32 %v6406_v4, %v3407_v54  ;;  %4430 = vmatprep.mubr.bf16.mxu1 %v9046_v13 }
 0x1a8   : > { %v3412_v58 = vadd.f32 %v9029_v23, %v6297_v25  ;;  %v6408_v48 = vpop.f32.mrf.mxu1 }
 0x1a9   : > { %v6299_v59 = vpop.f32.mrf.mxu0  ;;  %v3662_v11 = vmax.f32 %v3568_v18, 0.0  ;;  %v6409_v42 = vadd.f32 %v6408_v48, %v6407_v28  ;;  %v1906_v18 = vsel %vm7978_vm5, %v5440_v31, %v1905_v27  ;;  %v7166_v48 = vld [vmem:[%s7329_s28 + $0x34] sm:$0xf] }
 0x1aa   : > { %v6300_v17 = vadd.f32 %v6299_v59, %v6298_v41  ;;  %v6410_v62 = vpop.f32.mrf.mxu1  ;;  %v1912_v59 = vrot.slane %v7166_v48, 5 }
 0x1ab   : > { %v6301_v6 = vpop.f32.mrf.mxu0  ;;  %4270 = vmatmul.mubr.bf16.gmra.mxu0 %v9484_v45  ;;  %5691 = vst [vmem:[%s8305_s26 + $0x158] sm:$0xff] %v3662_v11  ;;  %v3573_v1 = vadd.f32 %v6409_v42, %v3412_v58  ;;  %v1909_v58 = vsel %vm7978_vm5, %v1907_v7, %v1908_v56  ;;  %v5425_v11 = vld [vmem:[%s7329_s28 + $0x30] sm:$0xe] }
 0x1ac   : > { %v3415_v53 = vadd.f32 %v9029_v23, %v6300_v17  ;;  %4857 = vmatprep.mubr.bf16.mxu0 %v9485_v44  ;;  %v6411_v37 = vpop.f32.mrf.mxu1  ;;  %v5873_v27 = vcombine.low %v1906_v18, %v1909_v58 }
 0x1ad   : > { %v6302_v54 = vpop.f32.mrf.mxu0  ;;  %v3663_v34 = vmax.f32 %v3573_v1, 0.0  ;;  %v6412_v3 = vadd.f32 %v6411_v37, %v6410_v62  ;;  %v1914_v1 = vrot.slane %v1912_v59, 4 }
 0x1ae   : > { %v6303_v63 = vadd.f32 %v6302_v54, %v6301_v6  ;;  %v6413_v4 = vpop.f32.mrf.mxu1  ;;  %4431 = vmatmul.mubr.bf16.gmra.mxu1 %v5727_v38  ;;  %v5441_v38 = vrot.slane %v5425_v11, 9  ;;  %v7169_v11 = vld [vmem:[%s7329_s28 + $0x44] sm:$0x1] }
 0x1af   : > { %v6304_v14 = vpop.f32.mrf.mxu0  ;;  %5692 = vst [vmem:[%s8305_s26 + $0x160] sm:$0xff] %v3663_v34  ;;  %v3576_v19 = vadd.f32 %v6412_v3, %v3415_v53  ;;  %5018 = vmatprep.mubr.bf16.mxu1 %v5872_v16  ;;  %v7167_v53 = vld [vmem:[%s7329_s28 + $0x38] sm:$0x1] }
 0x1b0   : > { %v3420_v25 = vadd.f32 %v9029_v23, %v6303_v63  ;;  %v6414_v28 = vpop.f32.mrf.mxu1  ;;  %v1915_v44 = vrot.slane %v7167_v53, 5  ;;  %v1913_v34 = vsel %vm7978_vm5, %v5441_v38, %v1912_v59  ;;  %v7168_v63 = vld [vmem:[%s7329_s28 + $0x40] sm:$0xf] }
 0x1b1   : > { %v6305_v41 = vpop.f32.mrf.mxu0  ;;  %v3664_v39 = vmax.f32 %v3576_v19, 0.0  ;;  %v6415_v10 = vadd.f32 %v6414_v28, %v6413_v4  ;;  %v1919_v4 = vrot.slane %v7168_v63, 5 }
 0x1b2   : > { %v6306_v43 = vadd.f32 %v6305_v41, %v6304_v14  ;;  %v6416_v42 = vpop.f32.mrf.mxu1  ;;  %v1916_v3 = vsel %vm7978_vm5, %v1914_v1, %v1915_v44  ;;  %v7170_v44 = vld [vmem:[%s7329_s28 + $0x4c] sm:$0xf] }
 0x1b3   : > { %v6307_v17 = vpop.f32.mrf.mxu0  ;;  %4858 = vmatmul.mubr.bf16.vlgmr.msra.gmra.mxu0 %v7398_v29  ;;  %5693 = vst [vmem:[%s8305_s26 + $0x168] sm:$0xff] %v3664_v39  ;;  %v3581_v8 = vadd.f32 %v6415_v10, %v3420_v25  ;;  %v5426_v25 = vld [vmem:[%s7329_s28 + $0x3c] sm:$0xe]  ;;  %v5874_v48 = vcombine.low %v1913_v34, %v1916_v3 }
 0x1b4   : > { %v3423_v62 = vadd.f32 %v9029_v23, %v6306_v43  ;;  %4865 = vmatprep.mubr.bf16.mxu0 %v8034_v30  ;;  %v6417_v6 = vpop.f32.mrf.mxu1  ;;  %v5442_v10 = vrot.slane %v5426_v25, 9  ;;  %v1921_v43 = vrot.slane %v1919_v4, 4 }
 0x1b5   : > { %v6308_v45 = vpop.f32.mrf.mxu0  ;;  %v3665_v16 = vmax.f32 %v3581_v8, 0.0  ;;  %v6418_v37 = vadd.f32 %v6417_v6, %v6416_v42  ;;  %v1922_v42 = vrot.slane %v7169_v11, 5 }
 0x1b6   : > { %v6309_v54 = vadd.f32 %v6308_v45, %v6307_v17  ;;  %v6419_v31 = vpop.f32.mrf.mxu1  ;;  %5019 = vmatmul.mubr.bf16.vlgmr.msra.gmra.mxu1 %v8494_v22  ;;  %v1920_v1 = vsel %vm7978_vm5, %v5442_v10, %v1919_v4  ;;  %v7172_v10 = vld [vmem:[%s7329_s28 + $0x58] sm:$0xf] }
 0x1b7   : > { %v6310_v29 = vpop.f32.mrf.mxu0  ;;  %5694 = vst [vmem:[%s8305_s26 + $0x170] sm:$0xff] %v3665_v16  ;;  %v3584_v7 = vadd.f32 %v6418_v37, %v3423_v62  ;;  %5026 = vmatprep.mubr.bf16.mxu1 %v5873_v27  ;;  %v1923_v53 = vsel %vm7978_vm5, %v1921_v43, %v1922_v42  ;;  %v1926_v16 = vrot.slane %v7170_v44, 5  ;;  %v1933_v43 = vrot.slane %v7172_v10, 5  ;;  %v7175_v10 = vld [vmem:[%s7329_s28 + $0x68] sm:$0x1] }
 0x1b8   : > { %v3428_v30 = vadd.f32 %v9029_v23, %v6309_v54  ;;  %v6420_v2 = vpop.f32.mrf.mxu1 }
 0x1b9   : > { %v6311_v56 = vpop.f32.mrf.mxu0  ;;  %v3666_v14 = vmax.f32 %v3584_v7, 0.0  ;;  %v6421_v22 = vadd.f32 %v6420_v2, %v6419_v31  ;;  %v5427_v31 = vld [vmem:[%s7329_s28 + $0x48] sm:$0xe]  ;;  %v1928_v4 = vrot.slane %v1926_v16, 4 }
 0x1ba   : > { %v6312_v19 = vadd.f32 %v6311_v56, %v6310_v29  ;;  %v6422_v28 = vpop.f32.mrf.mxu1  ;;  %v5875_v56 = vcombine.low %v1920_v1, %v1923_v53  ;;  %v5443_v63 = vrot.slane %v5427_v31, 9  ;;  %v1935_v1 = vrot.slane %v1933_v43, 4  ;;  %v7173_v53 = vld [vmem:[%s7329_s28 + $0x5c] sm:$0x1] }
 0x1bb   : > { %v6313_v41 = vpop.f32.mrf.mxu0  ;;  %4866 = vmatmul.mubr.bf16.gmra.mxu0 %v7449_v20  ;;  %5695 = vst [vmem:[%s8305_s26 + $0x178] sm:$0xff] %v3666_v14  ;;  %v3589_v18 = vadd.f32 %v6421_v22, %v3428_v30  ;;  %v7171_v14 = vld [vmem:[%s7329_s28 + $0x50] sm:$0x1]  ;;  %v1936_v44 = vrot.slane %v7173_v53, 5 }
 0x1bc   : > { %v3431_v58 = vadd.f32 %v9029_v23, %v6312_v19  ;;  %4873 = vmatprep.mubr.bf16.mxu0 %v8074_v35  ;;  %v6423_v59 = vpop.f32.mrf.mxu1  ;;  %v1929_v22 = vrot.slane %v7171_v14, 5 }
 0x1bd   : > { %v6314_v39 = vpop.f32.mrf.mxu0  ;;  %v3667_v17 = vmax.f32 %v3589_v18, 0.0  ;;  %v6424_v8 = vadd.f32 %v6423_v59, %v6422_v28  ;;  %v1927_v59 = vsel %vm7978_vm5, %v5443_v63, %v1926_v16 }
 0x1be   : > { %v6315_v62 = vadd.f32 %v6314_v39, %v6313_v41  ;;  %v6425_v27 = vpop.f32.mrf.mxu1  ;;  %5027 = vmatmul.mubr.bf16.gmra.mxu1 %v8534_v15  ;;  %v1930_v39 = vsel %vm7978_vm5, %v1928_v4, %v1929_v22  ;;  %v5429_v22 = vld [vmem:[%s7329_s28 + $0x60] sm:$0xe] }
 0x1bf   : > { %v6316_v20 = vpop.f32.mrf.mxu0  ;;  %5696 = vst [vmem:[%s8305_s26 + $0x180] sm:$0xff] %v3667_v17  ;;  %v3592_v6 = vadd.f32 %v6424_v8, %v3431_v58  ;;  %5034 = vmatprep.mubr.bf16.mxu1 %v5874_v48  ;;  %v5428_v17 = vld [vmem:[%s7329_s28 + $0x54] sm:$0xe] }
 0x1c0   : > { %v3436_v35 = vadd.f32 %v9029_v23, %v6315_v62  ;;  %v6426_v45 = vpop.f32.mrf.mxu1 }
 0x1c1   : > { %v6317_v38 = vpop.f32.mrf.mxu0  ;;  %v3668_v37 = vmax.f32 %v3592_v6, 0.0  ;;  %v6427_v15 = vadd.f32 %v6426_v45, %v6425_v27  ;;  %v5876_v6 = vcombine.low %v1927_v59, %v1930_v39  ;;  %v5445_v59 = vrot.slane %v5429_v22, 9 }
 0x1c2   : > { %v6318_v54 = vadd.f32 %v6317_v38, %v6316_v20  ;;  %v6428_v29 = vpop.f32.mrf.mxu1  ;;  %v5444_v38 = vrot.slane %v5428_v17, 9 }
 0x1c3   : > { %v6319_v7 = vpop.f32.mrf.mxu0  ;;  %4874 = vmatmul.mubr.bf16.gmra.mxu0 %v7497_v12  ;;  %5697 = vst [vmem:[%s8305_s26 + $0x188] sm:$0xff] %v3668_v37  ;;  %v3597_v30 = vadd.f32 %v6427_v15, %v3436_v35 }
 0x1c4   : > { %v3439_v2 = vadd.f32 %v9029_v23, %v6318_v54  ;;  %4881 = vmatprep.mubr.bf16.mxu0 %v8117_v47  ;;  %v6429_v34 = vpop.f32.mrf.mxu1 }
 0x1c5   : > { %v6320_v3 = vpop.f32.mrf.mxu0  ;;  %v3669_v19 = vmax.f32 %v3597_v30, 0.0  ;;  %v6430_v25 = vadd.f32 %v6429_v34, %v6428_v29  ;;  %v7174_v34 = vld [vmem:[%s7329_s28 + $0x64] sm:$0xf] }
 0x1c6   : > { %v6321_v28 = vadd.f32 %v6320_v3, %v6319_v7  ;;  %v6431_v41 = vpop.f32.mrf.mxu1  ;;  %5035 = vmatmul.mubr.bf16.gmra.mxu1 %v8591_v40  ;;  %v1940_v3 = vrot.slane %v7174_v34, 5 }
 0x1c7   : > { %v6322_v12 = vpop.f32.mrf.mxu0  ;;  %5698 = vst [vmem:[%s8305_s26 + $0x190] sm:$0xff] %v3669_v19  ;;  %v3600_v18 = vadd.f32 %v6430_v25, %v3439_v2  ;;  %5042 = vmatprep.mubr.bf16.mxu1 %v5875_v56  ;;  %v1934_v2 = vsel %vm7978_vm5, %v5444_v38, %v1933_v43  ;;  %v1937_v56 = vsel %vm7978_vm5, %v1935_v1, %v1936_v44  ;;  %v1943_v43 = vrot.slane %v7175_v10, 5  ;;  %v7176_v1 = vld [vmem:[%s7329_s28 + $0x70] sm:$0xf] }
 0x1c8   : > { %v3444_v47 = vadd.f32 %v9029_v23, %v6321_v28  ;;  %v6432_v58 = vpop.f32.mrf.mxu1  ;;  %v9487_v28 = vld [vmem:[#allocation6_spill] sm:$0xff]  ;;  %v1942_v39 = vrot.slane %v1940_v3, 4  ;;  %v1947_v53 = vrot.slane %v7176_v1, 5 }
 0x1c9   : > { %v6323_v48 = vpop.f32.mrf.mxu0  ;;  %v3670_v11 = vmax.f32 %v3600_v18, 0.0  ;;  %v6433_v40 = vadd.f32 %v6432_v58, %v6431_v41  ;;  %v9488_v18 = vld [vmem:[#allocation22_spill] sm:$0xff] }
 0x1ca   : > { %v6324_v42 = vadd.f32 %v6323_v48, %v6322_v12  ;;  %v6434_v8 = vpop.f32.mrf.mxu1  ;;  %v1944_v38 = vsel %vm7978_vm5, %v1942_v39, %v1943_v43  ;;  %v1949_v34 = vrot.slane %v1947_v53, 4  ;;  %v7179_v1 = vld [vmem:[%s7329_s28 + $0x80] sm:$0x1] }
 0x1cb   : > { %v6325_v62 = vpop.f32.mrf.mxu0  ;;  %4882 = vmatmul.mubr.bf16.gmra.mxu0 %v7539_v60  ;;  %5699 = vst [vmem:[%s8305_s26 + $0x198] sm:$0xff] %v3670_v11  ;;  %v3605_v27 = vadd.f32 %v6433_v40, %v3444_v47  ;;  %v9486_v60 = vld [vmem:[#allocation2_spill] sm:$0xff]  ;;  %v5877_v47 = vcombine.low %v1934_v2, %v1937_v56 }
 0x1cc   : > { %v3447_v20 = vadd.f32 %v9029_v23, %v6324_v42  ;;  %4889 = vmatprep.mubr.bf16.mxu0 %v8160_v0  ;;  %v6435_v35 = vpop.f32.mrf.mxu1 }
 0x1cd   : > { %v6326_v45 = vpop.f32.mrf.mxu0  ;;  %v3671_v16 = vmax.f32 %v3605_v27, 0.0  ;;  %v6436_v37 = vadd.f32 %v6435_v35, %v6434_v8  ;;  %v9489_v8 = vld [vmem:[#allocation3_spill] sm:$0xff] }
 0x1ce   : > { %v6327_v15 = vadd.f32 %v6326_v45, %v6325_v62  ;;  %v6437_v54 = vpop.f32.mrf.mxu1  ;;  %5043 = vmatmul.mubr.bf16.gmra.mxu1 %v9486_v60  ;;  %v1941_v45 = vsel %vm7978_vm5, %v5445_v59, %v1940_v3  ;;  %v7177_v3 = vld [vmem:[%s7329_s28 + $0x74] sm:$0x1] }
 0x1cf   : > { %v6328_v31 = vpop.f32.mrf.mxu0  ;;  %5700 = vst [vmem:[%s8305_s26 + $0x1a0] sm:$0xff] %v3671_v16  ;;  %v3608_v29 = vadd.f32 %v6436_v37, %v3447_v20  ;;  %5050 = vmatprep.mubr.bf16.mxu1 %v5876_v6 }
 0x1d0   : > { %v3452_v0 = vadd.f32 %v9029_v23, %v6327_v15  ;;  %v6438_v7 = vpop.f32.mrf.mxu1  ;;  %v5430_v15 = vld [vmem:[%s7329_s28 + $0x6c] sm:$0xe] }
 0x1d1   : > { %v6329_v30 = vpop.f32.mrf.mxu0  ;;  %v3672_v63 = vmax.f32 %v3608_v29, 0.0  ;;  %v6439_v4 = vadd.f32 %v6438_v7, %v6437_v54  ;;  %v5878_v7 = vcombine.low %v1941_v45, %v1944_v38  ;;  %v5446_v56 = vrot.slane %v5430_v15, 9 }
 0x1d2   : > { %v6330_v14 = vadd.f32 %v6329_v30, %v6328_v31  ;;  %v6440_v19 = vpop.f32.mrf.mxu1 }
 0x1d3   : > { %v6331_v25 = vpop.f32.mrf.mxu0  ;;  %4890 = vmatmul.mubr.bf16.gmra.mxu0 %v9487_v28  ;;  %5701 = vst [vmem:[%s8305_s26 + $0x1a8] sm:$0xff] %v3672_v63  ;;  %v3613_v41 = vadd.f32 %v6439_v4, %v3452_v0  ;;  %v9490_v0 = vld [vmem:[#allocation23_spill] sm:$0xff]  ;;  %v1950_v63 = vrot.slane %v7177_v3, 5 }
 0x1d4   : > { %v3455_v12 = vadd.f32 %v9029_v23, %v6330_v14  ;;  %4897 = vmatprep.mubr.bf16.mxu0 %v9488_v18  ;;  %v6441_v58 = vpop.f32.mrf.mxu1 }
 0x1d5   : > { %v6332_v48 = vpop.f32.mrf.mxu0  ;;  %v3673_v11 = vmax.f32 %v3613_v41, 0.0  ;;  %v6442_v40 = vadd.f32 %v6441_v58, %v6440_v19  ;;  %v1951_v58 = vsel %vm7978_vm5, %v1949_v34, %v1950_v63  ;;  %v5432_v63 = vld [vmem:[%s7329_s28 + $0x84] sm:$0xe] }
 0x1d6   : > { %v6333_v42 = vadd.f32 %v6332_v48, %v6331_v25  ;;  %v6443_v17 = vpop.f32.mrf.mxu1  ;;  %5051 = vmatmul.mubr.bf16.gmra.mxu1 %v9489_v8  ;;  %v7178_v48 = vld [vmem:[%s7329_s28 + $0x7c] sm:$0xf] }
 0x1d7   : > { %v6334_v62 = vpop.f32.mrf.mxu0  ;;  %5702 = vst [vmem:[%s8305_s26 + $0x1b0] sm:$0xff] %v3673_v11  ;;  %v3616_v27 = vadd.f32 %v6442_v40, %v3455_v12  ;;  %5058 = vmatprep.mubr.bf16.mxu1 %v5877_v47  ;;  %v1948_v47 = vsel %vm7978_vm5, %v5446_v56, %v1947_v53  ;;  %v1954_v59 = vrot.slane %v7178_v48, 5  ;;  %v5431_v11 = vld [vmem:[%s7329_s28 + $0x78] sm:$0xe]  ;;  %v1957_v53 = vrot.slane %v7179_v1, 5  ;;  %v9495_v1 = vld [vmem:[#allocation12_spill] sm:$0xff] }
 0x1d8   : > { %v3460_v20 = vadd.f32 %v9029_v23, %v6333_v42  ;;  %v6444_v6 = vpop.f32.mrf.mxu1  ;;  %v5447_v45 = vrot.slane %v5431_v11, 9 }
 0x1d9   : > { %v6335_v35 = vpop.f32.mrf.mxu0  ;;  %v3674_v44 = vmax.f32 %v3616_v27, 0.0  ;;  %v6445_v16 = vadd.f32 %v6444_v6, %v6443_v17  ;;  %v9492_v17 = vld [vmem:[#allocation9_spill] sm:$0xff]  ;;  %v1956_v38 = vrot.slane %v1954_v59, 4 }
 0x1da   : > { %v6336_v37 = vadd.f32 %v6335_v35, %v6334_v62  ;;  %v6446_v54 = vpop.f32.mrf.mxu1  ;;  %v9493_v27 = vld [vmem:[#allocation25_spill] sm:$0xff] }
 0x1db   : > { %v6337_v60 = vpop.f32.mrf.mxu0  ;;  %4898 = vmatmul.mubr.bf16.gmra.mxu0 %v7635_v52  ;;  %5703 = vst [vmem:[%s8305_s26 + $0x1b8] sm:$0xff] %v3674_v44  ;;  %v3621_v31 = vadd.f32 %v6445_v16, %v3460_v20  ;;  %v9491_v52 = vld [vmem:[#allocation4_spill] sm:$0xff]  ;;  %v5879_v20 = vcombine.low %v1948_v47, %v1951_v58  ;;  %v7181_v47 = vld [vmem:[%s7329_s28 + $0x8c] sm:$0x1] }
 0x1dc   : > { %v3463_v29 = vadd.f32 %v9029_v23, %v6336_v37  ;;  %4905 = vmatprep.mubr.bf16.mxu0 %v9490_v0  ;;  %v6447_v30 = vpop.f32.mrf.mxu1  ;;  %v1964_v58 = vrot.slane %v7181_v47, 5 }
 0x1dd   : > { %v6338_v2 = vpop.f32.mrf.mxu0  ;;  %v3675_v4 = vmax.f32 %v3621_v31, 0.0  ;;  %v6448_v14 = vadd.f32 %v6447_v30, %v6446_v54  ;;  %v1958_v30 = vsel %vm7978_vm5, %v1956_v38, %v1957_v53 }
 0x1de   : > { %v6339_v22 = vadd.f32 %v6338_v2, %v6337_v60  ;;  %v6449_v19 = vpop.f32.mrf.mxu1  ;;  %5059 = vmatmul.mubr.bf16.gmra.mxu1 %v9491_v52  ;;  %v7180_v2 = vld [vmem:[%s7329_s28 + $0x88] sm:$0xf]  ;;  %v9494_v52 = vld [vmem:[#allocation26_spill] sm:$0xff] }
 0x1df   : > { %v6340_v25 = vpop.f32.mrf.mxu0  ;;  %5704 = vst [vmem:[%s8305_s26 + $0x1c0] sm:$0xff] %v3675_v4  ;;  %v3624_v28 = vadd.f32 %v6448_v14, %v3463_v29  ;;  %5066 = vmatprep.mubr.bf16.mxu1 %v5878_v7  ;;  %v1955_v7 = vsel %vm7978_vm5, %v5447_v45, %v1954_v59  ;;  %v1961_v56 = vrot.slane %v7180_v2, 5 }
 0x1e0   : > { %v3468_v41 = vadd.f32 %v9029_v23, %v6339_v22  ;;  %v6450_v12 = vpop.f32.mrf.mxu1 }
 0x1e1   : > { %v6341_v18 = vpop.f32.mrf.mxu0  ;;  %v3676_v39 = vmax.f32 %v3624_v28, 0.0  ;;  %v6451_v10 = vadd.f32 %v6450_v12, %v6449_v19  ;;  %v5448_v12 = vrot.slane %v5432_v63, 9 }
 0x1e2   : > { %v6342_v43 = vadd.f32 %v6341_v18, %v6340_v25  ;;  %v6452_v40 = vpop.f32.mrf.mxu1  ;;  %v5880_v25 = vcombine.low %v1955_v7, %v1958_v30  ;;  %v1963_v18 = vrot.slane %v1961_v56, 4 }
 0x1e3   : > { %v6343_v42 = vpop.f32.mrf.mxu0  ;;  %4906 = vmatmul.mubr.bf16.gmra.mxu0 %v9492_v17  ;;  %5705 = vst [vmem:[%s8305_s26 + $0x1c8] sm:$0xff] %v3676_v39  ;;  %v3629_v8 = vadd.f32 %v6451_v10, %v3468_v41  ;;  %v1962_v17 = vsel %vm7978_vm5, %v5448_v12, %v1961_v56 }
 0x1e4   : > { %v3471_v62 = vadd.f32 %v9029_v23, %v6342_v43  ;;  %4913 = vmatprep.mubr.bf16.mxu0 %v9493_v27  ;;  %v6453_v6 = vpop.f32.mrf.mxu1 }
 0x1e5   : > { %v6344_v35 = vpop.f32.mrf.mxu0  ;;  %v3677_v44 = vmax.f32 %v3629_v8, 0.0  ;;  %v6454_v16 = vadd.f32 %v6453_v6, %v6452_v40  ;;  %v1965_v8 = vsel %vm7978_vm5, %v1963_v18, %v1964_v58  ;;  %v5434_v18 = vld [vmem:[%s7329_s28 + $0x9c] sm:$0xe] }
 0x1e6   : > { %v6345_v37 = vadd.f32 %v6344_v35, %v6343_v42  ;;  %v6455_v15 = vpop.f32.mrf.mxu1  ;;  %5067 = vmatmul.mubr.bf16.gmra.mxu1 %v8791_v33  ;;  %v5433_v35 = vld [vmem:[%s7329_s28 + $0x90] sm:$0xe] }
 0x1e7   : > { %v6346_v54 = vpop.f32.mrf.mxu0  ;;  %5706 = vst [vmem:[%s8305_s26 + $0x1d0] sm:$0xff] %v3677_v44  ;;  %v3632_v60 = vadd.f32 %v6454_v16, %v3471_v62  ;;  %5074 = vmatprep.mubr.bf16.mxu1 %v5879_v20  ;;  %v7182_v62 = vld [vmem:[%s7329_s28 + $0x94] sm:$0xf]  ;;  %v9496_v16 = vld [vmem:[#allocation27_spill] sm:$0xff] }
 0x1e8   : > { %v3476_v31 = vadd.f32 %v9029_v23, %v6345_v37  ;;  %v6456_v29 = vpop.f32.mrf.mxu1  ;;  %v1968_v27 = vrot.slane %v7182_v62, 5  ;;  %v5881_v37 = vcombine.low %v1962_v17, %v1965_v8 }
 0x1e9   : > { %v6347_v0 = vpop.f32.mrf.mxu0  ;;  %v3678_v34 = vmax.f32 %v3632_v60, 0.0  ;;  %v6457_v33 = vadd.f32 %v6456_v29, %v6455_v15  ;;  %v5449_v60 = vrot.slane %v5433_v35, 9  ;;  %v7183_v29 = vld [vmem:[%s7329_s28 + $0x98] sm:$0x1] }
 0x1ea   : > { %v6348_v3 = vadd.f32 %v6347_v0, %v6346_v54  ;;  %v6458_v4 = vpop.f32.mrf.mxu1  ;;  %v1971_v0 = vrot.slane %v7183_v29, 5 }
 0x1eb   : > { %v6349_v14 = vpop.f32.mrf.mxu0  ;;  %4914 = vmatmul.mubr.bf16.gmra.mxu0 %v7719_v61  ;;  %5707 = vst [vmem:[%s8305_s26 + $0x1d8] sm:$0xff] %v3678_v34  ;;  %v3637_v22 = vadd.f32 %v6457_v33, %v3476_v31  ;;  %v1970_v31 = vrot.slane %v1968_v27, 4  ;;  %v9497_v34 = vld [vmem:[#allocation5_spill] sm:$0xff] }
 0x1ec   : > { %v3479_v19 = vadd.f32 %v9029_v23, %v6348_v3  ;;  %4921 = vmatprep.mubr.bf16.mxu0 %v9494_v52  ;;  %v6459_v28 = vpop.f32.mrf.mxu1  ;;  %v7184_v52 = vld [vmem:[%s7329_s28 + $0xa0] sm:$0xf] }
 0x1ed   : > { %v6350_v41 = vpop.f32.mrf.mxu0  ;;  %v3679_v48 = vmax.f32 %v3637_v22, 0.0  ;;  %v6460_v59 = vadd.f32 %v6459_v28, %v6458_v4  ;;  %v1969_v22 = vsel %vm7978_vm5, %v5449_v60, %v1968_v27 }
 0x1ee   : > { %v6351_v39 = vadd.f32 %v6350_v41, %v6349_v14  ;;  %v6461_v10 = vpop.f32.mrf.mxu1  ;;  %5075 = vmatmul.mubr.bf16.gmra.mxu1 %v8826_v21 }
 0x1ef   : > { %v6352_v61 = vpop.f32.mrf.mxu0  ;;  %5708 = vst [vmem:[%s8305_s26 + $0x1e0] sm:$0xff] %v3679_v48  ;;  %v3640_v43 = vadd.f32 %v6460_v59, %v3479_v19  ;;  %5082 = vmatprep.mubr.bf16.mxu1 %v5880_v25  ;;  %v1972_v19 = vsel %vm7978_vm5, %v1970_v31, %v1971_v0  ;;  %v1975_v25 = vrot.slane %v7184_v52, 5  ;;  %v9499_v31 = vld [vmem:[#allocation15_spill] sm:$0xff] }
 0x1f0   : > { %v3484_v11 = vadd.f32 %v9029_v23, %v6351_v39  ;;  %v6462_v40 = vpop.f32.mrf.mxu1  ;;  %v9498_v39 = vld [vmem:[#allocation28_spill] sm:$0xff]  ;;  %v9501_v52 = vld [vmem:[#allocation7_spill] sm:$0xff] }
 0x1f1   : > { %v6353_v42 = vpop.f32.mrf.mxu0  ;;  %v3680_v20 = vmax.f32 %v3640_v43, 0.0  ;;  %v6463_v21 = vadd.f32 %v6462_v40, %v6461_v10  ;;  %v5882_v10 = vcombine.low %v1969_v22, %v1972_v19  ;;  %v1977_v40 = vrot.slane %v1975_v25, 4 }
 0x1f2   : > { %v6354_v6 = vadd.f32 %v6353_v42, %v6352_v61  ;;  %v6464_v45 = vpop.f32.mrf.mxu1  ;;  %v7185_v42 = vld [vmem:[%s7329_s28 + $0xa4] sm:$0x1] }
 0x1f3   : > { %v6483_v38 = vpop.f32.mrf.mxu0  ;;  %4922 = vmatmul.mubr.bf16.gmra.mxu0 %v9495_v1  ;;  %5709 = vst [vmem:[%s8305_s26 + $0x1e8] sm:$0xff] %v3680_v20  ;;  %v3645_v53 = vadd.f32 %v6463_v21, %v3484_v11  ;;  %v5450_v11 = vrot.slane %v5434_v18, 9  ;;  %v1978_v17 = vrot.slane %v7185_v42, 5 }
 0x1f4   : > { %v3487_v44 = vadd.f32 %v9029_v23, %v6354_v6  ;;  %4929 = vmatprep.mubr.bf16.mxu0 %v9496_v16  ;;  %v6465_v15 = vpop.f32.mrf.mxu1 }
 0x1f5   : > { %v6484_v54 = vpop.f32.mrf.mxu0  ;;  %v3681_v7 = vmax.f32 %v3645_v53, 0.0  ;;  %v6466_v30 = vadd.f32 %v6465_v15, %v6464_v45  ;;  %v1979_v1 = vsel %vm7978_vm5, %v1977_v40, %v1978_v17  ;;  %v7186_v53 = vld [vmem:[%s7329_s28 + $0xac] sm:$0xf]  ;;  %v5435_v15 = vld [vmem:[%s7329_s28 + $0xa8] sm:$0xe] }
 0x1f6   : > { %v6485_v2 = vadd.f32 %v6484_v54, %v6483_v38  ;;  %v6595_v56 = vpop.f32.mrf.mxu1  ;;  %5083 = vmatmul.mubr.bf16.gmra.mxu1 %v9497_v34  ;;  %v1976_v38 = vsel %vm7978_vm5, %v5450_v11, %v1975_v25  ;;  %v5451_v34 = vrot.slane %v5435_v15, 9 }
 0x1f7   : > { %v6486_v33 = vpop.f32.mrf.mxu0  ;;  %5710 = vst [vmem:[%s8305_s26 + $0x1f0] sm:$0xff] %v3681_v7  ;;  %v3648_v3 = vadd.f32 %v6466_v30, %v3487_v44  ;;  %5090 = vmatprep.mubr.bf16.mxu1 %v5881_v37  ;;  %v1982_v44 = vrot.slane %v7186_v53, 5  ;;  %v9500_v7 = vld [vmem:[#allocation29_spill] sm:$0xff]  ;;  %v5883_v30 = vcombine.low %v1976_v38, %v1979_v1 }
 0x1f8   : > { %v4152_v63 = vadd.f32 %v9029_v23, %v6485_v2  ;;  %v6596_v4 = vpop.f32.mrf.mxu1 }
 0x1f9   : > { %v6487_v14 = vpop.f32.mrf.mxu0  ;;  %v3682_v28 = vmax.f32 %v3648_v3, 0.0  ;;  %v6597_v41 = vadd.f32 %v6596_v4, %v6595_v56  ;;  %v7187_v3 = vld [vmem:[%s7329_s28 + $0xb0] sm:$0x1] }
 0x1fa   : > { %v6488_v12 = vadd.f32 %v6487_v14, %v6486_v33  ;;  %v6598_v47 = vpop.f32.mrf.mxu1  ;;  %v1984_v33 = vrot.slane %v1982_v44, 4 }
 0x1fb   : > { %v6489_v58 = vpop.f32.mrf.mxu0  ;;  %4930 = vmatmul.mubr.bf16.gmra.mxu0 %v7785_v32  ;;  %5711 = vst [vmem:[%s8305_s26 + $0x1f8] sm:$0xff] %v3682_v28  ;;  %v4313_v48 = vadd.f32 %v6597_v41, %v4152_v63  ;;  %v1985_v63 = vrot.slane %v7187_v3, 5 }
 0x1fc   : > { %v4155_v59 = vadd.f32 %v9029_v23, %v6488_v12  ;;  %4937 = vmatprep.mubr.bf16.mxu0 %v9498_v39  ;;  %v6599_v61 = vpop.f32.mrf.mxu1 }
 0x1fd   : > { %v6490_v43 = vpop.f32.mrf.mxu0  ;;  %v4439_v8 = vmax.f32 %v4313_v48, 0.0  ;;  %v6600_v62 = vadd.f32 %v6599_v61, %v6598_v47  ;;  %v1983_v47 = vsel %vm7978_vm5, %v5451_v34, %v1982_v44  ;;  %v7188_v48 = vld [vmem:[%s7329_s28 + $0xb8] sm:$0xf] }
 0x1fe   : > { %v6491_v27 = vadd.f32 %v6490_v43, %v6489_v58  ;;  %v6601_v20 = vpop.f32.mrf.mxu1  ;;  %5091 = vmatmul.mubr.bf16.gmra.mxu1 %v8879_v46  ;;  %v1986_v58 = vsel %vm7978_vm5, %v1984_v33, %v1985_v63  ;;  %v5436_v43 = vld [vmem:[%s7329_s28 + $0xb4] sm:$0xe]  ;;  %v9503_v33 = vld [vmem:[#allocation31_spill] sm:$0xff] }
 0x1ff   : > { %v6492_v32 = vpop.f32.mrf.mxu0  ;;  %5840 = vst [vmem:[%s8305_s26 + $0x200] sm:$0xff] %v4439_v8  ;;  %v4316_v21 = vadd.f32 %v6600_v62, %v4155_v59  ;;  %5098 = vmatprep.mubr.bf16.mxu1 %v5882_v10  ;;  %v1989_v59 = vrot.slane %v7188_v48, 5  ;;  %v9502_v8 = vld [vmem:[#allocation30_spill] sm:$0xff]  ;;  %v5884_v62 = vcombine.low %v1983_v47, %v1986_v58 }
 0x200   : > { %v4160_v6 = vadd.f32 %v9029_v23, %v6491_v27  ;;  %v6602_v35 = vpop.f32.mrf.mxu1 }
 0x201   : > { %v6493_v45 = vpop.f32.mrf.mxu0  ;;  %v4440_v16 = vmax.f32 %v4316_v21, 0.0  ;;  %v6603_v46 = vadd.f32 %v6602_v35, %v6601_v20  ;;  %v1991_v21 = vrot.slane %v1989_v59, 4 }
 0x202   : > { %v6494_v37 = vadd.f32 %v6493_v45, %v6492_v32  ;;  %v6604_v54 = vpop.f32.mrf.mxu1  ;;  %v5452_v32 = vrot.slane %v5436_v43, 9 }
 0x203   : > { %v6495_v60 = vpop.f32.mrf.mxu0  ;;  %4938 = vmatmul.mubr.bf16.gmra.mxu0 %v9499_v31  ;;  %5841 = vst [vmem:[%s8305_s26 + $0x208] sm:$0xff] %v4440_v16  ;;  %v4321_v29 = vadd.f32 %v6603_v46, %v4160_v6  ;;  %v7189_v6 = vld [vmem:[%s7329_s28 + $0xbc] sm:$0x1] }
 0x204   : > { %v4163_v0 = vadd.f32 %v9029_v23, %v6494_v37  ;;  %4945 = vmatprep.mubr.bf16.mxu0 %v9500_v7  ;;  %v6605_v2 = vpop.f32.mrf.mxu1  ;;  %v1992_v35 = vrot.slane %v7189_v6, 5  ;;  %v1990_v15 = vsel %vm7978_vm5, %v5452_v32, %v1989_v59  ;;  %v5437_v7 = vld [vmem:[%s7329_s28 + $0xc0] sm:$0xe] }
 0x205   : > { %v6496_v56 = vpop.f32.mrf.mxu0  ;;  %v4441_v4 = vmax.f32 %v4321_v29, 0.0  ;;  %v6606_v14 = vadd.f32 %v6605_v2, %v6604_v54 }
 0x206   : > { %v6497_v22 = vadd.f32 %v6496_v56, %v6495_v60  ;;  %v6607_v19 = vpop.f32.mrf.mxu1  ;;  %5099 = vmatmul.mubr.bf16.gmra.mxu1 %v9501_v52  ;;  %v1993_v54 = vsel %vm7978_vm5, %v1991_v21, %v1992_v35  ;;  %v7190_v60 = vld [vmem:[%s7329_s28 + $0xc4] sm:$0xf] }
 0x207   : > { %v6498_v25 = vpop.f32.mrf.mxu0  ;;  %5842 = vst [vmem:[%s8305_s26 + $0x210] sm:$0xff] %v4441_v4  ;;  %v4324_v28 = vadd.f32 %v6606_v14, %v4163_v0  ;;  %5106 = vmatprep.mubr.bf16.mxu1 %v5883_v30  ;;  %v1996_v31 = vrot.slane %v7190_v60, 5  ;;  %v5885_v3 = vcombine.low %v1990_v15, %v1993_v54  ;;  %v5453_v14 = vrot.slane %v5437_v7, 9 }
 0x208   : > { %v4168_v41 = vadd.f32 %v9029_v23, %v6497_v22  ;;  %v6608_v12 = vpop.f32.mrf.mxu1 }
 0x209   : > { %v6499_v18 = vpop.f32.mrf.mxu0  ;;  %v4442_v39 = vmax.f32 %v4324_v28, 0.0  ;;  %v6609_v10 = vadd.f32 %v6608_v12, %v6607_v19  ;;  %v1998_v22 = vrot.slane %v1996_v31, 4  ;;  %v7191_v19 = vld [vmem:[%s7329_s28 + $0xc8] sm:$0x1]  ;;  %v1997_v59 = vsel %vm7978_vm5, %v5453_v14, %v1996_v31 }
 0x20a   : > { %v6500_v61 = vadd.f32 %v6499_v18, %v6498_v25  ;;  %v6610_v11 = vpop.f32.mrf.mxu1  ;;  %v1999_v52 = vrot.slane %v7191_v19, 5 }
 0x20b   : > { %v6501_v40 = vpop.f32.mrf.mxu0  ;;  %4946 = vmatmul.mubr.bf16.gmra.mxu0 %v7857_v57  ;;  %5843 = vst [vmem:[%s8305_s26 + $0x218] sm:$0xff] %v4442_v39  ;;  %v4329_v42 = vadd.f32 %v6609_v10, %v4168_v41  ;;  %v7192_v10 = vld [vmem:[%s7329_s28 + $0xd0] sm:$0xf] }
 0x20c   : > { %v4171_v17 = vadd.f32 %v9029_v23, %v6500_v61  ;;  %4953 = vmatprep.mubr.bf16.mxu0 %v9502_v8  ;;  %v6611_v27 = vpop.f32.mrf.mxu1  ;;  %v2000_v39 = vsel %vm7978_vm5, %v1998_v22, %v1999_v52  ;;  %v2003_v61 = vrot.slane %v7192_v10, 5 }
 0x20d   : > { %v6502_v20 = vpop.f32.mrf.mxu0  ;;  %v4443_v45 = vmax.f32 %v4329_v42, 0.0  ;;  %v6612_v38 = vadd.f32 %v6611_v27, %v6610_v11  ;;  %v9504_v27 = vld [vmem:[#allocation32_spill] sm:$0xff] }
 0x20e   : > { %v6503_v1 = vadd.f32 %v6502_v20, %v6501_v40  ;;  %v6613_v53 = vpop.f32.mrf.mxu1  ;;  %5107 = vmatmul.mubr.bf16.gmra.mxu1 %v8946_v50  ;;  %v5438_v40 = vld [vmem:[%s7329_s28 + $0xcc] sm:$0xe]  ;;  %v5886_v20 = vcombine.low %v1997_v59, %v2000_v39  ;;  %v2005_v35 = vrot.slane %v2003_v61, 4 }
 0x20f   : > { %v6504_v57 = vpop.f32.mrf.mxu0  ;;  %5844 = vst [vmem:[%s8305_s26 + $0x220] sm:$0xff] %v4443_v45  ;;  %v4332_v44 = vadd.f32 %v6612_v38, %v4171_v17  ;;  %5114 = vmatprep.mubr.bf16.mxu1 %v5884_v62  ;;  %v5454_v6 = vrot.slane %v5438_v40, 9  ;;  %v7193_v45 = vld [vmem:[%s7329_s28 + $0xd4] sm:$0x1] }
 0x210   : > { %v4176_v16 = vadd.f32 %v9029_v23, %v6503_v1  ;;  %v6614_v46 = vpop.f32.mrf.mxu1  ;;  %v2006_v38 = vrot.slane %v7193_v45, 5 }
 0x211   : > { %v6505_v37 = vpop.f32.mrf.mxu0  ;;  %v4444_v29 = vmax.f32 %v4332_v44, 0.0  ;;  %v6615_v50 = vadd.f32 %v6614_v46, %v6613_v53  ;;  %v2004_v54 = vsel %vm7978_vm5, %v5454_v6, %v2003_v61 }
 0x212   : > { %v6506_v0 = vadd.f32 %v6505_v37, %v6504_v57  ;;  %v6616_v30 = vpop.f32.mrf.mxu1 }
 0x213   : > { %v6507_v2 = vpop.f32.mrf.mxu0  ;;  %4954 = vmatmul.mubr.bf16.gmra.mxu0 %v7890_v55  ;;  %5845 = vst [vmem:[%s8305_s26 + $0x228] sm:$0xff] %v4444_v29  ;;  %v4337_v56 = vadd.f32 %v6615_v50, %v4176_v16 }
 0x214   : > { %v4179_v34 = vadd.f32 %v9029_v23, %v6506_v0  ;;  %4961 = vmatprep.mubr.bf16.mxu0 %v9503_v33  ;;  %v6617_v63 = vpop.f32.mrf.mxu1 }
 0x215   : > { %v6508_v4 = vpop.f32.mrf.mxu0  ;;  %v4445_v25 = vmax.f32 %v4337_v56, 0.0  ;;  %v6618_v28 = vadd.f32 %v6617_v63, %v6616_v30 }
 0x216   : > { %v6509_v41 = vadd.f32 %v6508_v4, %v6507_v2  ;;  %v6619_v12 = vpop.f32.mrf.mxu1  ;;  %5115 = vmatmul.mubr.bf16.gmra.mxu1 %v8969_v5  ;;  %v9505_v2 = vld [vmem:[#allocation24_spill] sm:$0xff] }
 0x217   : > { %v6510_v55 = vpop.f32.mrf.mxu0  ;;  %5846 = vst [vmem:[%s8305_s26 + $0x230] sm:$0xff] %v4445_v25  ;;  %v4340_v18 = vadd.f32 %v6618_v28, %v4179_v34  ;;  %5122 = vmatprep.mubr.bf16.mxu1 %v5885_v3 }
 0x218   : > { %v4184_v47 = vadd.f32 %v9029_v23, %v6509_v41  ;;  %v6620_v58 = vpop.f32.mrf.mxu1 }
 0x219   : > { %v6511_v48 = vpop.f32.mrf.mxu0  ;;  %v4446_v43 = vmax.f32 %v4340_v18, 0.0  ;;  %v6621_v5 = vadd.f32 %v6620_v58, %v6619_v12 }
 0x21a   : > { %v6512_v11 = vadd.f32 %v6511_v48, %v6510_v55  ;;  %v6622_v42 = vpop.f32.mrf.mxu1 }
 0x21b   : > { %v6513_v17 = vpop.f32.mrf.mxu0  ;;  %4962 = vmatmul.mubr.bf16.gmra.mxu0 %v7923_v24  ;;  %5847 = vst [vmem:[%s8305_s26 + $0x238] sm:$0xff] %v4446_v43  ;;  %v4345_v8 = vadd.f32 %v6621_v5, %v4184_v47 }
 0x21c   : > { %v4187_v62 = vadd.f32 %v9029_v23, %v6512_v11  ;;  %4969 = vmatprep.mubr.bf16.mxu0 %v9504_v27  ;;  %v6623_v32 = vpop.f32.mrf.mxu1  ;;  %v9265_v23 = vld [vmem:[%s9390_s2] ss:$0 sm:$0xff] }
 0x21d   : > { %v6514_v21 = vpop.f32.mrf.mxu0  ;;  %v4447_v1 = vmax.f32 %v4345_v8, 0.0  ;;  %v6624_v53 = vadd.f32 %v6623_v32, %v6622_v42 }
 0x21e   : > { %v6515_v57 = vadd.f32 %v6514_v21, %v6513_v17  ;;  %v6625_v44 = vpop.f32.mrf.mxu1  ;;  %5123 = vmatmul.mubr.bf16.gmra.mxu1 %v9000_v26  ;;  %v2007_v26 = vsel %vm7978_vm5, %v2005_v35, %v2006_v38 }
 0x21f   : > { %v6516_v24 = vpop.f32.mrf.mxu0  ;;  %5848 = vst [vmem:[%s8305_s26 + $0x240] sm:$0xff] %v4447_v1  ;;  %v4348_v16 = vadd.f32 %v6624_v53, %v4187_v62  ;;  %5130 = vmatprep.mubr.bf16.mxu1 %v5886_v20  ;;  %v5887_v56 = vcombine.low %v2004_v54, %v2007_v26 }
 0x220   : > { %v4192_v46 = vadd.f32 %v9265_v23, %v6515_v57  ;;  %v6626_v37 = vpop.f32.mrf.mxu1 }
 0x221   : > { %v6517_v15 = vpop.f32.mrf.mxu0  ;;  %v4448_v60 = vmax.f32 %v4348_v16, 0.0  ;;  %v6627_v31 = vadd.f32 %v6626_v37, %v6625_v44 }
 0x222   : > { %v6518_v29 = vadd.f32 %v6517_v15, %v6516_v24  ;;  %v6628_v50 = vpop.f32.mrf.mxu1 }
 0x223   : > { %v6519_v0 = vpop.f32.mrf.mxu0  ;;  %4970 = vmatmul.mubr.bf16.gmra.mxu0 %v7959_v9  ;;  %5849 = vst [vmem:[%s8305_s26 + $0x248] sm:$0xff] %v4448_v60  ;;  %v4353_v7 = vadd.f32 %v6627_v31, %v4192_v46 }
 0x224   : > { %v4195_v30 = vadd.f32 %v9265_v23, %v6518_v29  ;;  %4977 = vmatprep.mubr.bf16.mxu0 %v9505_v2  ;;  %v6629_v34 = vpop.f32.mrf.mxu1 }
 0x225   : > { %v6520_v33 = vpop.f32.mrf.mxu0  ;;  %v4449_v3 = vmax.f32 %v4353_v7, 0.0  ;;  %v6630_v36 = vadd.f32 %v6629_v34, %v6628_v50 }
 0x226   : > { %v6521_v63 = vadd.f32 %v6520_v33, %v6519_v0  ;;  %v6631_v4 = vpop.f32.mrf.mxu1  ;;  %5131 = vmatmul.mubr.bf16.gmra.mxu1 %v9023_v51 }
 0x227   : > { %v6522_v14 = vpop.f32.mrf.mxu0  ;;  %5850 = vst [vmem:[%s8305_s26 + $0x250] sm:$0xff] %v4449_v3  ;;  %v4356_v22 = vadd.f32 %v6630_v36, %v4195_v30  ;;  %5138 = vmatprep.mubr.bf16.mxu1 %v5887_v56 }
 0x228   : > { %v4200_v9 = vadd.f32 %v9265_v23, %v6521_v63  ;;  %v6632_v19 = vpop.f32.mrf.mxu1 }
 0x229   : > { %v6523_v52 = vpop.f32.mrf.mxu0  ;;  %v4450_v25 = vmax.f32 %v4356_v22, 0.0  ;;  %v6633_v28 = vadd.f32 %v6632_v19, %v6631_v4 }
 0x22a   : > { %v6524_v41 = vadd.f32 %v6523_v52, %v6522_v14  ;;  %v6634_v12 = vpop.f32.mrf.mxu1 }
 0x22b   : > { %v6525_v55 = vpop.f32.mrf.mxu0  ;;  %4978 = vmatmul.mubr.bf16.gmra.mxu0 %v7996_v49  ;;  %5851 = vst [vmem:[%s8305_s26 + $0x258] sm:$0xff] %v4450_v25  ;;  %v4361_v18 = vadd.f32 %v6633_v28, %v4200_v9 }
 0x22c   : > { %v4203_v51 = vadd.f32 %v9265_v23, %v6524_v41  ;;  %v6635_v47 = vpop.f32.mrf.mxu1 }
 0x22d   : > { %v6526_v58 = vpop.f32.mrf.mxu0  ;;  %v4451_v48 = vmax.f32 %v4361_v18, 0.0  ;;  %v6636_v59 = vadd.f32 %v6635_v47, %v6634_v12 }
 0x22e   : > { %v6527_v39 = vadd.f32 %v6526_v58, %v6525_v55  ;;  %v6637_v10 = vpop.f32.mrf.mxu1  ;;  %5139 = vmatmul.mubr.bf16.gmra.mxu1 %v9046_v13 }
 0x22f   : > { %v6528_v61 = vpop.f32.mrf.mxu0  ;;  %5852 = vst [vmem:[%s8305_s26 + $0x260] sm:$0xff] %v4451_v48  ;;  %v4364_v43 = vadd.f32 %v6636_v59, %v4203_v51 }
 0x230   : > { %v4208_v5 = vadd.f32 %v9265_v23, %v6527_v39  ;;  %v6638_v11 = vpop.f32.mrf.mxu1 }
 0x231   : > { %v6529_v49 = vpop.f32.mrf.mxu0  ;;  %v4452_v40 = vmax.f32 %v4364_v43, 0.0  ;;  %v6639_v42 = vadd.f32 %v6638_v11, %v6637_v10 }
 0x232   : > { %v6530_v17 = vadd.f32 %v6529_v49, %v6528_v61  ;;  %v6640_v8 = vpop.f32.mrf.mxu1 }
 0x233   : > { %v6531_v62 = vpop.f32.mrf.mxu0  ;;  %5853 = vst [vmem:[%s8305_s26 + $0x268] sm:$0xff] %v4452_v40  ;;  %v4369_v27 = vadd.f32 %v6639_v42, %v4208_v5 }
 0x234   : > { %v4211_v20 = vadd.f32 %v9265_v23, %v6530_v17  ;;  %v6641_v32 = vpop.f32.mrf.mxu1 }
 0x235   : > { %v6532_v21 = vpop.f32.mrf.mxu0  ;;  %v4453_v13 = vmax.f32 %v4369_v27, 0.0  ;;  %v6642_v6 = vadd.f32 %v6641_v32, %v6640_v8 }
 0x236   : > { %v6533_v35 = vadd.f32 %v6532_v21, %v6531_v62  ;;  %v6643_v45 = vpop.f32.mrf.mxu1 }
 0x237   : > { %v6534_v38 = vpop.f32.mrf.mxu0  ;;  %5854 = vst [vmem:[%s8305_s26 + $0x270] sm:$0xff] %v4453_v13  ;;  %v4372_v1 = vadd.f32 %v6642_v6, %v4211_v20 }
 0x238   : > { %v4216_v53 = vadd.f32 %v9265_v23, %v6533_v35  ;;  %v6644_v57 = vpop.f32.mrf.mxu1 }
 0x239   : > { %v6535_v44 = vpop.f32.mrf.mxu0  ;;  %v4454_v24 = vmax.f32 %v4372_v1, 0.0  ;;  %v6645_v16 = vadd.f32 %v6644_v57, %v6643_v45 }
 0x23a   : > { %v6536_v46 = vadd.f32 %v6535_v44, %v6534_v38  ;;  %v6646_v37 = vpop.f32.mrf.mxu1 }
 0x23b   : > { %v6537_v15 = vpop.f32.mrf.mxu0  ;;  %5855 = vst [vmem:[%s8305_s26 + $0x278] sm:$0xff] %v4454_v24  ;;  %v4377_v54 = vadd.f32 %v6645_v16, %v4216_v53 }
 0x23c   : > { %v4219_v26 = vadd.f32 %v9265_v23, %v6536_v46  ;;  %v6647_v60 = vpop.f32.mrf.mxu1 }
 0x23d   : > { %v6538_v31 = vpop.f32.mrf.mxu0  ;;  %v4455_v29 = vmax.f32 %v4377_v54, 0.0  ;;  %v6648_v50 = vadd.f32 %v6647_v60, %v6646_v37 }
 0x23e   : > { %v6539_v0 = vadd.f32 %v6538_v31, %v6537_v15  ;;  %v6649_v7 = vpop.f32.mrf.mxu1 }
 0x23f   : > { %v6540_v30 = vpop.f32.mrf.mxu0  ;;  %5856 = vst [vmem:[%s8305_s26 + $0x280] sm:$0xff] %v4455_v29  ;;  %v4380_v2 = vadd.f32 %v6648_v50, %v4219_v26 }
 0x240   : > { %v4224_v56 = vadd.f32 %v9265_v23, %v6539_v0  ;;  %v6650_v34 = vpop.f32.mrf.mxu1 }
 0x241   : > { %v6541_v33 = vpop.f32.mrf.mxu0  ;;  %v4456_v3 = vmax.f32 %v4380_v2, 0.0  ;;  %v6651_v36 = vadd.f32 %v6650_v34, %v6649_v7 }
 0x242   : > { %v6542_v63 = vadd.f32 %v6541_v33, %v6540_v30  ;;  %v6652_v4 = vpop.f32.mrf.mxu1 }
 0x243   : > { %v6543_v14 = vpop.f32.mrf.mxu0  ;;  %5857 = vst [vmem:[%s8305_s26 + $0x288] sm:$0xff] %v4456_v3  ;;  %v4385_v22 = vadd.f32 %v6651_v36, %v4224_v56 }
 0x244   : > { %v4227_v9 = vadd.f32 %v9265_v23, %v6542_v63  ;;  %v6653_v19 = vpop.f32.mrf.mxu1 }
 0x245   : > { %v6544_v52 = vpop.f32.mrf.mxu0  ;;  %v4457_v25 = vmax.f32 %v4385_v22, 0.0  ;;  %v6654_v28 = vadd.f32 %v6653_v19, %v6652_v4 }
 0x246   : > { %v6545_v41 = vadd.f32 %v6544_v52, %v6543_v14  ;;  %v6655_v12 = vpop.f32.mrf.mxu1 }
 0x247   : > { %v6546_v55 = vpop.f32.mrf.mxu0  ;;  %5858 = vst [vmem:[%s8305_s26 + $0x290] sm:$0xff] %v4457_v25  ;;  %v4388_v18 = vadd.f32 %v6654_v28, %v4227_v9 }
 0x248   : > { %v4232_v51 = vadd.f32 %v9265_v23, %v6545_v41  ;;  %v6656_v47 = vpop.f32.mrf.mxu1 }
 0x249   : > { %v6547_v58 = vpop.f32.mrf.mxu0  ;;  %v4458_v48 = vmax.f32 %v4388_v18, 0.0  ;;  %v6657_v59 = vadd.f32 %v6656_v47, %v6655_v12 }
 0x24a   : > { %v6548_v39 = vadd.f32 %v6547_v58, %v6546_v55  ;;  %v6658_v10 = vpop.f32.mrf.mxu1 }
 0x24b   : > { %v6549_v61 = vpop.f32.mrf.mxu0  ;;  %5859 = vst [vmem:[%s8305_s26 + $0x298] sm:$0xff] %v4458_v48  ;;  %v4393_v43 = vadd.f32 %v6657_v59, %v4232_v51 }
 0x24c   : > { %v4235_v5 = vadd.f32 %v9265_v23, %v6548_v39  ;;  %v6659_v11 = vpop.f32.mrf.mxu1 }
 0x24d   : > { %v6550_v49 = vpop.f32.mrf.mxu0  ;;  %v4459_v40 = vmax.f32 %v4393_v43, 0.0  ;;  %v6660_v42 = vadd.f32 %v6659_v11, %v6658_v10 }
 0x24e   : > { %v6551_v17 = vadd.f32 %v6550_v49, %v6549_v61  ;;  %v6661_v8 = vpop.f32.mrf.mxu1 }
 0x24f   : > { %v6552_v62 = vpop.f32.mrf.mxu0  ;;  %5860 = vst [vmem:[%s8305_s26 + $0x2a0] sm:$0xff] %v4459_v40  ;;  %v4396_v27 = vadd.f32 %v6660_v42, %v4235_v5 }
 0x250   : > { %v4240_v20 = vadd.f32 %v9265_v23, %v6551_v17  ;;  %v6662_v32 = vpop.f32.mrf.mxu1 }
 0x251   : > { %v6553_v21 = vpop.f32.mrf.mxu0  ;;  %v4460_v13 = vmax.f32 %v4396_v27, 0.0  ;;  %v6663_v6 = vadd.f32 %v6662_v32, %v6661_v8 }
 0x252   : > { %v6554_v35 = vadd.f32 %v6553_v21, %v6552_v62  ;;  %v6664_v45 = vpop.f32.mrf.mxu1 }
 0x253   : > { %v6555_v38 = vpop.f32.mrf.mxu0  ;;  %5861 = vst [vmem:[%s8305_s26 + $0x2a8] sm:$0xff] %v4460_v13  ;;  %v4401_v1 = vadd.f32 %v6663_v6, %v4240_v20 }
 0x254   : > { %v4243_v53 = vadd.f32 %v9265_v23, %v6554_v35  ;;  %v6665_v57 = vpop.f32.mrf.mxu1 }
 0x255   : > { %v6556_v44 = vpop.f32.mrf.mxu0  ;;  %v4461_v24 = vmax.f32 %v4401_v1, 0.0  ;;  %v6666_v16 = vadd.f32 %v6665_v57, %v6664_v45 }
 0x256   : > { %v6557_v46 = vadd.f32 %v6556_v44, %v6555_v38  ;;  %v6667_v37 = vpop.f32.mrf.mxu1 }
 0x257   : > { %v6558_v15 = vpop.f32.mrf.mxu0  ;;  %5862 = vst [vmem:[%s8305_s26 + $0x2b0] sm:$0xff] %v4461_v24  ;;  %v4404_v54 = vadd.f32 %v6666_v16, %v4243_v53 }
 0x258   : > { %v4248_v26 = vadd.f32 %v9265_v23, %v6557_v46  ;;  %v6668_v60 = vpop.f32.mrf.mxu1 }
 0x259   : > { %v6559_v31 = vpop.f32.mrf.mxu0  ;;  %v4462_v29 = vmax.f32 %v4404_v54, 0.0  ;;  %v6669_v50 = vadd.f32 %v6668_v60, %v6667_v37 }
 0x25a   : > { %v6560_v0 = vadd.f32 %v6559_v31, %v6558_v15  ;;  %v6670_v7 = vpop.f32.mrf.mxu1 }
 0x25b   : > { %v6561_v30 = vpop.f32.mrf.mxu0  ;;  %5863 = vst [vmem:[%s8305_s26 + $0x2b8] sm:$0xff] %v4462_v29  ;;  %v4409_v2 = vadd.f32 %v6669_v50, %v4248_v26 }
 0x25c   : > { %v4251_v56 = vadd.f32 %v9265_v23, %v6560_v0  ;;  %v6671_v34 = vpop.f32.mrf.mxu1 }
 0x25d   : > { %v6562_v33 = vpop.f32.mrf.mxu0  ;;  %v4463_v3 = vmax.f32 %v4409_v2, 0.0  ;;  %v6672_v36 = vadd.f32 %v6671_v34, %v6670_v7 }
 0x25e   : > { %v6563_v63 = vadd.f32 %v6562_v33, %v6561_v30  ;;  %v6673_v4 = vpop.f32.mrf.mxu1 }
 0x25f   : > { %v6564_v14 = vpop.f32.mrf.mxu0  ;;  %5864 = vst [vmem:[%s8305_s26 + $0x2c0] sm:$0xff] %v4463_v3  ;;  %v4412_v22 = vadd.f32 %v6672_v36, %v4251_v56 }
 0x260   : > { %v4256_v9 = vadd.f32 %v9265_v23, %v6563_v63  ;;  %v6674_v19 = vpop.f32.mrf.mxu1 }
 0x261   : > { %v6565_v52 = vpop.f32.mrf.mxu0  ;;  %v4464_v25 = vmax.f32 %v4412_v22, 0.0  ;;  %v6675_v28 = vadd.f32 %v6674_v19, %v6673_v4 }
 0x262   : > { %v6566_v41 = vadd.f32 %v6565_v52, %v6564_v14  ;;  %v6676_v12 = vpop.f32.mrf.mxu1 }
 0x263   : > { %v6567_v55 = vpop.f32.mrf.mxu0  ;;  %5865 = vst [vmem:[%s8305_s26 + $0x2c8] sm:$0xff] %v4464_v25  ;;  %v4417_v18 = vadd.f32 %v6675_v28, %v4256_v9 }
 0x264   : > { %v4259_v51 = vadd.f32 %v9265_v23, %v6566_v41  ;;  %v6677_v47 = vpop.f32.mrf.mxu1 }
 0x265   : > { %v6568_v58 = vpop.f32.mrf.mxu0  ;;  %v4465_v48 = vmax.f32 %v4417_v18, 0.0  ;;  %v6678_v59 = vadd.f32 %v6677_v47, %v6676_v12 }
 0x266   : > { %v6569_v39 = vadd.f32 %v6568_v58, %v6567_v55  ;;  %v6679_v10 = vpop.f32.mrf.mxu1 }
 0x267   : > { %v6570_v61 = vpop.f32.mrf.mxu0  ;;  %5866 = vst [vmem:[%s8305_s26 + $0x2d0] sm:$0xff] %v4465_v48  ;;  %v4420_v43 = vadd.f32 %v6678_v59, %v4259_v51 }
 0x268   : > { %v4264_v5 = vadd.f32 %v9265_v23, %v6569_v39  ;;  %v6680_v11 = vpop.f32.mrf.mxu1 }
 0x269   : > { %v6571_v49 = vpop.f32.mrf.mxu0  ;;  %v4466_v40 = vmax.f32 %v4420_v43, 0.0  ;;  %v6681_v42 = vadd.f32 %v6680_v11, %v6679_v10 }
 0x26a   : > { %v6572_v17 = vadd.f32 %v6571_v49, %v6570_v61  ;;  %v6682_v8 = vpop.f32.mrf.mxu1 }
 0x26b   : > { %v6573_v62 = vpop.f32.mrf.mxu0  ;;  %5867 = vst [vmem:[%s8305_s26 + $0x2d8] sm:$0xff] %v4466_v40  ;;  %v4425_v27 = vadd.f32 %v6681_v42, %v4264_v5 }
 0x26c   : > { %v4267_v20 = vadd.f32 %v9265_v23, %v6572_v17  ;;  %v6683_v32 = vpop.f32.mrf.mxu1 }
 0x26d   : > { %v6574_v21 = vpop.f32.mrf.mxu0  ;;  %v4467_v13 = vmax.f32 %v4425_v27, 0.0  ;;  %v6684_v6 = vadd.f32 %v6683_v32, %v6682_v8 }
 0x26e   : > { %v6575_v35 = vadd.f32 %v6574_v21, %v6573_v62  ;;  %v6685_v45 = vpop.f32.mrf.mxu1 }
 0x26f   : > { %v6576_v38 = vpop.f32.mrf.mxu0  ;;  %5868 = vst [vmem:[%s8305_s26 + $0x2e0] sm:$0xff] %v4467_v13  ;;  %v4428_v1 = vadd.f32 %v6684_v6, %v4267_v20 }
 0x270   : > { %v4272_v53 = vadd.f32 %v9265_v23, %v6575_v35  ;;  %v6686_v57 = vpop.f32.mrf.mxu1 }
 0x271   : > { %v6577_v44 = vpop.f32.mrf.mxu0  ;;  %v4468_v24 = vmax.f32 %v4428_v1, 0.0  ;;  %v6687_v16 = vadd.f32 %v6686_v57, %v6685_v45 }
 0x272   : > { %v6578_v46 = vadd.f32 %v6577_v44, %v6576_v38  ;;  %v6688_v37 = vpop.f32.mrf.mxu1 }
 0x273   : > { %v6707_v15 = vpop.f32.mrf.mxu0  ;;  %5869 = vst [vmem:[%s8305_s26 + $0x2e8] sm:$0xff] %v4468_v24  ;;  %v4433_v54 = vadd.f32 %v6687_v16, %v4272_v53 }
 0x274   : > { %v4275_v26 = vadd.f32 %v9265_v23, %v6578_v46  ;;  %v6689_v60 = vpop.f32.mrf.mxu1 }
 0x275   : > { %v6708_v31 = vpop.f32.mrf.mxu0  ;;  %v4469_v29 = vmax.f32 %v4433_v54, 0.0  ;;  %v6690_v50 = vadd.f32 %v6689_v60, %v6688_v37 }
 0x276   : > { %v6709_v0 = vadd.f32 %v6708_v31, %v6707_v15  ;;  %v6819_v7 = vpop.f32.mrf.mxu1 }
 0x277   : > { %v6710_v30 = vpop.f32.mrf.mxu0  ;;  %5870 = vst [vmem:[%s8305_s26 + $0x2f0] sm:$0xff] %v4469_v29  ;;  %v4436_v2 = vadd.f32 %v6690_v50, %v4275_v26 }
 0x278   : > { %v4860_v56 = vadd.f32 %v9265_v23, %v6709_v0  ;;  %v6820_v34 = vpop.f32.mrf.mxu1 }
 0x279   : > { %v6711_v33 = vpop.f32.mrf.mxu0  ;;  %v4470_v3 = vmax.f32 %v4436_v2, 0.0  ;;  %v6821_v36 = vadd.f32 %v6820_v34, %v6819_v7 }
 0x27a   : > { %v6712_v63 = vadd.f32 %v6711_v33, %v6710_v30  ;;  %v6822_v4 = vpop.f32.mrf.mxu1 }
 0x27b   : > { %v6713_v14 = vpop.f32.mrf.mxu0  ;;  %5871 = vst [vmem:[%s8305_s26 + $0x2f8] sm:$0xff] %v4470_v3  ;;  %v5021_v22 = vadd.f32 %v6821_v36, %v4860_v56 }
 0x27c   : > { %v4863_v9 = vadd.f32 %v9265_v23, %v6712_v63  ;;  %v6823_v19 = vpop.f32.mrf.mxu1 }
 0x27d   : > { %v6714_v52 = vpop.f32.mrf.mxu0  ;;  %v5147_v25 = vmax.f32 %v5021_v22, 0.0  ;;  %v6824_v28 = vadd.f32 %v6823_v19, %v6822_v4 }
 0x27e   : > { %v6715_v41 = vadd.f32 %v6714_v52, %v6713_v14  ;;  %v6825_v12 = vpop.f32.mrf.mxu1 }
 0x27f   : > { %v6716_v55 = vpop.f32.mrf.mxu0  ;;  %5984 = vst [vmem:[%s8305_s26 + $0x300] sm:$0xff] %v5147_v25  ;;  %v5024_v18 = vadd.f32 %v6824_v28, %v4863_v9 }
 0x280   : > { %v4868_v51 = vadd.f32 %v9265_v23, %v6715_v41  ;;  %v6826_v47 = vpop.f32.mrf.mxu1 }
 0x281   : > { %v6717_v58 = vpop.f32.mrf.mxu0  ;;  %v5148_v48 = vmax.f32 %v5024_v18, 0.0  ;;  %v6827_v59 = vadd.f32 %v6826_v47, %v6825_v12 }
 0x282   : > { %v6718_v39 = vadd.f32 %v6717_v58, %v6716_v55  ;;  %v6828_v10 = vpop.f32.mrf.mxu1 }
 0x283   : > { %v6719_v61 = vpop.f32.mrf.mxu0  ;;  %5985 = vst [vmem:[%s8305_s26 + $0x308] sm:$0xff] %v5148_v48  ;;  %v5029_v43 = vadd.f32 %v6827_v59, %v4868_v51 }
 0x284   : > { %v4871_v5 = vadd.f32 %v9265_v23, %v6718_v39  ;;  %v6829_v11 = vpop.f32.mrf.mxu1 }
 0x285   : > { %v6720_v49 = vpop.f32.mrf.mxu0  ;;  %v5149_v40 = vmax.f32 %v5029_v43, 0.0  ;;  %v6830_v42 = vadd.f32 %v6829_v11, %v6828_v10 }
 0x286   : > { %v6721_v17 = vadd.f32 %v6720_v49, %v6719_v61  ;;  %v6831_v8 = vpop.f32.mrf.mxu1 }
 0x287   : > { %v6722_v62 = vpop.f32.mrf.mxu0  ;;  %5986 = vst [vmem:[%s8305_s26 + $0x310] sm:$0xff] %v5149_v40  ;;  %v5032_v27 = vadd.f32 %v6830_v42, %v4871_v5 }
 0x288   : > { %v4876_v20 = vadd.f32 %v9265_v23, %v6721_v17  ;;  %v6832_v32 = vpop.f32.mrf.mxu1 }
 0x289   : > { %v6723_v21 = vpop.f32.mrf.mxu0  ;;  %v5150_v13 = vmax.f32 %v5032_v27, 0.0  ;;  %v6833_v6 = vadd.f32 %v6832_v32, %v6831_v8 }
 0x28a   : > { %v6724_v35 = vadd.f32 %v6723_v21, %v6722_v62  ;;  %v6834_v45 = vpop.f32.mrf.mxu1 }
 0x28b   : > { %v6725_v38 = vpop.f32.mrf.mxu0  ;;  %5987 = vst [vmem:[%s8305_s26 + $0x318] sm:$0xff] %v5150_v13  ;;  %v5037_v1 = vadd.f32 %v6833_v6, %v4876_v20 }
 0x28c   : > { %v4879_v53 = vadd.f32 %v9265_v23, %v6724_v35  ;;  %v6835_v57 = vpop.f32.mrf.mxu1 }
 0x28d   : > { %v6726_v44 = vpop.f32.mrf.mxu0  ;;  %v5151_v24 = vmax.f32 %v5037_v1, 0.0  ;;  %v6836_v16 = vadd.f32 %v6835_v57, %v6834_v45 }
 0x28e   : > { %v6727_v46 = vadd.f32 %v6726_v44, %v6725_v38  ;;  %v6837_v37 = vpop.f32.mrf.mxu1 }
 0x28f   : > { %v6728_v15 = vpop.f32.mrf.mxu0  ;;  %5988 = vst [vmem:[%s8305_s26 + $0x320] sm:$0xff] %v5151_v24  ;;  %v5040_v54 = vadd.f32 %v6836_v16, %v4879_v53 }
 0x290   : > { %v4884_v26 = vadd.f32 %v9265_v23, %v6727_v46  ;;  %v6838_v60 = vpop.f32.mrf.mxu1 }
 0x291   : > { %v6729_v31 = vpop.f32.mrf.mxu0  ;;  %v5152_v29 = vmax.f32 %v5040_v54, 0.0  ;;  %v6839_v50 = vadd.f32 %v6838_v60, %v6837_v37 }
 0x292   : > { %v6730_v0 = vadd.f32 %v6729_v31, %v6728_v15  ;;  %v6840_v7 = vpop.f32.mrf.mxu1 }
 0x293   : > { %v6731_v30 = vpop.f32.mrf.mxu0  ;;  %5989 = vst [vmem:[%s8305_s26 + $0x328] sm:$0xff] %v5152_v29  ;;  %v5045_v2 = vadd.f32 %v6839_v50, %v4884_v26 }
 0x294   : > { %v4887_v56 = vadd.f32 %v9265_v23, %v6730_v0  ;;  %v6841_v34 = vpop.f32.mrf.mxu1 }
 0x295   : > { %v6732_v33 = vpop.f32.mrf.mxu0  ;;  %v5153_v3 = vmax.f32 %v5045_v2, 0.0  ;;  %v6842_v36 = vadd.f32 %v6841_v34, %v6840_v7 }
 0x296   : > { %v6733_v63 = vadd.f32 %v6732_v33, %v6731_v30  ;;  %v6843_v4 = vpop.f32.mrf.mxu1 }
 0x297   : > { %v6734_v14 = vpop.f32.mrf.mxu0  ;;  %5990 = vst [vmem:[%s8305_s26 + $0x330] sm:$0xff] %v5153_v3  ;;  %v5048_v22 = vadd.f32 %v6842_v36, %v4887_v56 }
 0x298   : > { %v4892_v9 = vadd.f32 %v9265_v23, %v6733_v63  ;;  %v6844_v19 = vpop.f32.mrf.mxu1 }
 0x299   : > { %v6735_v52 = vpop.f32.mrf.mxu0  ;;  %v5154_v25 = vmax.f32 %v5048_v22, 0.0  ;;  %v6845_v28 = vadd.f32 %v6844_v19, %v6843_v4 }
 0x29a   : > { %v6736_v41 = vadd.f32 %v6735_v52, %v6734_v14  ;;  %v6846_v12 = vpop.f32.mrf.mxu1 }
 0x29b   : > { %v6737_v55 = vpop.f32.mrf.mxu0  ;;  %5991 = vst [vmem:[%s8305_s26 + $0x338] sm:$0xff] %v5154_v25  ;;  %v5053_v18 = vadd.f32 %v6845_v28, %v4892_v9 }
 0x29c   : > { %v4895_v51 = vadd.f32 %v9265_v23, %v6736_v41  ;;  %v6847_v47 = vpop.f32.mrf.mxu1 }
 0x29d   : > { %v6738_v58 = vpop.f32.mrf.mxu0  ;;  %v5155_v48 = vmax.f32 %v5053_v18, 0.0  ;;  %v6848_v59 = vadd.f32 %v6847_v47, %v6846_v12 }
 0x29e   : > { %v6739_v39 = vadd.f32 %v6738_v58, %v6737_v55  ;;  %v6849_v10 = vpop.f32.mrf.mxu1 }
 0x29f   : > { %v6740_v61 = vpop.f32.mrf.mxu0  ;;  %5992 = vst [vmem:[%s8305_s26 + $0x340] sm:$0xff] %v5155_v48  ;;  %v5056_v43 = vadd.f32 %v6848_v59, %v4895_v51 }
 0x2a0   : > { %v4900_v5 = vadd.f32 %v9265_v23, %v6739_v39  ;;  %v6850_v11 = vpop.f32.mrf.mxu1 }
 0x2a1   : > { %v6741_v49 = vpop.f32.mrf.mxu0  ;;  %v5156_v40 = vmax.f32 %v5056_v43, 0.0  ;;  %v6851_v42 = vadd.f32 %v6850_v11, %v6849_v10 }
 0x2a2   : > { %v6742_v17 = vadd.f32 %v6741_v49, %v6740_v61  ;;  %v6852_v8 = vpop.f32.mrf.mxu1 }
 0x2a3   : > { %v6743_v62 = vpop.f32.mrf.mxu0  ;;  %5993 = vst [vmem:[%s8305_s26 + $0x348] sm:$0xff] %v5156_v40  ;;  %v5061_v27 = vadd.f32 %v6851_v42, %v4900_v5 }
 0x2a4   : > { %v4903_v20 = vadd.f32 %v9265_v23, %v6742_v17  ;;  %v6853_v32 = vpop.f32.mrf.mxu1 }
 0x2a5   : > { %v6744_v21 = vpop.f32.mrf.mxu0  ;;  %v5157_v13 = vmax.f32 %v5061_v27, 0.0  ;;  %v6854_v6 = vadd.f32 %v6853_v32, %v6852_v8 }
 0x2a6   : > { %v6745_v35 = vadd.f32 %v6744_v21, %v6743_v62  ;;  %v6855_v45 = vpop.f32.mrf.mxu1 }
 0x2a7   : > { %v6746_v38 = vpop.f32.mrf.mxu0  ;;  %5994 = vst [vmem:[%s8305_s26 + $0x350] sm:$0xff] %v5157_v13  ;;  %v5064_v1 = vadd.f32 %v6854_v6, %v4903_v20 }
 0x2a8   : > { %v4908_v53 = vadd.f32 %v9265_v23, %v6745_v35  ;;  %v6856_v57 = vpop.f32.mrf.mxu1 }
 0x2a9   : > { %v6747_v44 = vpop.f32.mrf.mxu0  ;;  %v5158_v24 = vmax.f32 %v5064_v1, 0.0  ;;  %v6857_v16 = vadd.f32 %v6856_v57, %v6855_v45 }
 0x2aa   : > { %v6748_v46 = vadd.f32 %v6747_v44, %v6746_v38  ;;  %v6858_v37 = vpop.f32.mrf.mxu1 }
 0x2ab   : > { %v6749_v15 = vpop.f32.mrf.mxu0  ;;  %5995 = vst [vmem:[%s8305_s26 + $0x358] sm:$0xff] %v5158_v24  ;;  %v5069_v54 = vadd.f32 %v6857_v16, %v4908_v53 }
 0x2ac   : > { %v4911_v26 = vadd.f32 %v9265_v23, %v6748_v46  ;;  %v6859_v60 = vpop.f32.mrf.mxu1 }
 0x2ad   : > { %v6750_v31 = vpop.f32.mrf.mxu0  ;;  %v5159_v29 = vmax.f32 %v5069_v54, 0.0  ;;  %v6860_v50 = vadd.f32 %v6859_v60, %v6858_v37 }
 0x2ae   : > { %v6751_v0 = vadd.f32 %v6750_v31, %v6749_v15  ;;  %v6861_v7 = vpop.f32.mrf.mxu1 }
 0x2af   : > { %v6752_v30 = vpop.f32.mrf.mxu0  ;;  %5996 = vst [vmem:[%s8305_s26 + $0x360] sm:$0xff] %v5159_v29  ;;  %v5072_v2 = vadd.f32 %v6860_v50, %v4911_v26 }
 0x2b0   : > { %v4916_v56 = vadd.f32 %v9265_v23, %v6751_v0  ;;  %v6862_v34 = vpop.f32.mrf.mxu1 }
 0x2b1   : > { %v6753_v33 = vpop.f32.mrf.mxu0  ;;  %v5160_v3 = vmax.f32 %v5072_v2, 0.0  ;;  %v6863_v36 = vadd.f32 %v6862_v34, %v6861_v7 }
 0x2b2   : > { %v6754_v63 = vadd.f32 %v6753_v33, %v6752_v30  ;;  %v6864_v4 = vpop.f32.mrf.mxu1 }
 0x2b3   : > { %v6755_v14 = vpop.f32.mrf.mxu0  ;;  %5997 = vst [vmem:[%s8305_s26 + $0x368] sm:$0xff] %v5160_v3  ;;  %v5077_v22 = vadd.f32 %v6863_v36, %v4916_v56 }
 0x2b4   : > { %v4919_v9 = vadd.f32 %v9265_v23, %v6754_v63  ;;  %v6865_v19 = vpop.f32.mrf.mxu1 }
 0x2b5   : > { %v6756_v52 = vpop.f32.mrf.mxu0  ;;  %v5161_v25 = vmax.f32 %v5077_v22, 0.0  ;;  %v6866_v28 = vadd.f32 %v6865_v19, %v6864_v4 }
 0x2b6   : > { %v6757_v41 = vadd.f32 %v6756_v52, %v6755_v14  ;;  %v6867_v12 = vpop.f32.mrf.mxu1 }
 0x2b7   : > { %v6758_v55 = vpop.f32.mrf.mxu0  ;;  %5998 = vst [vmem:[%s8305_s26 + $0x370] sm:$0xff] %v5161_v25  ;;  %v5080_v18 = vadd.f32 %v6866_v28, %v4919_v9 }
 0x2b8   : > { %v4924_v51 = vadd.f32 %v9265_v23, %v6757_v41  ;;  %v6868_v47 = vpop.f32.mrf.mxu1 }
 0x2b9   : > { %v6759_v58 = vpop.f32.mrf.mxu0  ;;  %v5162_v48 = vmax.f32 %v5080_v18, 0.0  ;;  %v6869_v59 = vadd.f32 %v6868_v47, %v6867_v12 }
 0x2ba   : > { %v6760_v39 = vadd.f32 %v6759_v58, %v6758_v55  ;;  %v6870_v10 = vpop.f32.mrf.mxu1 }
 0x2bb   : > { %v6761_v61 = vpop.f32.mrf.mxu0  ;;  %5999 = vst [vmem:[%s8305_s26 + $0x378] sm:$0xff] %v5162_v48  ;;  %v5085_v43 = vadd.f32 %v6869_v59, %v4924_v51 }
 0x2bc   : > { %v4927_v5 = vadd.f32 %v9265_v23, %v6760_v39  ;;  %v6871_v11 = vpop.f32.mrf.mxu1 }
 0x2bd   : > { %v6762_v49 = vpop.f32.mrf.mxu0  ;;  %v5163_v40 = vmax.f32 %v5085_v43, 0.0  ;;  %v6872_v42 = vadd.f32 %v6871_v11, %v6870_v10 }
 0x2be   : > { %v6763_v17 = vadd.f32 %v6762_v49, %v6761_v61  ;;  %v6873_v8 = vpop.f32.mrf.mxu1 }
 0x2bf   : > { %v6764_v62 = vpop.f32.mrf.mxu0  ;;  %6000 = vst [vmem:[%s8305_s26 + $0x380] sm:$0xff] %v5163_v40  ;;  %v5088_v27 = vadd.f32 %v6872_v42, %v4927_v5 }
 0x2c0   : > { %v4932_v20 = vadd.f32 %v9265_v23, %v6763_v17  ;;  %v6874_v32 = vpop.f32.mrf.mxu1 }
 0x2c1   : > { %v6765_v21 = vpop.f32.mrf.mxu0  ;;  %v5164_v13 = vmax.f32 %v5088_v27, 0.0  ;;  %v6875_v6 = vadd.f32 %v6874_v32, %v6873_v8 }
 0x2c2   : > { %v6766_v35 = vadd.f32 %v6765_v21, %v6764_v62  ;;  %v6876_v45 = vpop.f32.mrf.mxu1 }
 0x2c3   : > { %v6767_v38 = vpop.f32.mrf.mxu0  ;;  %6001 = vst [vmem:[%s8305_s26 + $0x388] sm:$0xff] %v5164_v13  ;;  %v5093_v1 = vadd.f32 %v6875_v6, %v4932_v20 }
 0x2c4   : > { %v4935_v53 = vadd.f32 %v9265_v23, %v6766_v35  ;;  %v6877_v57 = vpop.f32.mrf.mxu1 }
 0x2c5   : > { %v6768_v44 = vpop.f32.mrf.mxu0  ;;  %v5165_v24 = vmax.f32 %v5093_v1, 0.0  ;;  %v6878_v16 = vadd.f32 %v6877_v57, %v6876_v45 }
 0x2c6   : > { %v6769_v46 = vadd.f32 %v6768_v44, %v6767_v38  ;;  %v6879_v37 = vpop.f32.mrf.mxu1 }
 0x2c7   : > { %v6770_v15 = vpop.f32.mrf.mxu0  ;;  %6002 = vst [vmem:[%s8305_s26 + $0x390] sm:$0xff] %v5165_v24  ;;  %v5096_v54 = vadd.f32 %v6878_v16, %v4935_v53 }
 0x2c8   : > { %v4940_v26 = vadd.f32 %v9265_v23, %v6769_v46  ;;  %v6880_v60 = vpop.f32.mrf.mxu1 }
 0x2c9   : > { %v6771_v31 = vpop.f32.mrf.mxu0  ;;  %v5166_v29 = vmax.f32 %v5096_v54, 0.0  ;;  %v6881_v50 = vadd.f32 %v6880_v60, %v6879_v37 }
 0x2ca   : > { %v6772_v0 = vadd.f32 %v6771_v31, %v6770_v15  ;;  %v6882_v7 = vpop.f32.mrf.mxu1 }
 0x2cb   : > { %v6773_v30 = vpop.f32.mrf.mxu0  ;;  %6003 = vst [vmem:[%s8305_s26 + $0x398] sm:$0xff] %v5166_v29  ;;  %v5101_v2 = vadd.f32 %v6881_v50, %v4940_v26 }
 0x2cc   : > { %v4943_v56 = vadd.f32 %v9265_v23, %v6772_v0  ;;  %v6883_v34 = vpop.f32.mrf.mxu1 }
 0x2cd   : > { %v6774_v33 = vpop.f32.mrf.mxu0  ;;  %v5167_v3 = vmax.f32 %v5101_v2, 0.0  ;;  %v6884_v36 = vadd.f32 %v6883_v34, %v6882_v7 }
 0x2ce   : > { %v6775_v63 = vadd.f32 %v6774_v33, %v6773_v30  ;;  %v6885_v4 = vpop.f32.mrf.mxu1 }
 0x2cf   : > { %v6776_v14 = vpop.f32.mrf.mxu0  ;;  %6004 = vst [vmem:[%s8305_s26 + $0x3a0] sm:$0xff] %v5167_v3  ;;  %v5104_v22 = vadd.f32 %v6884_v36, %v4943_v56 }
 0x2d0   : > { %v4948_v9 = vadd.f32 %v9265_v23, %v6775_v63  ;;  %v6886_v19 = vpop.f32.mrf.mxu1 }
 0x2d1   : > { %v6777_v52 = vpop.f32.mrf.mxu0  ;;  %v5168_v25 = vmax.f32 %v5104_v22, 0.0  ;;  %v6887_v28 = vadd.f32 %v6886_v19, %v6885_v4 }
 0x2d2   : > { %v6778_v41 = vadd.f32 %v6777_v52, %v6776_v14  ;;  %v6888_v12 = vpop.f32.mrf.mxu1 }
 0x2d3   : > { %v6779_v55 = vpop.f32.mrf.mxu0  ;;  %6005 = vst [vmem:[%s8305_s26 + $0x3a8] sm:$0xff] %v5168_v25  ;;  %v5109_v18 = vadd.f32 %v6887_v28, %v4948_v9  ;;  %v7195_v9 = vld [vmem:[%s9390_s2] ss:$0 sm:$0xff] }
 0x2d4   : > { %v4951_v51 = vadd.f32 %v9265_v23, %v6778_v41  ;;  %v6889_v47 = vpop.f32.mrf.mxu1 }
 0x2d5   : > { %v6780_v58 = vpop.f32.mrf.mxu0  ;;  %v5169_v48 = vmax.f32 %v5109_v18, 0.0  ;;  %v6890_v59 = vadd.f32 %v6889_v47, %v6888_v12 }
 0x2d6   : > { %v6781_v39 = vadd.f32 %v6780_v58, %v6779_v55  ;;  %v6891_v10 = vpop.f32.mrf.mxu1 }
 0x2d7   : > { %v6782_v61 = vpop.f32.mrf.mxu0  ;;  %6006 = vst [vmem:[%s8305_s26 + $0x3b0] sm:$0xff] %v5169_v48  ;;  %v5112_v43 = vadd.f32 %v6890_v59, %v4951_v51 }
 0x2d8   : > { %v4956_v5 = vadd.f32 %v9265_v23, %v6781_v39  ;;  %v6892_v11 = vpop.f32.mrf.mxu1 }
 0x2d9   : > { %v6783_v49 = vpop.f32.mrf.mxu0  ;;  %v5170_v40 = vmax.f32 %v5112_v43, 0.0  ;;  %v6893_v42 = vadd.f32 %v6892_v11, %v6891_v10 }
 0x2da   : > { %v6784_v17 = vadd.f32 %v6783_v49, %v6782_v61  ;;  %v6894_v8 = vpop.f32.mrf.mxu1 }
 0x2db   : > { %v6785_v62 = vpop.f32.mrf.mxu0  ;;  %6007 = vst [vmem:[%s8305_s26 + $0x3b8] sm:$0xff] %v5170_v40  ;;  %v5117_v27 = vadd.f32 %v6893_v42, %v4956_v5 }
 0x2dc   : > { %v4959_v20 = vadd.f32 %v9265_v23, %v6784_v17  ;;  %v6895_v32 = vpop.f32.mrf.mxu1 }
 0x2dd   : > { %v6786_v21 = vpop.f32.mrf.mxu0  ;;  %v5171_v13 = vmax.f32 %v5117_v27, 0.0  ;;  %v6896_v6 = vadd.f32 %v6895_v32, %v6894_v8 }
 0x2de   : > { %v6787_v35 = vadd.f32 %v6786_v21, %v6785_v62  ;;  %v6897_v45 = vpop.f32.mrf.mxu1 }
 0x2df   : > { %v6788_v38 = vpop.f32.mrf.mxu0  ;;  %6008 = vst [vmem:[%s8305_s26 + $0x3c0] sm:$0xff] %v5171_v13  ;;  %v5120_v1 = vadd.f32 %v6896_v6, %v4959_v20 }
 0x2e0   : > { %v4964_v53 = vadd.f32 %v9265_v23, %v6787_v35  ;;  %v6898_v57 = vpop.f32.mrf.mxu1 }
 0x2e1   : > { %v6789_v44 = vpop.f32.mrf.mxu0  ;;  %v5172_v24 = vmax.f32 %v5120_v1, 0.0  ;;  %v6899_v16 = vadd.f32 %v6898_v57, %v6897_v45 }
 0x2e2   : > { %v6790_v46 = vadd.f32 %v6789_v44, %v6788_v38  ;;  %v6900_v37 = vpop.f32.mrf.mxu1 }
 0x2e3   : > { %v6791_v15 = vpop.f32.mrf.mxu0  ;;  %6009 = vst [vmem:[%s8305_s26 + $0x3c8] sm:$0xff] %v5172_v24  ;;  %v5125_v54 = vadd.f32 %v6899_v16, %v4964_v53 }
 0x2e4   : > { %v4967_v26 = vadd.f32 %v9265_v23, %v6790_v46  ;;  %v6901_v60 = vpop.f32.mrf.mxu1 }
 0x2e5   : > { %v6792_v31 = vpop.f32.mrf.mxu0  ;;  %v5173_v29 = vmax.f32 %v5125_v54, 0.0  ;;  %v6902_v50 = vadd.f32 %v6901_v60, %v6900_v37 }
 0x2e6   : > { %v6793_v0 = vadd.f32 %v6792_v31, %v6791_v15  ;;  %v6903_v7 = vpop.f32.mrf.mxu1 }
 0x2e7   : > { %v6794_v30 = vpop.f32.mrf.mxu0  ;;  %6010 = vst [vmem:[%s8305_s26 + $0x3d0] sm:$0xff] %v5173_v29  ;;  %v5128_v2 = vadd.f32 %v6902_v50, %v4967_v26 }
 0x2e8   : > { %v4972_v56 = vadd.f32 %v9265_v23, %v6793_v0  ;;  %v6904_v34 = vpop.f32.mrf.mxu1 }
 0x2e9   : > { %v6795_v33 = vpop.f32.mrf.mxu0  ;;  %v5174_v3 = vmax.f32 %v5128_v2, 0.0  ;;  %v6905_v36 = vadd.f32 %v6904_v34, %v6903_v7 }
 0x2ea   : > { %v6796_v63 = vadd.f32 %v6795_v33, %v6794_v30  ;;  %v6906_v4 = vpop.f32.mrf.mxu1 }
 0x2eb   : > { %v6797_v14 = vpop.f32.mrf.mxu0  ;;  %6011 = vst [vmem:[%s8305_s26 + $0x3d8] sm:$0xff] %v5174_v3  ;;  %v5133_v22 = vadd.f32 %v6905_v36, %v4972_v56 }
 0x2ec   : > { %v4975_v19 = vadd.f32 %v7195_v9, %v6796_v63  ;;  %v6907_v52 = vpop.f32.mrf.mxu1 }
 0x2ed   : > { %v6798_v25 = vpop.f32.mrf.mxu0  ;;  %v5175_v28 = vmax.f32 %v5133_v22, 0.0  ;;  %v6908_v23 = vadd.f32 %v6907_v52, %v6906_v4 }
 0x2ee   : > { %v6799_v41 = vadd.f32 %v6798_v25, %v6797_v14  ;;  %v6909_v12 = vpop.f32.mrf.mxu1 }
 0x2ef   : > { %v6800_v55 = vpop.f32.mrf.mxu0  ;;  %6012 = vst [vmem:[%s8305_s26 + $0x3e0] sm:$0xff] %v5175_v28  ;;  %v5136_v18 = vadd.f32 %v6908_v23, %v4975_v19 }
 0x2f0   : > { %v4980_v51 = vadd.f32 %v7195_v9, %v6799_v41  ;;  %v6910_v47 = vpop.f32.mrf.mxu1 }
 0x2f1   : > { %v6801_v58 = vpop.f32.mrf.mxu0  ;;  %v5176_v48 = vmax.f32 %v5136_v18, 0.0  ;;  %v6911_v59 = vadd.f32 %v6910_v47, %v6909_v12 }
 0x2f2   : > { %v6802_v39 = vadd.f32 %v6801_v58, %v6800_v55  ;;  %v6912_v10 = vpop.f32.mrf.mxu1 }
 0x2f3   : > { %6013 = vst [vmem:[%s8305_s26 + $0x3e8] sm:$0xff] %v5176_v48  ;;  %v5141_v61 = vadd.f32 %v6911_v59, %v4980_v51 }
 0x2f4   : > { %v4983_v43 = vadd.f32 %v7195_v9, %v6802_v39  ;;  %v6913_v5 = vpop.f32.mrf.mxu1 }
 0x2f5   : > { %v5177_v11 = vmax.f32 %v5141_v61, 0.0  ;;  %v6914_v49 = vadd.f32 %v6913_v5, %v6912_v10 }
 0x2f7   : > { %6014 = vst [vmem:[%s8305_s26 + $0x3f0] sm:$0xff] %v5177_v11  ;;  %v5144_v40 = vadd.f32 %v6914_v49, %v4983_v43 }
 0x2f9   : > { %v5178_v42 = vmax.f32 %v5144_v40, 0.0 }
 0x2fb   : > { %6015 = vst [vmem:[%s8305_s26 + $0x3f8] sm:$0xff] %v5178_v42 }
 0x2fc PF: > { %s13_s12 = sadd.s32 1, %s7202_s12  }
 0x2fd   : > { %p10_p5 = scmp.ge.s32.totalorder %s13_s12, 4  }
 0x2ff   :  { %12 = sbr.rel (!%p10_p5) target bundleno = 1 (0x1), region = 70 }

</bundles_post_ra>
